<compile_context>
chip_gen: v7x
topology: tpu7x:2x2x1
jax: 0.10.0
libtpu: 0.0.40
codegen_flags: <defaults>
</compile_context>

<pallas_src>
import functools

import jax
import jax.numpy as jnp
from jax.experimental import pallas as pl
from jax.experimental.pallas import tpu as pltpu

LANE = 128
_COMPILER_PARAMS = pltpu.CompilerParams(vmem_limit_bytes=32 * 1024 * 1024)


def _round_up(v, m):
    return (v + m - 1) // m * m


def _pad_lanes(x):
    """Zero-pad the last dim up to a multiple of 128 lanes."""
    n = _round_up(x.shape[-1], LANE)
    pad = n - x.shape[-1]
    if pad == 0:
        return x
    cfg = [(0, 0)] * (x.ndim - 1) + [(0, pad)]
    return jnp.pad(x, cfg)


# ----------------------------------------------------------------------------
# Pallas kernels
# ----------------------------------------------------------------------------
def _fused_layer_kernel(x_ref, w_ref, b_ref, g_ref, be_ref, o_ref, *,
                        use_tanh, use_bn, eps):
    # bf16 operands, f32 accumulation on the MXU.
    acc = jnp.dot(x_ref[...], w_ref[...], preferred_element_type=jnp.float32)
    acc = acc + b_ref[...]
    if use_tanh:
        acc = jnp.tanh(acc)
    if use_bn:
        # Training-mode BatchNorm2d over the (N*H*W) rows of this slab.
        mean = jnp.mean(acc, axis=0, keepdims=True)
        xc = acc - mean
        var = jnp.mean(xc * xc, axis=0, keepdims=True)   # biased (torch train)
        acc = xc * jax.lax.rsqrt(var + eps) * g_ref[...] + be_ref[...]
    o_ref[...] = acc


def fused_matmul_tanh_bn(x, w, b, g, be, *, use_tanh, use_bn, eps=1e-5,
                         tile_m=256):
    """out = BN(tanh(x @ w + b)).  x:(M,K) bf16, w:(K,Np) bf16, b/g/be:(1,Np) f32.

    Np is a multiple of 128 (lane-dense stores). When BN is off, the M axis is
    tiled with a "parallel" grid so v7x can use both TensorCores.
    """
    M, K = x.shape
    Np = w.shape[1]
    kern = functools.partial(_fused_layer_kernel, use_tanh=use_tanh,
                             use_bn=use_bn, eps=eps)

    if (not use_bn) and M > tile_m and M % tile_m == 0:
        return pl.pallas_call(
            kern,
            out_shape=jax.ShapeDtypeStruct((M, Np), jnp.float32),
            grid_spec=pltpu.PrefetchScalarGridSpec(
                num_scalar_prefetch=0, grid=(M // tile_m,),
                in_specs=[pl.BlockSpec((tile_m, K), lambda i: (i, 0)),
                          pl.BlockSpec((K, Np), lambda i: (0, 0)),
                          pl.BlockSpec((1, Np), lambda i: (0, 0)),
                          pl.BlockSpec((1, Np), lambda i: (0, 0)),
                          pl.BlockSpec((1, Np), lambda i: (0, 0))],
                out_specs=pl.BlockSpec((tile_m, Np), lambda i: (i, 0))),
            compiler_params=pltpu.CompilerParams(
                dimension_semantics=("parallel",),
                vmem_limit_bytes=32 * 1024 * 1024),
        )(x, w, b, g, be)

    # Whole-slab path: the fused BN reduces over all M rows, so the slab must
    # be resident.  Fine at these shapes (largest slab < 1 MiB).
    # TODO(synk): for large batches switch to a two-pass (stats, normalize)
    # tiled BN so this path can also be gridded over M.
    return pl.pallas_call(
        kern,
        out_shape=jax.ShapeDtypeStruct((M, Np), jnp.float32),
        in_specs=[pl.BlockSpec(memory_space=pltpu.MemorySpace.VMEM)] * 5,
        out_specs=pl.BlockSpec(memory_space=pltpu.MemorySpace.VMEM),
        compiler_params=_COMPILER_PARAMS,
    )(x, w, b, g, be)


def _bn_kernel(x_ref, g_ref, b_ref, o_ref, *, eps):
    x = x_ref[...]
    mean = jnp.mean(x, axis=0, keepdims=True)
    xc = x - mean
    var = jnp.mean(xc * xc, axis=0, keepdims=True)
    o_ref[...] = xc * jax.lax.rsqrt(var + eps) * g_ref[...] + b_ref[...]


def batchnorm_rows(x2d, gamma_row, beta_row, eps=1e-5):
    """BatchNorm over rows; channels are pre-padded to 128 lanes (dense)."""
    R, C = x2d.shape
    return pl.pallas_call(
        functools.partial(_bn_kernel, eps=eps),
        out_shape=jax.ShapeDtypeStruct((R, C), jnp.float32),
        in_specs=[pl.BlockSpec(memory_space=pltpu.MemorySpace.VMEM)] * 3,
        out_specs=pl.BlockSpec(memory_space=pltpu.MemorySpace.VMEM),
        compiler_params=_COMPILER_PARAMS,
    )(x2d, gamma_row, beta_row)


def _rsr_fc_kernel(y_ref, a_ref, fw_ref, fb_ref, yr_ref, h_ref):
    # RSR projection:  y_rsr = y @ A           (renorm=False, so z = y_rsr)
    yr = jnp.dot(y_ref[...], a_ref[...], preferred_element_type=jnp.float32)
    yr_ref[...] = yr
    # Decoder fc + tanh, chained without leaving the kernel.
    h = jnp.dot(yr.astype(jnp.bfloat16), fw_ref[...],
                preferred_element_type=jnp.float32) + fb_ref[...]
    h_ref[...] = jnp.tanh(h)


def rsr_and_fc(y_bf16, a_p, fw_p, fb_p):
    B = y_bf16.shape[0]
    Zp = a_p.shape[1]
    Hp = fw_p.shape[1]
    return pl.pallas_call(
        _rsr_fc_kernel,
        out_shape=(jax.ShapeDtypeStruct((B, Zp), jnp.float32),
                   jax.ShapeDtypeStruct((B, Hp), jnp.float32)),
        in_specs=[pl.BlockSpec(memory_space=pltpu.MemorySpace.VMEM)] * 4,
        out_specs=(pl.BlockSpec(memory_space=pltpu.MemorySpace.VMEM),
                   pl.BlockSpec(memory_space=pltpu.MemorySpace.VMEM)),
        compiler_params=_COMPILER_PARAMS,
    )(y_bf16, a_p, fw_p, fb_p)


# ----------------------------------------------------------------------------
# Conv / ConvTranspose wrappers (im2col glue in bf16 + one fused kernel each)
# ----------------------------------------------------------------------------
def _im2col(x_nhwc, K, stride):
    # TODO(synk): move im2col inside the Pallas kernel (strided in-VMEM gather
    # over (kh,kw)) to avoid materializing the K^2 patch blow-up through HBM.
    N, H, W, C = x_nhwc.shape
    Ho = (H - K) // stride + 1
    Wo = (W - K) // stride + 1
    cols = []
    for kh in range(K):
        for kw in range(K):
            cols.append(x_nhwc[:, kh:kh + stride * (Ho - 1) + 1:stride,
                               kw:kw + stride * (Wo - 1) + 1:stride, :])
    patches = jnp.concatenate(cols, axis=-1)          # (N,Ho,Wo,K*K*C)
    return patches.reshape(N * Ho * Wo, K * K * C), Ho, Wo


def conv2d_fused(x_nhwc, lp, *, K, cout, stride, pad, use_bn=True,
                 use_tanh=True):
    """PyTorch Conv2d -> tanh -> BN, one fused Pallas kernel."""
    N = x_nhwc.shape[0]
    xp = jnp.pad(x_nhwc.astype(jnp.bfloat16),
                 ((0, 0), (pad, pad), (pad, pad), (0, 0)))
    patches, Ho, Wo = _im2col(xp, K, stride)
    out = fused_matmul_tanh_bn(patches, lp["w"], lp["b"], lp["g"], lp["be"],
                               use_tanh=use_tanh, use_bn=use_bn)
    return out.reshape(N, Ho, Wo, -1)[..., :cout]


def conv_transpose2d_fused(x_nhwc, lp, *, K, cout, stride, pad, output_pad,
                           use_bn=True, use_tanh=True):
    """PyTorch ConvTranspose2d -> tanh -> BN, one fused Pallas kernel.
    Implemented as dilate-by-stride + pad + stride-1 conv with flipped kernel
    (kernel pre-flipped/reshaped at init)."""
    # TODO(synk): replace zero-dilation with a sub-pixel (per-output-phase)
    # decomposition to avoid ~75% wasted MXU work at stride 2.
    N, H, W, C = x_nhwc.shape
    x = x_nhwc.astype(jnp.bfloat16)
    Hd = (H - 1) * stride + 1
    Wd = (W - 1) * stride + 1
    xd = jnp.zeros((N, Hd, Wd, C), jnp.bfloat16).at[:, ::stride, ::stride, :].set(x)
    p = K - 1 - pad
    xp = jnp.pad(xd, ((0, 0), (p, p + output_pad), (p, p + output_pad), (0, 0)))
    patches, Ho, Wo = _im2col(xp, K, 1)
    out = fused_matmul_tanh_bn(patches, lp["w"], lp["b"], lp["g"], lp["be"],
                               use_tanh=use_tanh, use_bn=use_bn)
    return out.reshape(N, Ho, Wo, -1)[..., :cout]


# ----------------------------------------------------------------------------
# Parameters: deterministic synthetic init (torch layout) + kernel-ready prep
# ----------------------------------------------------------------------------
def init_rsrae_params(key, input_shape, hls, z_channels):
    h, w, c = input_shape
    h_shape = (hls[2], h // 8, w // 8)
    h_channels = h_shape[0] * h_shape[1] * h_shape[2]
    ks = jax.random.split(key, 16)
    rn = lambda k, s, sc=0.1: sc * jax.random.normal(k, s, jnp.float32)
    return {
        "enc_w1": rn(ks[0], (hls[0], c, 5, 5)), "enc_b1": rn(ks[1], (hls[0],)),
        "enc_g1": jnp.ones((hls[0],), jnp.float32), "enc_be1": jnp.zeros((hls[0],), jnp.float32),
        "enc_w2": rn(ks[2], (hls[1], hls[0], 5, 5)), "enc_b2": rn(ks[3], (hls[1],)),
        "enc_g2": jnp.ones((hls[1],), jnp.float32), "enc_be2": jnp.zeros((hls[1],), jnp.float32),
        "enc_w3": rn(ks[4], (hls[2], hls[1], 3, 3)), "enc_b3": rn(ks[5], (hls[2],)),
        "enc_g3": jnp.ones((hls[2],), jnp.float32), "enc_be3": jnp.zeros((hls[2],), jnp.float32),
        "A": jax.random.normal(ks[6], (h_channels, z_channels), jnp.float32),
        "fc_w": rn(ks[7], (z_channels, h_channels)), "fc_b": rn(ks[8], (h_channels,)),
        "dec_bn_g": jnp.ones((hls[2],), jnp.float32), "dec_bn_b": jnp.zeros((hls[2],), jnp.float32),
        "dec_w1": rn(ks[9], (hls[2], hls[1], 3, 3)), "dec_b1": rn(ks[10], (hls[1],)),
        "dec_g1": jnp.ones((hls[1],), jnp.float32), "dec_be1": jnp.zeros((hls[1],), jnp.float32),
        "dec_w2": rn(ks[11], (hls[1], hls[0], 5, 5)), "dec_b2": rn(ks[12], (hls[0],)),
        "dec_g2": jnp.ones((hls[0],), jnp.float32), "dec_be2": jnp.zeros((hls[0],), jnp.float32),
        "dec_w3": rn(ks[13], (hls[0], c, 5, 5)), "dec_b3": rn(ks[14], (c,)),
    }


def _prep_conv(w_oikk, b, g, be):
    Cout, Cin, K, _ = w_oikk.shape
    wmat = jnp.transpose(w_oikk, (2, 3, 1, 0)).reshape(K * K * Cin, Cout)
    return {"w": _pad_lanes(wmat).astype(jnp.bfloat16),
            "b": _pad_lanes(b.reshape(1, -1)).astype(jnp.float32),
            "g": _pad_lanes(g.reshape(1, -1)).astype(jnp.float32),
            "be": _pad_lanes(be.reshape(1, -1)).astype(jnp.float32)}


def _prep_deconv(w_iokk, b, g, be):
    Cin, Cout, K, _ = w_iokk.shape
    wf = jnp.flip(w_iokk, axis=(2, 3))                     # flipped kernel
    wmat = jnp.transpose(wf, (2, 3, 0, 1)).reshape(K * K * Cin, Cout)
    return {"w": _pad_lanes(wmat).astype(jnp.bfloat16),
            "b": _pad_lanes(b.reshape(1, -1)).astype(jnp.float32),
            "g": _pad_lanes(g.reshape(1, -1)).astype(jnp.float32),
            "be": _pad_lanes(be.reshape(1, -1)).astype(jnp.float32)}


def preprocess_params(params, input_shape, hls, z_channels):
    h, w, c = input_shape
    C = hls[2]
    hh, ww = h // 8, w // 8
    zp = _round_up(z_channels, LANE)
    cpad = _round_up(C, LANE)

    prep = {
        "enc1": _prep_conv(params["enc_w1"], params["enc_b1"], params["enc_g1"], params["enc_be1"]),
        "enc2": _prep_conv(params["enc_w2"], params["enc_b2"], params["enc_g2"], params["enc_be2"]),
        "enc3": _prep_conv(params["enc_w3"], params["enc_b3"], params["enc_g3"], params["enc_be3"]),
        "dec1": _prep_deconv(params["dec_w1"], params["dec_b1"], params["dec_g1"], params["dec_be1"]),
        "dec2": _prep_deconv(params["dec_w2"], params["dec_b2"], params["dec_g2"], params["dec_be2"]),
        "dec3": _prep_deconv(params["dec_w3"], params["dec_b3"],
                             jnp.ones((c,), jnp.float32), jnp.zeros((c,), jnp.float32)),
    }
    # RSR projection A: rows in NCHW-flatten order (matches y), z padded to 128.
    prep["A"] = _pad_lanes(params["A"]).astype(jnp.bfloat16)
    # Decoder fc: torch column order is NCHW (ch, ih, iw). Permute columns to
    # NHWC with channels padded to 128 per spatial position so the output
    # reshapes into a lane-dense NHWC map (no transpose, dense BN).
    fw = params["fc_w"].reshape(z_channels, C, hh, ww)
    fw = jnp.transpose(fw, (0, 2, 3, 1))                   # (z, hh, ww, C)
    fw = jnp.pad(fw, ((0, zp - z_channels), (0, 0), (0, 0), (0, cpad - C)))
    prep["fc_w"] = fw.reshape(zp, hh * ww * cpad).astype(jnp.bfloat16)
    fb = jnp.transpose(params["fc_b"].reshape(C, hh, ww), (1, 2, 0))
    fb = jnp.pad(fb, ((0, 0), (0, 0), (0, cpad - C)))
    prep["fc_b"] = fb.reshape(1, hh * ww * cpad).astype(jnp.float32)
    prep["dec_bn_g"] = _pad_lanes(params["dec_bn_g"].reshape(1, -1)).astype(jnp.float32)
    prep["dec_bn_b"] = _pad_lanes(params["dec_bn_b"].reshape(1, -1)).astype(jnp.float32)
    return prep


# ----------------------------------------------------------------------------
# Forward
# ----------------------------------------------------------------------------
def rsrae_forward(prep, x_nchw, input_shape, hls, z_channels):
    h, w, c = input_shape
    pad_mode = 1 if h % 8 == 0 else 0
    B = x_nchw.shape[0]
    C = hls[2]
    hh, ww = h // 8, w // 8
    cpad = _round_up(C, LANE)

    x = jnp.transpose(x_nchw, (0, 2, 3, 1))                # NCHW -> NHWC (boundary)

    # ---- encoder: each layer = ONE fused Pallas kernel (conv+bias+tanh+BN) ----
    e = conv2d_fused(x, prep["enc1"], K=5, cout=hls[0], stride=2, pad=2)
    e = conv2d_fused(e, prep["enc2"], K=5, cout=hls[1], stride=2, pad=2)
    e = conv2d_fused(e, prep["enc3"], K=3, cout=hls[2], stride=2, pad=pad_mode)

    # y in torch NCHW-flatten order (y itself is a returned tensor).
    y = jnp.transpose(e, (0, 3, 1, 2)).reshape(B, -1)

    # ---- RSR projection + decoder fc + tanh, fused in one kernel ----
    yr_p, h_p = rsr_and_fc(y.astype(jnp.bfloat16), prep["A"],
                           prep["fc_w"], prep["fc_b"])
    y_rsr = yr_p[:, :z_channels]
    z = y_rsr                                              # renorm=False
    # TODO(synk): l2_norm branch (renorm=True) not exercised; module default is False.

    # ---- decoder BN on the fc output (lane-dense: channels padded to 128) ----
    hmap = batchnorm_rows(h_p.reshape(B * hh * ww, cpad),
                          prep["dec_bn_g"], prep["dec_bn_b"])
    hmap = hmap.reshape(B, hh, ww, cpad)[..., :C]          # NHWC, no transpose

    # ---- decoder deconv stack: fused deconv+bias+tanh+BN per layer ----
    d = conv_transpose2d_fused(hmap, prep["dec1"], K=3, cout=hls[1], stride=2,
                               pad=pad_mode, output_pad=pad_mode)
    d = conv_transpose2d_fused(d, prep["dec2"], K=5, cout=hls[0], stride=2,
                               pad=2, output_pad=1)
    d = conv_transpose2d_fused(d, prep["dec3"], K=5, cout=c, stride=2,
                               pad=2, output_pad=1, use_bn=False)

    x_r = jnp.transpose(d, (0, 3, 1, 2))                   # NHWC -> NCHW (boundary)
    return y, y_rsr, z, x_r


# ----------------------------------------------------------------------------
if __name__ == "__main__":
    input_shape = (16, 16, 4)            # H, W, C
    hidden_layer_sizes = [8, 16, 32]
    z_channels = 10
    batch = 2

    key = jax.random.PRNGKey(0)
    k_param, k_x = jax.random.split(key)
    raw = init_rsrae_params(k_param, input_shape, hidden_layer_sizes, z_channels)
    prep = preprocess_params(raw, input_shape, hidden_layer_sizes, z_channels)
    x = jax.random.normal(k_x, (batch, input_shape[2], input_shape[0], input_shape[1]),
                          jnp.float32)   # NCHW, like torch

    fwd = jax.jit(functools.partial(rsrae_forward, input_shape=input_shape,
                                    hls=hidden_layer_sizes, z_channels=z_channels))
    y, y_rsr, z, x_r = fwd(prep, x)
    jax.block_until_ready((y, y_rsr, z, x_r))

    assert y.shape == (batch, hidden_layer_sizes[2] * (input_shape[0] // 8) * (input_shape[1] // 8))
    assert y_rsr.shape == (batch, z_channels)
    assert z.shape == (batch, z_channels)
    assert x_r.shape == (batch, input_shape[2], input_shape[0], input_shape[1])
    print("KERNEL_OK")
</pallas_src>

<mosaic_0001>
module attributes {stable_mosaic.version = 11 : i64} {
  func.func @_fused_layer_kernel(%arg0: memref<128x100xbf16, #tpu.memory_space<vmem>>, %arg1: memref<100x128xbf16, #tpu.memory_space<vmem>>, %arg2: memref<1x128xf32, #tpu.memory_space<vmem>>, %arg3: memref<1x128xf32, #tpu.memory_space<vmem>>, %arg4: memref<1x128xf32, #tpu.memory_space<vmem>>, %arg5: memref<128x128xf32, #tpu.memory_space<vmem>>) attributes {dimension_semantics = [], scalar_prefetch = 0 : i64, scratch_operands = 0 : i64, tpu.core_type = #tpu.core_type<tc>} {
    %c0 = arith.constant 0 : index
    %c0_0 = arith.constant 0 : index
    %0 = vector.load %arg0[%c0, %c0_0] : memref<128x100xbf16, #tpu.memory_space<vmem>>, vector<128x100xbf16>
    %c0_1 = arith.constant 0 : index
    %c0_2 = arith.constant 0 : index
    %1 = vector.load %arg1[%c0_1, %c0_2] : memref<100x128xbf16, #tpu.memory_space<vmem>>, vector<100x128xbf16>
    %cst = arith.constant dense<0.000000e+00> : vector<128x128xf32>
    %2 = tpu.matmul %0, %1, %cst {dimension_numbers = #tpu.dot_dimension_numbers<[1], [0], [0], [1], [0, 0, 1, 1], [], []>} : vector<128x100xbf16>, vector<100x128xbf16>, vector<128x128xf32> -> vector<128x128xf32>
    %c0_3 = arith.constant 0 : index
    %c0_4 = arith.constant 0 : index
    %3 = vector.load %arg2[%c0_3, %c0_4] : memref<1x128xf32, #tpu.memory_space<vmem>>, vector<1x128xf32>
    %4 = vector.broadcast %3 : vector<1x128xf32> to vector<128x128xf32>
    %5 = arith.addf %2, %4 : vector<128x128xf32>
    %6 = math.tanh %5 : vector<128x128xf32>
    %cst_5 = arith.constant dense<0.000000e+00> : vector<128xf32>
    %7 = vector.multi_reduction <add>, %6, %cst_5 [0] : vector<128x128xf32> to vector<128xf32>
    %8 = vector.shape_cast %7 : vector<128xf32> to vector<1x128xf32>
    %cst_6 = arith.constant 1.280000e+02 : f32
    %9 = vector.broadcast %cst_6 : f32 to vector<1x128xf32>
    %10 = arith.divf %8, %9 : vector<1x128xf32>
    %11 = vector.broadcast %10 : vector<1x128xf32> to vector<128x128xf32>
    %12 = arith.subf %6, %11 : vector<128x128xf32>
    %13 = arith.mulf %12, %12 : vector<128x128xf32>
    %cst_7 = arith.constant dense<0.000000e+00> : vector<128xf32>
    %14 = vector.multi_reduction <add>, %13, %cst_7 [0] : vector<128x128xf32> to vector<128xf32>
    %15 = vector.shape_cast %14 : vector<128xf32> to vector<1x128xf32>
    %cst_8 = arith.constant 1.280000e+02 : f32
    %16 = vector.broadcast %cst_8 : f32 to vector<1x128xf32>
    %17 = arith.divf %15, %16 : vector<1x128xf32>
    %cst_9 = arith.constant 9.99999974E-6 : f32
    %18 = vector.broadcast %cst_9 : f32 to vector<1x128xf32>
    %19 = arith.addf %17, %18 : vector<1x128xf32>
    %20 = math.rsqrt %19 : vector<1x128xf32>
    %21 = vector.broadcast %20 : vector<1x128xf32> to vector<128x128xf32>
    %22 = arith.mulf %12, %21 : vector<128x128xf32>
    %c0_10 = arith.constant 0 : index
    %c0_11 = arith.constant 0 : index
    %23 = vector.load %arg3[%c0_10, %c0_11] : memref<1x128xf32, #tpu.memory_space<vmem>>, vector<1x128xf32>
    %24 = vector.broadcast %23 : vector<1x128xf32> to vector<128x128xf32>
    %25 = arith.mulf %22, %24 : vector<128x128xf32>
    %c0_12 = arith.constant 0 : index
    %c0_13 = arith.constant 0 : index
    %26 = vector.load %arg4[%c0_12, %c0_13] : memref<1x128xf32, #tpu.memory_space<vmem>>, vector<1x128xf32>
    %27 = vector.broadcast %26 : vector<1x128xf32> to vector<128x128xf32>
    %28 = arith.addf %25, %27 : vector<128x128xf32>
    %c0_14 = arith.constant 0 : index
    %c0_15 = arith.constant 0 : index
    %29 = vector.load %arg5[%c0_14, %c0_15] : memref<128x128xf32, #tpu.memory_space<vmem>>, vector<128x128xf32>
    tpu.vector_store %arg5[%c0_14, %c0_15], %28 {strides = array<i32>} : memref<128x128xf32, #tpu.memory_space<vmem>>, vector<128x128xf32>,
    return
  }
}

module attributes {stable_mosaic.version = 11 : i64} {
  func.func @_fused_layer_kernel(%arg0: memref<32x200xbf16, #tpu.memory_space<vmem>>, %arg1: memref<200x128xbf16, #tpu.memory_space<vmem>>, %arg2: memref<1x128xf32, #tpu.memory_space<vmem>>, %arg3: memref<1x128xf32, #tpu.memory_space<vmem>>, %arg4: memref<1x128xf32, #tpu.memory_space<vmem>>, %arg5: memref<32x128xf32, #tpu.memory_space<vmem>>) attributes {dimension_semantics = [], scalar_prefetch = 0 : i64, scratch_operands = 0 : i64, tpu.core_type = #tpu.core_type<tc>} {
    %c0 = arith.constant 0 : index
    %c0_0 = arith.constant 0 : index
    %0 = vector.load %arg0[%c0, %c0_0] : memref<32x200xbf16, #tpu.memory_space<vmem>>, vector<32x200xbf16>
    %c0_1 = arith.constant 0 : index
    %c0_2 = arith.constant 0 : index
    %1 = vector.load %arg1[%c0_1, %c0_2] : memref<200x128xbf16, #tpu.memory_space<vmem>>, vector<200x128xbf16>
    %cst = arith.constant dense<0.000000e+00> : vector<32x128xf32>
    %2 = tpu.matmul %0, %1, %cst {dimension_numbers = #tpu.dot_dimension_numbers<[1], [0], [0], [1], [0, 0, 1, 1], [], []>} : vector<32x200xbf16>, vector<200x128xbf16>, vector<32x128xf32> -> vector<32x128xf32>
    %c0_3 = arith.constant 0 : index
    %c0_4 = arith.constant 0 : index
    %3 = vector.load %arg2[%c0_3, %c0_4] : memref<1x128xf32, #tpu.memory_space<vmem>>, vector<1x128xf32>
    %4 = vector.broadcast %3 : vector<1x128xf32> to vector<32x128xf32>
    %5 = arith.addf %2, %4 : vector<32x128xf32>
    %6 = math.tanh %5 : vector<32x128xf32>
    %cst_5 = arith.constant dense<0.000000e+00> : vector<128xf32>
    %7 = vector.multi_reduction <add>, %6, %cst_5 [0] : vector<32x128xf32> to vector<128xf32>
    %8 = vector.shape_cast %7 : vector<128xf32> to vector<1x128xf32>
    %cst_6 = arith.constant 3.200000e+01 : f32
    %9 = vector.broadcast %cst_6 : f32 to vector<1x128xf32>
    %10 = arith.divf %8, %9 : vector<1x128xf32>
    %11 = vector.broadcast %10 : vector<1x128xf32> to vector<32x128xf32>
    %12 = arith.subf %6, %11 : vector<32x128xf32>
    %13 = arith.mulf %12, %12 : vector<32x128xf32>
    %cst_7 = arith.constant dense<0.000000e+00> : vector<128xf32>
    %14 = vector.multi_reduction <add>, %13, %cst_7 [0] : vector<32x128xf32> to vector<128xf32>
    %15 = vector.shape_cast %14 : vector<128xf32> to vector<1x128xf32>
    %cst_8 = arith.constant 3.200000e+01 : f32
    %16 = vector.broadcast %cst_8 : f32 to vector<1x128xf32>
    %17 = arith.divf %15, %16 : vector<1x128xf32>
    %cst_9 = arith.constant 9.99999974E-6 : f32
    %18 = vector.broadcast %cst_9 : f32 to vector<1x128xf32>
    %19 = arith.addf %17, %18 : vector<1x128xf32>
    %20 = math.rsqrt %19 : vector<1x128xf32>
    %21 = vector.broadcast %20 : vector<1x128xf32> to vector<32x128xf32>
    %22 = arith.mulf %12, %21 : vector<32x128xf32>
    %c0_10 = arith.constant 0 : index
    %c0_11 = arith.constant 0 : index
    %23 = vector.load %arg3[%c0_10, %c0_11] : memref<1x128xf32, #tpu.memory_space<vmem>>, vector<1x128xf32>
    %24 = vector.broadcast %23 : vector<1x128xf32> to vector<32x128xf32>
    %25 = arith.mulf %22, %24 : vector<32x128xf32>
    %c0_12 = arith.constant 0 : index
    %c0_13 = arith.constant 0 : index
    %26 = vector.load %arg4[%c0_12, %c0_13] : memref<1x128xf32, #tpu.memory_space<vmem>>, vector<1x128xf32>
    %27 = vector.broadcast %26 : vector<1x128xf32> to vector<32x128xf32>
    %28 = arith.addf %25, %27 : vector<32x128xf32>
    %c0_14 = arith.constant 0 : index
    %c0_15 = arith.constant 0 : index
    %29 = vector.load %arg5[%c0_14, %c0_15] : memref<32x128xf32, #tpu.memory_space<vmem>>, vector<32x128xf32>
    tpu.vector_store %arg5[%c0_14, %c0_15], %28 {strides = array<i32>} : memref<32x128xf32, #tpu.memory_space<vmem>>, vector<32x128xf32>,
    return
  }
}

module attributes {stable_mosaic.version = 11 : i64} {
  func.func @_fused_layer_kernel(%arg0: memref<8x144xbf16, #tpu.memory_space<vmem>>, %arg1: memref<144x128xbf16, #tpu.memory_space<vmem>>, %arg2: memref<1x128xf32, #tpu.memory_space<vmem>>, %arg3: memref<1x128xf32, #tpu.memory_space<vmem>>, %arg4: memref<1x128xf32, #tpu.memory_space<vmem>>, %arg5: memref<8x128xf32, #tpu.memory_space<vmem>>) attributes {dimension_semantics = [], scalar_prefetch = 0 : i64, scratch_operands = 0 : i64, tpu.core_type = #tpu.core_type<tc>} {
    %c0 = arith.constant 0 : index
    %c0_0 = arith.constant 0 : index
    %0 = vector.load %arg0[%c0, %c0_0] : memref<8x144xbf16, #tpu.memory_space<vmem>>, vector<8x144xbf16>
    %c0_1 = arith.constant 0 : index
    %c0_2 = arith.constant 0 : index
    %1 = vector.load %arg1[%c0_1, %c0_2] : memref<144x128xbf16, #tpu.memory_space<vmem>>, vector<144x128xbf16>
    %cst = arith.constant dense<0.000000e+00> : vector<8x128xf32>
    %2 = tpu.matmul %0, %1, %cst {dimension_numbers = #tpu.dot_dimension_numbers<[1], [0], [0], [1], [0, 0, 1, 1], [], []>} : vector<8x144xbf16>, vector<144x128xbf16>, vector<8x128xf32> -> vector<8x128xf32>
    %c0_3 = arith.constant 0 : index
    %c0_4 = arith.constant 0 : index
    %3 = vector.load %arg2[%c0_3, %c0_4] : memref<1x128xf32, #tpu.memory_space<vmem>>, vector<1x128xf32>
    %4 = vector.broadcast %3 : vector<1x128xf32> to vector<8x128xf32>
    %5 = arith.addf %2, %4 : vector<8x128xf32>
    %6 = math.tanh %5 : vector<8x128xf32>
    %cst_5 = arith.constant dense<0.000000e+00> : vector<128xf32>
    %7 = vector.multi_reduction <add>, %6, %cst_5 [0] : vector<8x128xf32> to vector<128xf32>
    %8 = vector.shape_cast %7 : vector<128xf32> to vector<1x128xf32>
    %cst_6 = arith.constant 8.000000e+00 : f32
    %9 = vector.broadcast %cst_6 : f32 to vector<1x128xf32>
    %10 = arith.divf %8, %9 : vector<1x128xf32>
    %11 = vector.broadcast %10 : vector<1x128xf32> to vector<8x128xf32>
    %12 = arith.subf %6, %11 : vector<8x128xf32>
    %13 = arith.mulf %12, %12 : vector<8x128xf32>
    %cst_7 = arith.constant dense<0.000000e+00> : vector<128xf32>
    %14 = vector.multi_reduction <add>, %13, %cst_7 [0] : vector<8x128xf32> to vector<128xf32>
    %15 = vector.shape_cast %14 : vector<128xf32> to vector<1x128xf32>
    %cst_8 = arith.constant 8.000000e+00 : f32
    %16 = vector.broadcast %cst_8 : f32 to vector<1x128xf32>
    %17 = arith.divf %15, %16 : vector<1x128xf32>
    %cst_9 = arith.constant 9.99999974E-6 : f32
    %18 = vector.broadcast %cst_9 : f32 to vector<1x128xf32>
    %19 = arith.addf %17, %18 : vector<1x128xf32>
    %20 = math.rsqrt %19 : vector<1x128xf32>
    %21 = vector.broadcast %20 : vector<1x128xf32> to vector<8x128xf32>
    %22 = arith.mulf %12, %21 : vector<8x128xf32>
    %c0_10 = arith.constant 0 : index
    %c0_11 = arith.constant 0 : index
    %23 = vector.load %arg3[%c0_10, %c0_11] : memref<1x128xf32, #tpu.memory_space<vmem>>, vector<1x128xf32>
    %24 = vector.broadcast %23 : vector<1x128xf32> to vector<8x128xf32>
    %25 = arith.mulf %22, %24 : vector<8x128xf32>
    %c0_12 = arith.constant 0 : index
    %c0_13 = arith.constant 0 : index
    %26 = vector.load %arg4[%c0_12, %c0_13] : memref<1x128xf32, #tpu.memory_space<vmem>>, vector<1x128xf32>
    %27 = vector.broadcast %26 : vector<1x128xf32> to vector<8x128xf32>
    %28 = arith.addf %25, %27 : vector<8x128xf32>
    %c0_14 = arith.constant 0 : index
    %c0_15 = arith.constant 0 : index
    %29 = vector.load %arg5[%c0_14, %c0_15] : memref<8x128xf32, #tpu.memory_space<vmem>>, vector<8x128xf32>
    tpu.vector_store %arg5[%c0_14, %c0_15], %28 {strides = array<i32>} : memref<8x128xf32, #tpu.memory_space<vmem>>, vector<8x128xf32>,
    return
  }
}

module attributes {stable_mosaic.version = 11 : i64} {
  func.func @_rsr_fc_kernel(%arg0: memref<2x128xbf16, #tpu.memory_space<vmem>>, %arg1: memref<128x128xbf16, #tpu.memory_space<vmem>>, %arg2: memref<128x512xbf16, #tpu.memory_space<vmem>>, %arg3: memref<1x512xf32, #tpu.memory_space<vmem>>, %arg4: memref<2x128xf32, #tpu.memory_space<vmem>>, %arg5: memref<2x512xf32, #tpu.memory_space<vmem>>) attributes {dimension_semantics = [], scalar_prefetch = 0 : i64, scratch_operands = 0 : i64, tpu.core_type = #tpu.core_type<tc>} {
    %c0 = arith.constant 0 : index
    %c0_0 = arith.constant 0 : index
    %0 = vector.load %arg0[%c0, %c0_0] : memref<2x128xbf16, #tpu.memory_space<vmem>>, vector<2x128xbf16>
    %c0_1 = arith.constant 0 : index
    %c0_2 = arith.constant 0 : index
    %1 = vector.load %arg1[%c0_1, %c0_2] : memref<128x128xbf16, #tpu.memory_space<vmem>>, vector<128x128xbf16>
    %cst = arith.constant dense<0.000000e+00> : vector<2x128xf32>
    %2 = tpu.matmul %0, %1, %cst {dimension_numbers = #tpu.dot_dimension_numbers<[1], [0], [0], [1], [0, 0, 1, 1], [], []>} : vector<2x128xbf16>, vector<128x128xbf16>, vector<2x128xf32> -> vector<2x128xf32>
    %c0_3 = arith.constant 0 : index
    %c0_4 = arith.constant 0 : index
    %3 = vector.load %arg4[%c0_3, %c0_4] : memref<2x128xf32, #tpu.memory_space<vmem>>, vector<2x128xf32>
    tpu.vector_store %arg4[%c0_3, %c0_4], %2 {strides = array<i32>} : memref<2x128xf32, #tpu.memory_space<vmem>>, vector<2x128xf32>,
    %4 = arith.truncf %2 : vector<2x128xf32> to vector<2x128xbf16>
    %c0_5 = arith.constant 0 : index
    %c0_6 = arith.constant 0 : index
    %5 = vector.load %arg2[%c0_5, %c0_6] : memref<128x512xbf16, #tpu.memory_space<vmem>>, vector<128x512xbf16>
    %cst_7 = arith.constant dense<0.000000e+00> : vector<2x512xf32>
    %6 = tpu.matmul %4, %5, %cst_7 {dimension_numbers = #tpu.dot_dimension_numbers<[1], [0], [0], [1], [0, 0, 1, 1], [], []>} : vector<2x128xbf16>, vector<128x512xbf16>, vector<2x512xf32> -> vector<2x512xf32>
    %c0_8 = arith.constant 0 : index
    %c0_9 = arith.constant 0 : index
    %7 = vector.load %arg3[%c0_8, %c0_9] : memref<1x512xf32, #tpu.memory_space<vmem>>, vector<1x512xf32>
    %8 = vector.broadcast %7 : vector<1x512xf32> to vector<2x512xf32>
    %9 = arith.addf %6, %8 : vector<2x512xf32>
    %10 = math.tanh %9 : vector<2x512xf32>
    %c0_10 = arith.constant 0 : index
    %c0_11 = arith.constant 0 : index
    %11 = vector.load %arg5[%c0_10, %c0_11] : memref<2x512xf32, #tpu.memory_space<vmem>>, vector<2x512xf32>
    tpu.vector_store %arg5[%c0_10, %c0_11], %10 {strides = array<i32>} : memref<2x512xf32, #tpu.memory_space<vmem>>, vector<2x512xf32>,
    return
  }
}

module attributes {stable_mosaic.version = 11 : i64} {
  func.func @_bn_kernel(%arg0: memref<8x128xf32, #tpu.memory_space<vmem>>, %arg1: memref<1x128xf32, #tpu.memory_space<vmem>>, %arg2: memref<1x128xf32, #tpu.memory_space<vmem>>, %arg3: memref<8x128xf32, #tpu.memory_space<vmem>>) attributes {dimension_semantics = [], scalar_prefetch = 0 : i64, scratch_operands = 0 : i64, tpu.core_type = #tpu.core_type<tc>} {
    %c0 = arith.constant 0 : index
    %c0_0 = arith.constant 0 : index
    %0 = vector.load %arg0[%c0, %c0_0] : memref<8x128xf32, #tpu.memory_space<vmem>>, vector<8x128xf32>
    %cst = arith.constant dense<0.000000e+00> : vector<128xf32>
    %1 = vector.multi_reduction <add>, %0, %cst [0] : vector<8x128xf32> to vector<128xf32>
    %2 = vector.shape_cast %1 : vector<128xf32> to vector<1x128xf32>
    %cst_1 = arith.constant 8.000000e+00 : f32
    %3 = vector.broadcast %cst_1 : f32 to vector<1x128xf32>
    %4 = arith.divf %2, %3 : vector<1x128xf32>
    %5 = vector.broadcast %4 : vector<1x128xf32> to vector<8x128xf32>
    %6 = arith.subf %0, %5 : vector<8x128xf32>
    %7 = arith.mulf %6, %6 : vector<8x128xf32>
    %cst_2 = arith.constant dense<0.000000e+00> : vector<128xf32>
    %8 = vector.multi_reduction <add>, %7, %cst_2 [0] : vector<8x128xf32> to vector<128xf32>
    %9 = vector.shape_cast %8 : vector<128xf32> to vector<1x128xf32>
    %cst_3 = arith.constant 8.000000e+00 : f32
    %10 = vector.broadcast %cst_3 : f32 to vector<1x128xf32>
    %11 = arith.divf %9, %10 : vector<1x128xf32>
    %cst_4 = arith.constant 9.99999974E-6 : f32
    %12 = vector.broadcast %cst_4 : f32 to vector<1x128xf32>
    %13 = arith.addf %11, %12 : vector<1x128xf32>
    %14 = math.rsqrt %13 : vector<1x128xf32>
    %15 = vector.broadcast %14 : vector<1x128xf32> to vector<8x128xf32>
    %16 = arith.mulf %6, %15 : vector<8x128xf32>
    %c0_5 = arith.constant 0 : index
    %c0_6 = arith.constant 0 : index
    %17 = vector.load %arg1[%c0_5, %c0_6] : memref<1x128xf32, #tpu.memory_space<vmem>>, vector<1x128xf32>
    %18 = vector.broadcast %17 : vector<1x128xf32> to vector<8x128xf32>
    %19 = arith.mulf %16, %18 : vector<8x128xf32>
    %c0_7 = arith.constant 0 : index
    %c0_8 = arith.constant 0 : index
    %20 = vector.load %arg2[%c0_7, %c0_8] : memref<1x128xf32, #tpu.memory_space<vmem>>, vector<1x128xf32>
    %21 = vector.broadcast %20 : vector<1x128xf32> to vector<8x128xf32>
    %22 = arith.addf %19, %21 : vector<8x128xf32>
    %c0_9 = arith.constant 0 : index
    %c0_10 = arith.constant 0 : index
    %23 = vector.load %arg3[%c0_9, %c0_10] : memref<8x128xf32, #tpu.memory_space<vmem>>, vector<8x128xf32>
    tpu.vector_store %arg3[%c0_9, %c0_10], %22 {strides = array<i32>} : memref<8x128xf32, #tpu.memory_space<vmem>>, vector<8x128xf32>,
    return
  }
}

module attributes {stable_mosaic.version = 11 : i64} {
  func.func @_fused_layer_kernel(%arg0: memref<32x288xbf16, #tpu.memory_space<vmem>>, %arg1: memref<288x128xbf16, #tpu.memory_space<vmem>>, %arg2: memref<1x128xf32, #tpu.memory_space<vmem>>, %arg3: memref<1x128xf32, #tpu.memory_space<vmem>>, %arg4: memref<1x128xf32, #tpu.memory_space<vmem>>, %arg5: memref<32x128xf32, #tpu.memory_space<vmem>>) attributes {dimension_semantics = [], scalar_prefetch = 0 : i64, scratch_operands = 0 : i64, tpu.core_type = #tpu.core_type<tc>} {
    %c0 = arith.constant 0 : index
    %c0_0 = arith.constant 0 : index
    %0 = vector.load %arg0[%c0, %c0_0] : memref<32x288xbf16, #tpu.memory_space<vmem>>, vector<32x288xbf16>
    %c0_1 = arith.constant 0 : index
    %c0_2 = arith.constant 0 : index
    %1 = vector.load %arg1[%c0_1, %c0_2] : memref<288x128xbf16, #tpu.memory_space<vmem>>, vector<288x128xbf16>
    %cst = arith.constant dense<0.000000e+00> : vector<32x128xf32>
    %2 = tpu.matmul %0, %1, %cst {dimension_numbers = #tpu.dot_dimension_numbers<[1], [0], [0], [1], [0, 0, 1, 1], [], []>} : vector<32x288xbf16>, vector<288x128xbf16>, vector<32x128xf32> -> vector<32x128xf32>
    %c0_3 = arith.constant 0 : index
    %c0_4 = arith.constant 0 : index
    %3 = vector.load %arg2[%c0_3, %c0_4] : memref<1x128xf32, #tpu.memory_space<vmem>>, vector<1x128xf32>
    %4 = vector.broadcast %3 : vector<1x128xf32> to vector<32x128xf32>
    %5 = arith.addf %2, %4 : vector<32x128xf32>
    %6 = math.tanh %5 : vector<32x128xf32>
    %cst_5 = arith.constant dense<0.000000e+00> : vector<128xf32>
    %7 = vector.multi_reduction <add>, %6, %cst_5 [0] : vector<32x128xf32> to vector<128xf32>
    %8 = vector.shape_cast %7 : vector<128xf32> to vector<1x128xf32>
    %cst_6 = arith.constant 3.200000e+01 : f32
    %9 = vector.broadcast %cst_6 : f32 to vector<1x128xf32>
    %10 = arith.divf %8, %9 : vector<1x128xf32>
    %11 = vector.broadcast %10 : vector<1x128xf32> to vector<32x128xf32>
    %12 = arith.subf %6, %11 : vector<32x128xf32>
    %13 = arith.mulf %12, %12 : vector<32x128xf32>
    %cst_7 = arith.constant dense<0.000000e+00> : vector<128xf32>
    %14 = vector.multi_reduction <add>, %13, %cst_7 [0] : vector<32x128xf32> to vector<128xf32>
    %15 = vector.shape_cast %14 : vector<128xf32> to vector<1x128xf32>
    %cst_8 = arith.constant 3.200000e+01 : f32
    %16 = vector.broadcast %cst_8 : f32 to vector<1x128xf32>
    %17 = arith.divf %15, %16 : vector<1x128xf32>
    %cst_9 = arith.constant 9.99999974E-6 : f32
    %18 = vector.broadcast %cst_9 : f32 to vector<1x128xf32>
    %19 = arith.addf %17, %18 : vector<1x128xf32>
    %20 = math.rsqrt %19 : vector<1x128xf32>
    %21 = vector.broadcast %20 : vector<1x128xf32> to vector<32x128xf32>
    %22 = arith.mulf %12, %21 : vector<32x128xf32>
    %c0_10 = arith.constant 0 : index
    %c0_11 = arith.constant 0 : index
    %23 = vector.load %arg3[%c0_10, %c0_11] : memref<1x128xf32, #tpu.memory_space<vmem>>, vector<1x128xf32>
    %24 = vector.broadcast %23 : vector<1x128xf32> to vector<32x128xf32>
    %25 = arith.mulf %22, %24 : vector<32x128xf32>
    %c0_12 = arith.constant 0 : index
    %c0_13 = arith.constant 0 : index
    %26 = vector.load %arg4[%c0_12, %c0_13] : memref<1x128xf32, #tpu.memory_space<vmem>>, vector<1x128xf32>
    %27 = vector.broadcast %26 : vector<1x128xf32> to vector<32x128xf32>
    %28 = arith.addf %25, %27 : vector<32x128xf32>
    %c0_14 = arith.constant 0 : index
    %c0_15 = arith.constant 0 : index
    %29 = vector.load %arg5[%c0_14, %c0_15] : memref<32x128xf32, #tpu.memory_space<vmem>>, vector<32x128xf32>
    tpu.vector_store %arg5[%c0_14, %c0_15], %28 {strides = array<i32>} : memref<32x128xf32, #tpu.memory_space<vmem>>, vector<32x128xf32>,
    return
  }
}

module attributes {stable_mosaic.version = 11 : i64} {
  func.func @_fused_layer_kernel(%arg0: memref<128x400xbf16, #tpu.memory_space<vmem>>, %arg1: memref<400x128xbf16, #tpu.memory_space<vmem>>, %arg2: memref<1x128xf32, #tpu.memory_space<vmem>>, %arg3: memref<1x128xf32, #tpu.memory_space<vmem>>, %arg4: memref<1x128xf32, #tpu.memory_space<vmem>>, %arg5: memref<128x128xf32, #tpu.memory_space<vmem>>) attributes {dimension_semantics = [], scalar_prefetch = 0 : i64, scratch_operands = 0 : i64, tpu.core_type = #tpu.core_type<tc>} {
    %c0 = arith.constant 0 : index
    %c0_0 = arith.constant 0 : index
    %0 = vector.load %arg0[%c0, %c0_0] : memref<128x400xbf16, #tpu.memory_space<vmem>>, vector<128x400xbf16>
    %c0_1 = arith.constant 0 : index
    %c0_2 = arith.constant 0 : index
    %1 = vector.load %arg1[%c0_1, %c0_2] : memref<400x128xbf16, #tpu.memory_space<vmem>>, vector<400x128xbf16>
    %cst = arith.constant dense<0.000000e+00> : vector<128x128xf32>
    %2 = tpu.matmul %0, %1, %cst {dimension_numbers = #tpu.dot_dimension_numbers<[1], [0], [0], [1], [0, 0, 1, 1], [], []>} : vector<128x400xbf16>, vector<400x128xbf16>, vector<128x128xf32> -> vector<128x128xf32>
    %c0_3 = arith.constant 0 : index
    %c0_4 = arith.constant 0 : index
    %3 = vector.load %arg2[%c0_3, %c0_4] : memref<1x128xf32, #tpu.memory_space<vmem>>, vector<1x128xf32>
    %4 = vector.broadcast %3 : vector<1x128xf32> to vector<128x128xf32>
    %5 = arith.addf %2, %4 : vector<128x128xf32>
    %6 = math.tanh %5 : vector<128x128xf32>
    %cst_5 = arith.constant dense<0.000000e+00> : vector<128xf32>
    %7 = vector.multi_reduction <add>, %6, %cst_5 [0] : vector<128x128xf32> to vector<128xf32>
    %8 = vector.shape_cast %7 : vector<128xf32> to vector<1x128xf32>
    %cst_6 = arith.constant 1.280000e+02 : f32
    %9 = vector.broadcast %cst_6 : f32 to vector<1x128xf32>
    %10 = arith.divf %8, %9 : vector<1x128xf32>
    %11 = vector.broadcast %10 : vector<1x128xf32> to vector<128x128xf32>
    %12 = arith.subf %6, %11 : vector<128x128xf32>
    %13 = arith.mulf %12, %12 : vector<128x128xf32>
    %cst_7 = arith.constant dense<0.000000e+00> : vector<128xf32>
    %14 = vector.multi_reduction <add>, %13, %cst_7 [0] : vector<128x128xf32> to vector<128xf32>
    %15 = vector.shape_cast %14 : vector<128xf32> to vector<1x128xf32>
    %cst_8 = arith.constant 1.280000e+02 : f32
    %16 = vector.broadcast %cst_8 : f32 to vector<1x128xf32>
    %17 = arith.divf %15, %16 : vector<1x128xf32>
    %cst_9 = arith.constant 9.99999974E-6 : f32
    %18 = vector.broadcast %cst_9 : f32 to vector<1x128xf32>
    %19 = arith.addf %17, %18 : vector<1x128xf32>
    %20 = math.rsqrt %19 : vector<1x128xf32>
    %21 = vector.broadcast %20 : vector<1x128xf32> to vector<128x128xf32>
    %22 = arith.mulf %12, %21 : vector<128x128xf32>
    %c0_10 = arith.constant 0 : index
    %c0_11 = arith.constant 0 : index
    %23 = vector.load %arg3[%c0_10, %c0_11] : memref<1x128xf32, #tpu.memory_space<vmem>>, vector<1x128xf32>
    %24 = vector.broadcast %23 : vector<1x128xf32> to vector<128x128xf32>
    %25 = arith.mulf %22, %24 : vector<128x128xf32>
    %c0_12 = arith.constant 0 : index
    %c0_13 = arith.constant 0 : index
    %26 = vector.load %arg4[%c0_12, %c0_13] : memref<1x128xf32, #tpu.memory_space<vmem>>, vector<1x128xf32>
    %27 = vector.broadcast %26 : vector<1x128xf32> to vector<128x128xf32>
    %28 = arith.addf %25, %27 : vector<128x128xf32>
    %c0_14 = arith.constant 0 : index
    %c0_15 = arith.constant 0 : index
    %29 = vector.load %arg5[%c0_14, %c0_15] : memref<128x128xf32, #tpu.memory_space<vmem>>, vector<128x128xf32>
    tpu.vector_store %arg5[%c0_14, %c0_15], %28 {strides = array<i32>} : memref<128x128xf32, #tpu.memory_space<vmem>>, vector<128x128xf32>,
    return
  }
}

module attributes {stable_mosaic.version = 11 : i64} {
  func.func @_fused_layer_kernel(%arg0: i32, %arg1: memref<256x200xbf16, #tpu.memory_space<vmem>>, %arg2: memref<200x128xbf16, #tpu.memory_space<vmem>>, %arg3: memref<1x128xf32, #tpu.memory_space<vmem>>, %arg4: memref<1x128xf32, #tpu.memory_space<vmem>>, %arg5: memref<1x128xf32, #tpu.memory_space<vmem>>, %arg6: memref<256x128xf32, #tpu.memory_space<vmem>>) attributes {dimension_semantics = [#tpu.dimension_semantics<parallel>], iteration_bounds = array<i64: 2>, scalar_prefetch = 0 : i64, scratch_operands = 0 : i64, tpu.core_type = #tpu.core_type<tc>, window_params = [{transform_indices = @transform_0, window_bounds = array<i64: 256, 200>}, {pipeline_mode = #tpu.pipeline_mode<synchronous>, transform_indices = @transform_1, window_bounds = array<i64: 200, 128>}, {pipeline_mode = #tpu.pipeline_mode<synchronous>, transform_indices = @transform_2, window_bounds = array<i64: 1, 128>}, {pipeline_mode = #tpu.pipeline_mode<synchronous>, transform_indices = @transform_3, window_bounds = array<i64: 1, 128>}, {pipeline_mode = #tpu.pipeline_mode<synchronous>, transform_indices = @transform_4, window_bounds = array<i64: 1, 128>}, {transform_indices = @transform_5, window_bounds = array<i64: 256, 128>}]} {
    %c0 = arith.constant 0 : index
    %c0_0 = arith.constant 0 : index
    %0 = vector.load %arg1[%c0, %c0_0] : memref<256x200xbf16, #tpu.memory_space<vmem>>, vector<256x200xbf16>
    %c0_1 = arith.constant 0 : index
    %c0_2 = arith.constant 0 : index
    %1 = vector.load %arg2[%c0_1, %c0_2] : memref<200x128xbf16, #tpu.memory_space<vmem>>, vector<200x128xbf16>
    %cst = arith.constant dense<0.000000e+00> : vector<256x128xf32>
    %2 = tpu.matmul %0, %1, %cst {dimension_numbers = #tpu.dot_dimension_numbers<[1], [0], [0], [1], [0, 0, 1, 1], [], []>} : vector<256x200xbf16>, vector<200x128xbf16>, vector<256x128xf32> -> vector<256x128xf32>
    %c0_3 = arith.constant 0 : index
    %c0_4 = arith.constant 0 : index
    %3 = vector.load %arg3[%c0_3, %c0_4] : memref<1x128xf32, #tpu.memory_space<vmem>>, vector<1x128xf32>
    %4 = vector.broadcast %3 : vector<1x128xf32> to vector<256x128xf32>
    %5 = arith.addf %2, %4 : vector<256x128xf32>
    %6 = math.tanh %5 : vector<256x128xf32>
    %c0_5 = arith.constant 0 : index
    %c0_6 = arith.constant 0 : index
    %7 = vector.load %arg6[%c0_5, %c0_6] : memref<256x128xf32, #tpu.memory_space<vmem>>, vector<256x128xf32>
    tpu.vector_store %arg6[%c0_5, %c0_6], %6 {strides = array<i32>} : memref<256x128xf32, #tpu.memory_space<vmem>>, vector<256x128xf32>,
    return
  }
  func.func @transform_0(%arg0: i32) -> (i32, i32) {
    %c0_i32 = arith.constant 0 : i32
    %c0_i32_0 = arith.constant 0 : i32
    return %arg0, %c0_i32 : i32, i32
  }
  func.func @transform_1(%arg0: i32) -> (i32, i32) {
    %c0_i32 = arith.constant 0 : i32
    %c0_i32_0 = arith.constant 0 : i32
    %c0_i32_1 = arith.constant 0 : i32
    return %c0_i32, %c0_i32_0 : i32, i32
  }
  func.func @transform_2(%arg0: i32) -> (i32, i32) {
    %c0_i32 = arith.constant 0 : i32
    %c0_i32_0 = arith.constant 0 : i32
    %c0_i32_1 = arith.constant 0 : i32
    return %c0_i32, %c0_i32_0 : i32, i32
  }
  func.func @transform_3(%arg0: i32) -> (i32, i32) {
    %c0_i32 = arith.constant 0 : i32
    %c0_i32_0 = arith.constant 0 : i32
    %c0_i32_1 = arith.constant 0 : i32
    return %c0_i32, %c0_i32_0 : i32, i32
  }
  func.func @transform_4(%arg0: i32) -> (i32, i32) {
    %c0_i32 = arith.constant 0 : i32
    %c0_i32_0 = arith.constant 0 : i32
    %c0_i32_1 = arith.constant 0 : i32
    return %c0_i32, %c0_i32_0 : i32, i32
  }
  func.func @transform_5(%arg0: i32) -> (i32, i32) {
    %c0_i32 = arith.constant 0 : i32
    %c0_i32_0 = arith.constant 0 : i32
    return %arg0, %c0_i32 : i32, i32
  }
}

</mosaic_0001>

<bundles_post_ra>
// kernel: rsrae_forward.8
= control target key start
LH: loop header
LB: loop body
LE: loop exit
PB: predicated region body
PF: predicated region fallthrough
CT: control target
= control target key end

     0   :  { %vm136_vm0 = vcmask 818176   ;;  %vm161_vm1 = vcmask 1041408   ;;  %s715_s1 = inlined_call_operand.vmem [shape: bf16[100,128], index: 1, kind: input, shape index: {}]   ;;  %s716_s0 = inlined_call_operand.vmem [shape: bf16[128,100], index: 0, kind: input, shape index: {}]   ;;  %s717_s2 = inlined_call_operand.vmem [shape: f32[1,128], index: 2, kind: input, shape index: {}]   ;;  %s718_s3 = inlined_call_operand.vmem [shape: f32[1,128], index: 3, kind: input, shape index: {}]   ;;  %s719_s4 = inlined_call_operand.vmem [shape: f32[1,128], index: 4, kind: input, shape index: {}]   ;;  %s720_s5 = inlined_call_operand.vmem [shape: f32[128,128], index: 5, kind: output, shape index: {}]  }
   0x1   :  { %v526_v0 = vld [vmem:[%s715_s1] sm:$0xff]   ;;  %v527_v1 = vld [vmem:[%s715_s1 + $0x8] sm:$0xff]   ;;  %v528_v2 = vld [vmem:[%s715_s1 + $0x10] sm:$0xff]  }
   0x2   :  { %480 = vmatprep.subr.bf16.mxu0 %v526_v0  ;;  %510 = vmatprep.subr.bf16.mxu1 %v526_v0  ;;  %v533_v3 = vld [vmem:[%s716_s0] sm:$0xff]   ;;  %v529_v4 = vld [vmem:[%s715_s1 + $0x18] sm:$0xff]   ;;  %v531_v7 = vld [vmem:[%s715_s1 + $0x28] sm:$0xff]  }
   0x3   :  { %481 = vmatpush3.bf16.msra.mxu0 %v526_v0  ;;  %517 = vmatpush3.bf16.msra.mxu1 %v526_v0  ;;  %v537_v5 = vld [vmem:[%s716_s0 + $0x20] sm:$0xff]   ;;  %v532_v8 = vld [vmem:[%s715_s1 + $0x30] ss:$0 sps:$4 sm:$0x33]   ;;  %v534_v10 = vld [vmem:[%s716_s0 + $0x8] sm:$0xff]  }
   0x4   :  { %482 = vmatprep.subr.bf16.mxu0 %v527_v1  ;;  %511 = vmatprep.subr.bf16.mxu1 %v527_v1  ;;  %v530_v6 = vld [vmem:[%s715_s1 + $0x20] sm:$0xff]   ;;  %v163_v9 = vsel %vm161_vm1, %v532_v8, 0  ;;  %v538_v11 = vld [vmem:[%s716_s0 + $0x28] sm:$0xff]   ;;  %v535_v12 = vld [vmem:[%s716_s0 + $0x10] sm:$0xff]  }
   0x5   :  { %494 = vmatprep.mubr.msk.bf16.mxu0 %vm136_vm0, %v533_v3  ;;  %502 = vmatprep.mubr.msk.bf16.mxu1 %vm136_vm0, %v537_v5  ;;  %v539_v13 = vld [vmem:[%s716_s0 + $0x30] sm:$0xff]   ;;  %v536_v14 = vld [vmem:[%s716_s0 + $0x18] sm:$0xff]   ;;  %v439_v16 = vld [vmem:[%s717_s2] ss:$0 sm:$0xff] }
   0x6   :  { %v540_v15 = vld [vmem:[%s716_s0 + $0x38] sm:$0xff]  }
   0x7   :  { %483 = vmatpush3.bf16.msra.mxu0 %v527_v1  ;;  %518 = vmatpush3.bf16.msra.mxu1 %v527_v1 }
   0x8   :  { %484 = vmatprep.subr.bf16.mxu0 %v528_v2  ;;  %512 = vmatprep.subr.bf16.mxu1 %v528_v2 }
   0xb   :  { %485 = vmatpush3.bf16.msra.mxu0 %v528_v2  ;;  %519 = vmatpush3.bf16.msra.mxu1 %v528_v2 }
   0xc   :  { %486 = vmatprep.subr.bf16.mxu0 %v529_v4  ;;  %513 = vmatprep.subr.bf16.mxu1 %v529_v4 }
   0xf   :  { %487 = vmatpush3.bf16.msra.mxu0 %v529_v4  ;;  %520 = vmatpush3.bf16.msra.mxu1 %v529_v4 }
  0x10   :  { %488 = vmatprep.subr.bf16.mxu0 %v530_v6  ;;  %514 = vmatprep.subr.bf16.mxu1 %v530_v6 }
  0x13   :  { %489 = vmatpush3.bf16.msra.mxu0 %v530_v6  ;;  %521 = vmatpush3.bf16.msra.mxu1 %v530_v6 }
  0x14   :  { %490 = vmatprep.subr.bf16.mxu0 %v531_v7  ;;  %515 = vmatprep.subr.bf16.mxu1 %v531_v7 }
  0x17   :  { %491 = vmatpush3.bf16.msra.mxu0 %v531_v7  ;;  %522 = vmatpush3.bf16.msra.mxu1 %v531_v7 }
  0x18   :  { %524 = vmatprep.subr.msk.bf16.mxu0 %vm161_vm1, %v532_v8  ;;  %525 = vmatprep.subr.msk.bf16.mxu1 %vm161_vm1, %v532_v8 }
  0x1b   :  { %493 = vmatpush3.bf16.msra.mxu0 %v163_v9  ;;  %523 = vmatpush3.bf16.msra.mxu1 %v163_v9 }
  0x1e   :  { %495 = vmatmul.mubr.msk.bf16.vlgmr.msra.gmra.mrb[0].mxu0 %vm136_vm0, %v534_v10  ;;  %503 = vmatmul.mubr.msk.bf16.vlgmr.msra.gmra.mrb[0].mxu1 %vm136_vm0, %v538_v11 }
  0x1f   :  { %498 = vmatprep.mubr.msk.bf16.mxu0 %vm136_vm0, %v535_v12  ;;  %506 = vmatprep.mubr.msk.bf16.mxu1 %vm136_vm0, %v539_v13 }
  0x26   :  { %499 = vmatmul.mubr.msk.bf16.gmra.mrb[4].mxu0 %vm136_vm0, %v536_v14  ;;  %507 = vmatmul.mubr.msk.bf16.gmra.mrb[4].mxu1 %vm136_vm0, %v540_v15 }
  0xf1   :  { %v496_v17 = vpop.f32.mrb[0].mxu0  ;;  %v504_v18 = vpop.f32.mrb[0].mxu1 }
  0xf2   :  { %v199_v19 = vpop.f32.mrb[1].mxu0  ;;  %v231_v20 = vpop.f32.mrb[1].mxu1  ;;  %v208_v26 = vadd.f32 %v496_v17, %v439_v16  ;;  %v240_v49 = vadd.f32 %v504_v18, %v439_v16 }
  0xf3   :  { %v200_v21 = vadd.f32 %v439_v16, %v199_v19  ;;  %v497_v22 = vpop.f32.mrb[2].mxu0  ;;  %v505_v23 = vpop.f32.mrb[2].mxu1  ;;  %v232_v40 = vadd.f32 %v439_v16, %v231_v20 }
  0xf4   :  { %v202_v24 = vpop.f32.mrb[3].mxu0  ;;  %v234_v25 = vpop.f32.mrb[3].mxu1  ;;  %v211_v28 = vadd.f32 %v497_v22, %v439_v16  ;;  %v243_v51 = vadd.f32 %v505_v23, %v439_v16 }
  0xf5   :  { %v203_v27 = vadd.f32 %v439_v16, %v202_v24  ;;  %541 = vtanh.f32 %v200_v21  ;;  %v235_v46 = vadd.f32 %v439_v16, %v234_v25 }
  0xf7   :  { %543 = vtanh.f32 %v203_v27 }
  0xf8   :  { %545 = vtanh.f32 %v208_v26 }
  0xf9   :  { %v500_v29 = vpop.f32.mrb[4].mxu0  ;;  %v508_v30 = vpop.f32.mrb[4].mxu1  ;;  %547 = vtanh.f32 %v211_v28 }
  0xfa   :  { %v215_v31 = vpop.f32.mrb[5].mxu0  ;;  %v247_v32 = vpop.f32.mrb[5].mxu1  ;;  %v224_v38 = vadd.f32 %v500_v29, %v439_v16  ;;  %v256_v62 = vadd.f32 %v508_v30, %v439_v16 }
  0xfb   :  { %v216_v33 = vadd.f32 %v439_v16, %v215_v31  ;;  %v501_v34 = vpop.f32.mrb[6].mxu0  ;;  %v509_v35 = vpop.f32.mrb[6].mxu1  ;;  %v248_v53 = vadd.f32 %v439_v16, %v247_v32 }
  0xfc   :  { %v218_v36 = vpop.f32.mrb[7].mxu0  ;;  %v250_v37 = vpop.f32.mrb[7].mxu1  ;;  %v227_v41 = vadd.f32 %v501_v34, %v439_v16  ;;  %v259_v0 = vadd.f32 %v509_v35, %v439_v16 }
  0xfd   :  { %549 = vtanh.f32 %v216_v33  ;;  %v219_v39 = vadd.f32 %v439_v16, %v218_v36  ;;  %v251_v58 = vadd.f32 %v439_v16, %v250_v37 }
  0xff   :  { %551 = vtanh.f32 %v219_v39  ;;  %v542_v42 = vpop.eup %541 }
 0x100   :  { %553 = vtanh.f32 %v224_v38 }
 0x101   :  { %v544_v43 = vpop.eup %543  ;;  %555 = vtanh.f32 %v232_v40 }
 0x102   :  { %v278_v44 = vadd.f32 %v544_v43, %v542_v42  ;;  %v546_v45 = vpop.eup %545  ;;  %557 = vtanh.f32 %v227_v41 }
 0x103   :  { %v548_v48 = vpop.eup %547  ;;  %559 = vtanh.f32 %v235_v46 }
 0x104   :  { %v279_v47 = vadd.f32 %v546_v45, %v278_v44  ;;  %561 = vtanh.f32 %v240_v49 }
 0x105   :  { %563 = vtanh.f32 %v243_v51 }
 0x106   :  { %v280_v50 = vadd.f32 %v548_v48, %v279_v47  ;;  %565 = vtanh.f32 %v248_v53 }
 0x107   :  { %v550_v52 = vpop.eup %549  ;;  %567 = vtanh.f32 %v251_v58 }
 0x108   :  { %v281_v54 = vadd.f32 %v550_v52, %v280_v50  ;;  %569 = vtanh.f32 %v256_v62 }
 0x109   :  { %v552_v55 = vpop.eup %551  ;;  %571 = vtanh.f32 %v259_v0 }
 0x10a   :  { %v282_v56 = vadd.f32 %v552_v55, %v281_v54  ;;  %v554_v57 = vpop.eup %553 }
 0x10b   :  { %v556_v59 = vpop.eup %555 }
 0x10c   :  { %v283_v60 = vadd.f32 %v554_v57, %v282_v56  ;;  %v558_v61 = vpop.eup %557 }
 0x10d   :  { %v560_v2 = vpop.eup %559 }
 0x10e   :  { %v284_v63 = vadd.f32 %v558_v61, %v283_v60  ;;  %v562_v4 = vpop.eup %561 }
 0x10f   :  { %v564_v5 = vpop.eup %563 }
 0x110   :  { %v285_v1 = vadd.f32 %v556_v59, %v284_v63  ;;  %v566_v7 = vpop.eup %565 }
 0x111   :  { %v568_v10 = vpop.eup %567 }
 0x112   :  { %v286_v3 = vadd.f32 %v560_v2, %v285_v1  ;;  %v570_v12 = vpop.eup %569 }
 0x113   :  { %v572_v14 = vpop.eup %571 }
 0x114   :  { %v287_v6 = vadd.f32 %v562_v4, %v286_v3 }
 0x116   :  { %v288_v8 = vadd.f32 %v564_v5, %v287_v6 }
 0x118   :  { %v289_v9 = vadd.f32 %v566_v7, %v288_v8 }
 0x11a   :  { %v290_v11 = vadd.f32 %v568_v10, %v289_v9 }
 0x11c   :  { %v291_v13 = vadd.f32 %v570_v12, %v290_v11 }
 0x11e   :  { %v292_v15 = vadd.f32 %v572_v14, %v291_v13 }
 0x120   :  { %v293_v17 = vrot.slane %v292_v15, 4 }
 0x122   :  { %v294_v16 = vadd.f32 %v293_v17, %v292_v15 }
 0x124   :  { %v295_v18 = vrot.slane %v294_v16, 2 }
 0x126   :  { %v296_v19 = vadd.f32 %v295_v18, %v294_v16 }
 0x128   :  { %v297_v20 = vrot.slane %v296_v19, 1 }
 0x12a   :  { %v298_v21 = vadd.f32 %v297_v20, %v296_v19 }
 0x12c   :  { %v300_v22 = vmul.f32 0.0078125, %v298_v21 }
 0x12e   :  { %v301_v23 = vsub.f32 %v542_v42, %v300_v22  ;;  %v302_v24 = vsub.f32 %v544_v43, %v300_v22  ;;  %v303_v25 = vsub.f32 %v546_v45, %v300_v22  ;;  %v304_v26 = vsub.f32 %v548_v48, %v300_v22 }
 0x12f   :  { %v305_v27 = vsub.f32 %v550_v52, %v300_v22  ;;  %v306_v28 = vsub.f32 %v552_v55, %v300_v22  ;;  %v307_v29 = vsub.f32 %v554_v57, %v300_v22  ;;  %v308_v30 = vsub.f32 %v558_v61, %v300_v22 }
 0x130   :  { %v309_v31 = vsub.f32 %v556_v59, %v300_v22  ;;  %v310_v32 = vsub.f32 %v560_v2, %v300_v22  ;;  %v311_v33 = vsub.f32 %v562_v4, %v300_v22  ;;  %v312_v34 = vsub.f32 %v564_v5, %v300_v22 }
 0x131   :  { %v313_v35 = vsub.f32 %v566_v7, %v300_v22  ;;  %v314_v36 = vsub.f32 %v568_v10, %v300_v22  ;;  %v315_v37 = vsub.f32 %v570_v12, %v300_v22  ;;  %v316_v38 = vsub.f32 %v572_v14, %v300_v22 }
 0x132   :  { %v317_v39 = vmul.f32 %v301_v23, %v301_v23  ;;  %v318_v40 = vmul.f32 %v302_v24, %v302_v24  ;;  %v319_v41 = vmul.f32 %v303_v25, %v303_v25  ;;  %v320_v42 = vmul.f32 %v304_v26, %v304_v26 }
 0x133   :  { %v321_v45 = vmul.f32 %v305_v27, %v305_v27  ;;  %v322_v47 = vmul.f32 %v306_v28, %v306_v28  ;;  %v323_v49 = vmul.f32 %v307_v29, %v307_v29  ;;  %v324_v51 = vmul.f32 %v308_v30, %v308_v30 }
 0x134   :  { %v333_v44 = vadd.f32 %v318_v40, %v317_v39  ;;  %v325_v53 = vmul.f32 %v309_v31, %v309_v31  ;;  %v326_v55 = vmul.f32 %v310_v32, %v310_v32  ;;  %v327_v57 = vmul.f32 %v311_v33, %v311_v33  ;;  %v463_v39 = vld [vmem:[%s718_s3] ss:$0 sm:$0xff] }
 0x135   :  { %v328_v59 = vmul.f32 %v312_v34, %v312_v34  ;;  %v329_v61 = vmul.f32 %v313_v35, %v313_v35  ;;  %v330_v63 = vmul.f32 %v314_v36, %v314_v36  ;;  %v331_v1 = vmul.f32 %v315_v37, %v315_v37 }
 0x136   :  { %v334_v43 = vadd.f32 %v333_v44, %v319_v41  ;;  %v332_v3 = vmul.f32 %v316_v38, %v316_v38 }
 0x138   :  { %v335_v46 = vadd.f32 %v334_v43, %v320_v42 }
 0x13a   :  { %v336_v48 = vadd.f32 %v335_v46, %v321_v45 }
 0x13c   :  { %v337_v50 = vadd.f32 %v336_v48, %v322_v47  ;;  %v464_v48 = vld [vmem:[%s719_s4] ss:$0 sm:$0xff] }
 0x13e   :  { %v338_v52 = vadd.f32 %v337_v50, %v323_v49 }
 0x140   :  { %v339_v54 = vadd.f32 %v338_v52, %v324_v51 }
 0x142   :  { %v340_v56 = vadd.f32 %v339_v54, %v325_v53 }
 0x144   :  { %v341_v58 = vadd.f32 %v340_v56, %v326_v55 }
 0x146   :  { %v342_v60 = vadd.f32 %v341_v58, %v327_v57 }
 0x148   :  { %v343_v62 = vadd.f32 %v342_v60, %v328_v59 }
 0x14a   :  { %v344_v0 = vadd.f32 %v343_v62, %v329_v61 }
 0x14c   :  { %v345_v2 = vadd.f32 %v344_v0, %v330_v63 }
 0x14e   :  { %v346_v4 = vadd.f32 %v345_v2, %v331_v1 }
 0x150   :  { %v347_v5 = vadd.f32 %v346_v4, %v332_v3 }
 0x152   :  { %v348_v6 = vrot.slane %v347_v5, 4 }
 0x154   :  { %v349_v7 = vadd.f32 %v348_v6, %v347_v5 }
 0x156   :  { %v350_v8 = vrot.slane %v349_v7, 2 }
 0x158   :  { %v351_v9 = vadd.f32 %v350_v8, %v349_v7 }
 0x15a   :  { %v352_v10 = vrot.slane %v351_v9, 1 }
 0x15c   :  { %v353_v11 = vadd.f32 %v352_v10, %v351_v9 }
 0x15e   :  { %v354_v12 = vmul.f32 0.0078125, %v353_v11 }
 0x160   :  { %v355_v13 = vadd.f32 1e-05, %v354_v12 }
 0x162   :  { %573 = vrsqrt.f32 %v355_v13 }
 0x16c   :  { %v574_v14 = vpop.eup %573 }
 0x16d   :  { %v357_v15 = vmul.f32 %v574_v14, %v301_v23  ;;  %v358_v17 = vmul.f32 %v574_v14, %v302_v24  ;;  %v359_v16 = vmul.f32 %v574_v14, %v303_v25  ;;  %v360_v18 = vmul.f32 %v574_v14, %v304_v26 }
 0x16e   :  { %v361_v19 = vmul.f32 %v574_v14, %v305_v27  ;;  %v362_v20 = vmul.f32 %v574_v14, %v306_v28  ;;  %v363_v21 = vmul.f32 %v574_v14, %v307_v29  ;;  %v364_v22 = vmul.f32 %v574_v14, %v308_v30 }
 0x16f   :  { %v365_v40 = vmul.f32 %v574_v14, %v309_v31  ;;  %v366_v41 = vmul.f32 %v574_v14, %v310_v32  ;;  %v367_v44 = vmul.f32 %v574_v14, %v311_v33  ;;  %v368_v42 = vmul.f32 %v574_v14, %v312_v34 }
 0x170   :  { %v369_v43 = vmul.f32 %v574_v14, %v313_v35  ;;  %v370_v45 = vmul.f32 %v574_v14, %v314_v36  ;;  %v371_v46 = vmul.f32 %v574_v14, %v315_v37  ;;  %v372_v47 = vmul.f32 %v574_v14, %v316_v38 }
 0x171   :  { %v380_v23 = vmul.f32 %v463_v39, %v357_v15  ;;  %v381_v24 = vmul.f32 %v463_v39, %v358_v17  ;;  %v382_v25 = vmul.f32 %v463_v39, %v359_v16  ;;  %v383_v26 = vmul.f32 %v463_v39, %v360_v18 }
 0x172   :  { %v384_v27 = vmul.f32 %v463_v39, %v361_v19  ;;  %v385_v28 = vmul.f32 %v463_v39, %v362_v20  ;;  %v386_v29 = vmul.f32 %v463_v39, %v363_v21  ;;  %v387_v30 = vmul.f32 %v463_v39, %v364_v22 }
 0x173   :  { %v388_v31 = vmul.f32 %v463_v39, %v365_v40  ;;  %v389_v32 = vmul.f32 %v463_v39, %v366_v41  ;;  %v390_v33 = vmul.f32 %v463_v39, %v367_v44  ;;  %v391_v34 = vmul.f32 %v463_v39, %v368_v42 }
 0x174   :  { %v392_v35 = vmul.f32 %v463_v39, %v369_v43  ;;  %v393_v36 = vmul.f32 %v463_v39, %v370_v45  ;;  %v394_v37 = vmul.f32 %v463_v39, %v371_v46  ;;  %v395_v38 = vmul.f32 %v463_v39, %v372_v47 }
 0x175   :  { %v403_v49 = vadd.f32 %v464_v48, %v380_v23  ;;  %v404_v50 = vadd.f32 %v464_v48, %v381_v24  ;;  %v405_v51 = vadd.f32 %v464_v48, %v382_v25  ;;  %v406_v52 = vadd.f32 %v464_v48, %v383_v26 }
 0x176   :  { %v407_v53 = vadd.f32 %v464_v48, %v384_v27  ;;  %v408_v54 = vadd.f32 %v464_v48, %v385_v28  ;;  %v409_v55 = vadd.f32 %v464_v48, %v386_v29  ;;  %v410_v56 = vadd.f32 %v464_v48, %v387_v30 }
 0x177   :  { %v411_v57 = vadd.f32 %v464_v48, %v388_v31  ;;  %v412_v58 = vadd.f32 %v464_v48, %v389_v32  ;;  %v413_v59 = vadd.f32 %v464_v48, %v390_v33  ;;  %v414_v60 = vadd.f32 %v464_v48, %v391_v34  ;;  %419 = vst [vmem:[%s720_s5] sm:$0xff] %v403_v49 }
 0x178   :  { %420 = vst [vmem:[%s720_s5 + $0x8] sm:$0xff] %v404_v50  ;;  %421 = vst [vmem:[%s720_s5 + $0x10] sm:$0xff] %v405_v51  ;;  %v415_v61 = vadd.f32 %v464_v48, %v392_v35  ;;  %v416_v62 = vadd.f32 %v464_v48, %v393_v36  ;;  %v417_v63 = vadd.f32 %v464_v48, %v394_v37 }
 0x179   :  { %422 = vst [vmem:[%s720_s5 + $0x18] sm:$0xff] %v406_v52  ;;  %v418_v0 = vadd.f32 %v464_v48, %v395_v38  ;;  %423 = vst [vmem:[%s720_s5 + $0x20] sm:$0xff] %v407_v53 }
 0x17a   :  { %424 = vst [vmem:[%s720_s5 + $0x28] sm:$0xff] %v408_v54  ;;  %425 = vst [vmem:[%s720_s5 + $0x30] sm:$0xff] %v409_v55 }
 0x17b   :  { %426 = vst [vmem:[%s720_s5 + $0x38] sm:$0xff] %v410_v56  ;;  %427 = vst [vmem:[%s720_s5 + $0x40] sm:$0xff] %v411_v57 }
 0x17c   :  { %428 = vst [vmem:[%s720_s5 + $0x48] sm:$0xff] %v412_v58  ;;  %429 = vst [vmem:[%s720_s5 + $0x50] sm:$0xff] %v413_v59 }
 0x17d   :  { %430 = vst [vmem:[%s720_s5 + $0x58] sm:$0xff] %v414_v60  ;;  %431 = vst [vmem:[%s720_s5 + $0x60] sm:$0xff] %v415_v61 }
 0x17e   :  { %432 = vst [vmem:[%s720_s5 + $0x68] sm:$0xff] %v416_v62  ;;  %433 = vst [vmem:[%s720_s5 + $0x70] sm:$0xff] %v417_v63 }
 0x17f   :  { %434 = vst [vmem:[%s720_s5 + $0x78] sm:$0xff] %v418_v0 }

// kernel: rsrae_forward.9
= control target key start
LH: loop header
LB: loop body
LE: loop exit
PB: predicated region body
PF: predicated region fallthrough
CT: control target
= control target key end

     0   :  { %v357_v0 = vmov 0   ;;  %vm150_vm0 = vcmask 588800   ;;  %vm157_vm1 = vcmask 1043456   ;;  %s486_s1 = inlined_call_operand.vmem [shape: bf16[200,128], index: 1, kind: input, shape index: {}]   ;;  %s487_s0 = inlined_call_operand.vmem [shape: bf16[32,200], index: 0, kind: input, shape index: {}]   ;;  %s488_s2 = inlined_call_operand.vmem [shape: f32[1,128], index: 2, kind: input, shape index: {}]   ;;  %s489_s3 = inlined_call_operand.vmem [shape: f32[1,128], index: 3, kind: input, shape index: {}]   ;;  %s490_s4 = inlined_call_operand.vmem [shape: f32[1,128], index: 4, kind: input, shape index: {}]   ;;  %s491_s5 = inlined_call_operand.vmem [shape: f32[32,128], index: 5, kind: output, shape index: {}]  }
   0x1   :  { %161 = vmatprep.subr.bf16.mxu0 %v357_v0  ;;  %301 = vmatprep.subr.bf16.mxu1 %v357_v0  ;;  %v328_v1 = vld [vmem:[%s486_s1] sm:$0xff]   ;;  %v329_v2 = vld [vmem:[%s486_s1 + $0x8] sm:$0xff]   ;;  %v330_v3 = vld [vmem:[%s486_s1 + $0x10] sm:$0xff]  }
   0x2   :  { %162 = vmatpush1.bf16.msra.mxu0 %v328_v1  ;;  %314 = vmatpush1.bf16.msra.mxu1 %v328_v1  ;;  %v331_v4 = vld [vmem:[%s486_s1 + $0x18] sm:$0xff]   ;;  %v343_v5 = vld [vmem:[%s487_s0 + $0x4] ss:$8 sps:$4 sm:$0xff]   ;;  %v334_v9 = vld [vmem:[%s486_s1 + $0x30] sm:$0xff]  }
   0x3   :  { %163 = vmatprep.subr.bf16.mxu0 %v357_v0  ;;  %302 = vmatprep.subr.bf16.mxu1 %v357_v0  ;;  %v332_v6 = vld [vmem:[%s486_s1 + $0x20] sm:$0xff]   ;;  %v346_v7 = vld [vmem:[%s487_s0 + $0x14] ss:$8 sps:$4 sm:$0xff]   ;;  %v333_v8 = vld [vmem:[%s486_s1 + $0x28] sm:$0xff]  }
   0x4   :  { %297 = vmatprep.mubr.msk.bf16.mxu0 %vm150_vm0, %v343_v5  ;;  %298 = vmatprep.mubr.msk.bf16.mxu1 %vm150_vm0, %v346_v7  ;;  %v335_v10 = vld [vmem:[%s486_s1 + $0x38] sm:$0xff]   ;;  %v336_v11 = vld [vmem:[%s486_s1 + $0x40] sm:$0xff]   ;;  %v337_v12 = vld [vmem:[%s486_s1 + $0x48] sm:$0xff]  }
   0x5   :  { %v338_v13 = vld [vmem:[%s486_s1 + $0x50] sm:$0xff]   ;;  %v339_v14 = vld [vmem:[%s486_s1 + $0x58] sm:$0xff]   ;;  %v340_v15 = vld [vmem:[%s486_s1 + $0x60] ss:$0 sps:$4 sm:$0xff]  }
   0x6   :  { %164 = vmatpush1.bf16.msra.mxu0 %v329_v2  ;;  %315 = vmatpush1.bf16.msra.mxu1 %v329_v2  ;;  %v159_v16 = vsel %vm157_vm1, %v340_v15, 0  ;;  %v341_v17 = vld [vmem:[%s487_s0] ss:$8 sps:$4 sm:$0xff]   ;;  %v344_v18 = vld [vmem:[%s487_s0 + $0x10] ss:$8 sps:$4 sm:$0xff]  }
   0x7   :  { %165 = vmatprep.subr.bf16.mxu0 %v357_v0  ;;  %303 = vmatprep.subr.bf16.mxu1 %v357_v0  ;;  %v279_v19 = vld [vmem:[%s488_s2] ss:$0 sm:$0xff] }
   0x8   :  { %v299_v2 = vld [vmem:[%s489_s3] ss:$0 sm:$0xff] }
   0x9   :  { %v300_v7 = vld [vmem:[%s490_s4] ss:$0 sm:$0xff] }
   0xa   :  { %166 = vmatpush1.bf16.msra.mxu0 %v330_v3  ;;  %316 = vmatpush1.bf16.msra.mxu1 %v330_v3 }
   0xb   :  { %167 = vmatprep.subr.bf16.mxu0 %v357_v0  ;;  %304 = vmatprep.subr.bf16.mxu1 %v357_v0 }
   0xe   :  { %168 = vmatpush1.bf16.msra.mxu0 %v331_v4  ;;  %317 = vmatpush1.bf16.msra.mxu1 %v331_v4 }
   0xf   :  { %169 = vmatprep.subr.bf16.mxu0 %v357_v0  ;;  %305 = vmatprep.subr.bf16.mxu1 %v357_v0 }
  0x12   :  { %170 = vmatpush1.bf16.msra.mxu0 %v332_v6  ;;  %318 = vmatpush1.bf16.msra.mxu1 %v332_v6 }
  0x13   :  { %171 = vmatprep.subr.bf16.mxu0 %v357_v0  ;;  %306 = vmatprep.subr.bf16.mxu1 %v357_v0 }
  0x16   :  { %172 = vmatpush1.bf16.msra.mxu0 %v333_v8  ;;  %319 = vmatpush1.bf16.msra.mxu1 %v333_v8 }
  0x17   :  { %173 = vmatprep.subr.bf16.mxu0 %v357_v0  ;;  %307 = vmatprep.subr.bf16.mxu1 %v357_v0 }
  0x1a   :  { %174 = vmatpush1.bf16.msra.mxu0 %v334_v9  ;;  %320 = vmatpush1.bf16.msra.mxu1 %v334_v9 }
  0x1b   :  { %175 = vmatprep.subr.bf16.mxu0 %v357_v0  ;;  %308 = vmatprep.subr.bf16.mxu1 %v357_v0 }
  0x1e   :  { %176 = vmatpush1.bf16.msra.mxu0 %v335_v10  ;;  %321 = vmatpush1.bf16.msra.mxu1 %v335_v10 }
  0x1f   :  { %177 = vmatprep.subr.bf16.mxu0 %v357_v0  ;;  %309 = vmatprep.subr.bf16.mxu1 %v357_v0 }
  0x22   :  { %178 = vmatpush1.bf16.msra.mxu0 %v336_v11  ;;  %322 = vmatpush1.bf16.msra.mxu1 %v336_v11 }
  0x23   :  { %179 = vmatprep.subr.bf16.mxu0 %v357_v0  ;;  %310 = vmatprep.subr.bf16.mxu1 %v357_v0 }
  0x26   :  { %180 = vmatpush1.bf16.msra.mxu0 %v337_v12  ;;  %323 = vmatpush1.bf16.msra.mxu1 %v337_v12 }
  0x27   :  { %181 = vmatprep.subr.bf16.mxu0 %v357_v0  ;;  %311 = vmatprep.subr.bf16.mxu1 %v357_v0 }
  0x2a   :  { %182 = vmatpush1.bf16.msra.mxu0 %v338_v13  ;;  %324 = vmatpush1.bf16.msra.mxu1 %v338_v13 }
  0x2b   :  { %183 = vmatprep.subr.bf16.mxu0 %v357_v0  ;;  %312 = vmatprep.subr.bf16.mxu1 %v357_v0 }
  0x2e   :  { %184 = vmatpush1.bf16.msra.mxu0 %v339_v14  ;;  %325 = vmatpush1.bf16.msra.mxu1 %v339_v14 }
  0x2f   :  { %185 = vmatprep.subr.bf16.mxu0 %v357_v0  ;;  %313 = vmatprep.subr.bf16.mxu1 %v357_v0 }
  0x32   :  { %186 = vmatpush1.bf16.msra.mxu0 %v159_v16  ;;  %326 = vmatpush1.bf16.msra.mxu1 %v159_v16 }
  0x35   :  { %194 = vmatmul.mubr.bf16.vlgmr.msra.gmra.mrb[0].mxu0 %v341_v17  ;;  %202 = vmatmul.mubr.bf16.vlgmr.msra.gmra.mrb[0].mxu1 %v344_v18 }
 0x108   :  { %v195_v20 = vpop.f32.mrb[0].mxu0  ;;  %v203_v21 = vpop.f32.mrb[0].mxu1 }
 0x109   :  { %v196_v22 = vadd.f32 %v279_v19, %v195_v20  ;;  %v197_v23 = vpop.f32.mrb[1].mxu0  ;;  %v204_v24 = vadd.f32 %v279_v19, %v203_v21  ;;  %v205_v25 = vpop.f32.mrb[1].mxu1 }
 0x10a   :  { %v198_v26 = vpop.f32.mrb[2].mxu0  ;;  %v206_v27 = vpop.f32.mrb[2].mxu1 }
 0x10b   :  { %347 = vtanh.f32 %v196_v22  ;;  %v199_v28 = vadd.f32 %v279_v19, %v198_v26  ;;  %v200_v29 = vpop.f32.mrb[3].mxu0  ;;  %v208_v30 = vpop.f32.mrb[3].mxu1  ;;  %v207_v31 = vadd.f32 %v279_v19, %v206_v27 }
 0x10c   :  { %349 = vtanh.f32 %v204_v24 }
 0x10d   :  { %351 = vtanh.f32 %v199_v28 }
 0x10e   :  { %353 = vtanh.f32 %v207_v31 }
 0x115   :  { %v348_v32 = vpop.eup %347 }
 0x116   :  { %v350_v33 = vpop.eup %349 }
 0x117   :  { %v352_v34 = vpop.eup %351 }
 0x118   :  { %v214_v35 = vadd.f32 %v352_v34, %v348_v32  ;;  %v354_v37 = vpop.eup %353 }
 0x11a   :  { %v215_v36 = vadd.f32 %v350_v33, %v214_v35 }
 0x11c   :  { %v216_v38 = vadd.f32 %v354_v37, %v215_v36 }
 0x11e   :  { %v217_v39 = vrot.slane %v216_v38, 4 }
 0x120   :  { %v218_v40 = vadd.f32 %v217_v39, %v216_v38 }
 0x122   :  { %v219_v41 = vrot.slane %v218_v40, 2 }
 0x124   :  { %v220_v42 = vadd.f32 %v219_v41, %v218_v40 }
 0x126   :  { %v221_v43 = vrot.slane %v220_v42, 1 }
 0x128   :  { %v222_v44 = vadd.f32 %v221_v43, %v220_v42 }
 0x12a   :  { %v224_v45 = vmul.f32 0.03125, %v222_v44 }
 0x12c   :  { %v225_v46 = vsub.f32 %v348_v32, %v224_v45  ;;  %v226_v47 = vsub.f32 %v352_v34, %v224_v45  ;;  %v227_v48 = vsub.f32 %v350_v33, %v224_v45  ;;  %v228_v49 = vsub.f32 %v354_v37, %v224_v45 }
 0x12e   :  { %v229_v50 = vmul.f32 %v225_v46, %v225_v46  ;;  %v230_v51 = vmul.f32 %v226_v47, %v226_v47  ;;  %v231_v52 = vmul.f32 %v227_v48, %v227_v48  ;;  %v232_v54 = vmul.f32 %v228_v49, %v228_v49 }
 0x130   :  { %v233_v53 = vadd.f32 %v230_v51, %v229_v50 }
 0x132   :  { %v234_v55 = vadd.f32 %v233_v53, %v231_v52 }
 0x134   :  { %v235_v56 = vadd.f32 %v234_v55, %v232_v54 }
 0x136   :  { %v236_v57 = vrot.slane %v235_v56, 4 }
 0x138   :  { %v237_v58 = vadd.f32 %v236_v57, %v235_v56 }
 0x13a   :  { %v238_v59 = vrot.slane %v237_v58, 2 }
 0x13c   :  { %v239_v60 = vadd.f32 %v238_v59, %v237_v58 }
 0x13e   :  { %v240_v61 = vrot.slane %v239_v60, 1 }
 0x140   :  { %v241_v62 = vadd.f32 %v240_v61, %v239_v60 }
 0x142   :  { %v242_v63 = vmul.f32 0.03125, %v241_v62 }
 0x144   :  { %v243_v0 = vadd.f32 1e-05, %v242_v63 }
 0x146   :  { %355 = vrsqrt.f32 %v243_v0 }
 0x150   :  { %v356_v1 = vpop.eup %355 }
 0x151   :  { %v245_v3 = vmul.f32 %v356_v1, %v225_v46  ;;  %v246_v4 = vmul.f32 %v356_v1, %v226_v47  ;;  %v247_v5 = vmul.f32 %v356_v1, %v227_v48  ;;  %v248_v6 = vmul.f32 %v356_v1, %v228_v49 }
 0x153   :  { %v256_v8 = vmul.f32 %v299_v2, %v245_v3  ;;  %v257_v9 = vmul.f32 %v299_v2, %v246_v4  ;;  %v258_v10 = vmul.f32 %v299_v2, %v247_v5  ;;  %v259_v11 = vmul.f32 %v299_v2, %v248_v6 }
 0x155   :  { %v267_v12 = vadd.f32 %v300_v7, %v256_v8  ;;  %v268_v13 = vadd.f32 %v300_v7, %v257_v9  ;;  %v269_v14 = vadd.f32 %v300_v7, %v258_v10  ;;  %v270_v15 = vadd.f32 %v300_v7, %v259_v11 }
 0x157   :  { %271 = vst [vmem:[%s491_s5] sm:$0xff] %v267_v12  ;;  %272 = vst [vmem:[%s491_s5 + $0x8] sm:$0xff] %v268_v13 }
 0x158   :  { %273 = vst [vmem:[%s491_s5 + $0x10] sm:$0xff] %v269_v14  ;;  %274 = vst [vmem:[%s491_s5 + $0x18] sm:$0xff] %v270_v15 }

// kernel: rsrae_forward.10
= control target key start
LH: loop header
LB: loop body
LE: loop exit
PB: predicated region body
PF: predicated region fallthrough
CT: control target
= control target key end

     0   :  { %v224_v0 = vmov 0   ;;  %vm107_vm0 = vcmask 130048   ;;  %s297_s1 = inlined_call_operand.vmem [shape: bf16[144,128], index: 1, kind: input, shape index: {}]   ;;  %s298_s0 = inlined_call_operand.vmem [shape: bf16[8,144], index: 0, kind: input, shape index: {}]   ;;  %s299_s2 = inlined_call_operand.vmem [shape: f32[1,128], index: 2, kind: input, shape index: {}]   ;;  %s300_s3 = inlined_call_operand.vmem [shape: f32[1,128], index: 3, kind: input, shape index: {}]   ;;  %s301_s4 = inlined_call_operand.vmem [shape: f32[1,128], index: 4, kind: input, shape index: {}]   ;;  %s302_s5 = inlined_call_operand.vmem [shape: f32[8,128], index: 5, kind: output, shape index: {}]  }
   0x1   :  { %111 = vmatprep.subr.bf16.mxu0 %v224_v0  ;;  %v209_v1 = vld [vmem:[%s297_s1] sm:$0xff]   ;;  %v210_v2 = vld [vmem:[%s297_s1 + $0x8] sm:$0xff]   ;;  %v211_v3 = vld [vmem:[%s297_s1 + $0x10] sm:$0xff]  }
   0x2   :  { %112 = vmatpush1.bf16.msra.mxu0 %v209_v1  ;;  %v21_v4 = vld [vmem:[%s298_s0] sm:$0xff]  ;;  %v212_v5 = vld [vmem:[%s297_s1 + $0x18] sm:$0xff]   ;;  %v214_v8 = vld [vmem:[%s297_s1 + $0x28] sm:$0xff]  }
   0x3   :  { %113 = vmatprep.subr.bf16.mxu0 %v224_v0  ;;  %v195_v6 = vcombine.high %v21_v4, %v21_v4  ;;  %v213_v7 = vld [vmem:[%s297_s1 + $0x20] sm:$0xff]   ;;  %v215_v9 = vld [vmem:[%s297_s1 + $0x30] sm:$0xff]   ;;  %v216_v10 = vld [vmem:[%s297_s1 + $0x38] sm:$0xff]   ;;  %v194_v12 = vcombine.low %v21_v4, %v21_v4 }
   0x4   :  { %v217_v11 = vld [vmem:[%s297_s1 + $0x40] sm:$0xff]  }
   0x5   :  { %205 = vmatprep.mubr.msk.bf16.mxu0 %vm107_vm0, %v195_v6  ;;  %v193_v13 = vld [vmem:[%s299_s2] ss:$0 sm:$0xff] }
   0x6   :  { %114 = vmatpush1.bf16.msra.mxu0 %v210_v2  ;;  %v206_v38 = vld [vmem:[%s300_s3] ss:$0 sm:$0xff] }
   0x7   :  { %115 = vmatprep.subr.bf16.mxu0 %v224_v0  ;;  %v207_v40 = vld [vmem:[%s301_s4] ss:$0 sm:$0xff] }
   0xa   :  { %116 = vmatpush1.bf16.msra.mxu0 %v211_v3 }
   0xb   :  { %117 = vmatprep.subr.bf16.mxu0 %v224_v0 }
   0xe   :  { %118 = vmatpush1.bf16.msra.mxu0 %v212_v5 }
   0xf   :  { %119 = vmatprep.subr.bf16.mxu0 %v224_v0 }
  0x12   :  { %120 = vmatpush1.bf16.msra.mxu0 %v213_v7 }
  0x13   :  { %121 = vmatprep.subr.bf16.mxu0 %v224_v0 }
  0x16   :  { %122 = vmatpush1.bf16.msra.mxu0 %v214_v8 }
  0x17   :  { %123 = vmatprep.subr.bf16.mxu0 %v224_v0 }
  0x1a   :  { %124 = vmatpush1.bf16.msra.mxu0 %v215_v9 }
  0x1b   :  { %125 = vmatprep.subr.bf16.mxu0 %v224_v0 }
  0x1e   :  { %126 = vmatpush1.bf16.msra.mxu0 %v216_v10 }
  0x1f   :  { %127 = vmatprep.subr.bf16.mxu0 %v224_v0 }
  0x22   :  { %128 = vmatpush1.bf16.msra.mxu0 %v217_v11 }
  0x25   :  { %144 = vmatmul.mubr.bf16.vlgmr.msra.gmra.mrb[0].mxu0 %v194_v12 }
  0xf8   :  { %v145_v14 = vpop.f32.mrb[0].mxu0 }
  0xf9   :  { %v146_v15 = vadd.f32 %v193_v13, %v145_v14  ;;  %v147_v16 = vpop.f32.mrb[1].mxu0 }
  0xfa   :  { %v148_v17 = vpop.f32.mrb[2].mxu0 }
  0xfb   :  { %220 = vtanh.f32 %v146_v15  ;;  %v149_v18 = vpop.f32.mrb[3].mxu0 }
 0x105   :  { %v221_v19 = vpop.eup %220 }
 0x106   :  { %v152_v20 = vrot.slane %v221_v19, 4 }
 0x108   :  { %v153_v21 = vadd.f32 %v221_v19, %v152_v20 }
 0x10a   :  { %v154_v22 = vrot.slane %v153_v21, 2 }
 0x10c   :  { %v155_v23 = vadd.f32 %v154_v22, %v153_v21 }
 0x10e   :  { %v156_v24 = vrot.slane %v155_v23, 1 }
 0x110   :  { %v157_v25 = vadd.f32 %v156_v24, %v155_v23 }
 0x112   :  { %v159_v26 = vmul.f32 0.125, %v157_v25 }
 0x114   :  { %v160_v27 = vsub.f32 %v221_v19, %v159_v26 }
 0x116   :  { %v161_v28 = vmul.f32 %v160_v27, %v160_v27 }
 0x118   :  { %v162_v29 = vrot.slane %v161_v28, 4 }
 0x11a   :  { %v163_v30 = vadd.f32 %v162_v29, %v161_v28 }
 0x11c   :  { %v164_v31 = vrot.slane %v163_v30, 2 }
 0x11e   :  { %v165_v32 = vadd.f32 %v164_v31, %v163_v30 }
 0x120   :  { %v166_v33 = vrot.slane %v165_v32, 1 }
 0x122   :  { %v167_v34 = vadd.f32 %v166_v33, %v165_v32 }
 0x124   :  { %v168_v35 = vmul.f32 0.125, %v167_v34 }
 0x126   :  { %v169_v36 = vadd.f32 1e-05, %v168_v35 }
 0x128   :  { %222 = vrsqrt.f32 %v169_v36 }
 0x132   :  { %v223_v37 = vpop.eup %222 }
 0x133   :  { %v171_v39 = vmul.f32 %v223_v37, %v160_v27 }
 0x135   :  { %v179_v41 = vmul.f32 %v206_v38, %v171_v39 }
 0x137   :  { %v187_v42 = vadd.f32 %v207_v40, %v179_v41 }
 0x139   :  { %188 = vst [vmem:[%s302_s5] sm:$0xff] %v187_v42 }

// kernel: rsrae_forward.11
= control target key start
LH: loop header
LB: loop body
LE: loop exit
PB: predicated region body
PF: predicated region fallthrough
CT: control target
= control target key end

     0   :  { %v595_v0 = vmov 0.0   ;;  %vm596_vm0 = vmmov 0   ;;  %v597_v42 = vmov 0   ;;  %v161_v48 = vlaneseq  ;;  %s761_s1 = inlined_call_operand.vmem [shape: bf16[128,128], index: 1, kind: input, shape index: {}]   ;;  %s762_s2 = inlined_call_operand.vmem [shape: bf16[128,512], index: 2, kind: input, shape index: {}]   ;;  %s763_s0 = inlined_call_operand.vmem [shape: bf16[2,128], index: 0, kind: input, shape index: {}]   ;;  %s764_s4 = inlined_call_operand.vmem [shape: f32[2,128], index: 4, kind: output, shape index: {0}]   ;;  %s765_s3 = inlined_call_operand.vmem [shape: f32[1,512], index: 3, kind: input, shape index: {}]   ;;  %s766_s5 = inlined_call_operand.vmem [shape: f32[2,512], index: 5, kind: output, shape index: {1}]  }
   0x1   :  { %507 = vmatprep.subr.bf16.mxu0 %v595_v0  ;;  %v531_v1 = vld [vmem:[%s761_s1] sm:$0xff]   ;;  %523 = vmatprep.mubr.msk.bf16.mxu0 %vm596_vm0, %v595_v0  ;;  %v532_v2 = vld [vmem:[%s761_s1 + $0x8] sm:$0xff]   ;;  %v533_v3 = vld [vmem:[%s761_s1 + $0x10] sm:$0xff]  }
   0x2   :  { %508 = vmatpush3.bf16.msra.mxu0 %v531_v1  ;;  %v539_v4 = vld [vmem:[%s762_s2 + $0x4] ss:$16 sps:$4 sm:$0xff]   ;;  %v534_v5 = vld [vmem:[%s761_s1 + $0x18] sm:$0xff]   ;;  %v544_v6 = vld [vmem:[%s762_s2] ss:$16 sps:$4 sm:$0xff]   ;;  %373 = vmatprep.mubr.bf16.mxu1 %v597_v42  ;;  %v162_v49 = vshrl.u32 %v161_v48, 7 }
   0x3   :  { %509 = vmatprep.subr.bf16.mxu0 %v595_v0  ;;  %341 = vmatprep.subr.bf16.mxu1 %v539_v4  ;;  %v545_v7 = vld [vmem:[%s762_s2 + $0x24] ss:$16 sps:$4 sm:$0xff]   ;;  %v550_v9 = vld [vmem:[%s762_s2 + $0x20] ss:$16 sps:$4 sm:$0xff]   ;;  %v536_v13 = vld [vmem:[%s761_s1 + $0x28] sm:$0xff]  }
   0x4   :  { %342 = vmatpush1.bf16.msra.mxu1 %v544_v6  ;;  %v535_v8 = vld [vmem:[%s761_s1 + $0x20] sm:$0xff]   ;;  %v537_v16 = vld [vmem:[%s761_s1 + $0x30] sm:$0xff]   ;;  %v538_v19 = vld [vmem:[%s761_s1 + $0x38] sm:$0xff]   ;;  %v163_v50 = vsub.s32 0, %v162_v49  ;;  %v171_v51 = vsub.s32 2, %v162_v49  ;;  %v167_v53 = vsub.s32 1, %v162_v49 }
   0x5   :  { %343 = vmatprep.subr.bf16.mxu1 %v545_v7  ;;  %v551_v10 = vld [vmem:[%s762_s2 + $0x44] ss:$16 sps:$4 sm:$0xff]   ;;  %v556_v11 = vld [vmem:[%s762_s2 + $0x40] ss:$16 sps:$4 sm:$0xff]   ;;  %v543_v20 = vld [vmem:[%s762_s2 + $0xc] ss:$16 sps:$4 sm:$0xff]  }
   0x6   :  { %510 = vmatpush3.bf16.msra.mxu0 %v532_v2  ;;  %v557_v12 = vld [vmem:[%s762_s2 + $0x64] ss:$16 sps:$4 sm:$0xff]   ;;  %v562_v14 = vld [vmem:[%s762_s2 + $0x60] ss:$16 sps:$4 sm:$0xff]   ;;  %v541_v24 = vld [vmem:[%s762_s2 + $0x8] ss:$16 sps:$4 sm:$0xff]  }
   0x7   :  { %511 = vmatprep.subr.bf16.mxu0 %v595_v0  ;;  %v563_v15 = vld [vmem:[%s762_s2 + $0x84] ss:$16 sps:$4 sm:$0xff]   ;;  %v568_v17 = vld [vmem:[%s762_s2 + $0x80] ss:$16 sps:$4 sm:$0xff]   ;;  %v549_v25 = vld [vmem:[%s762_s2 + $0x2c] ss:$16 sps:$4 sm:$0xff]  }
   0x8   :  { %344 = vmatpush1.bf16.msra.mxu1 %v550_v9  ;;  %v569_v18 = vld [vmem:[%s762_s2 + $0xa4] ss:$16 sps:$4 sm:$0xff]   ;;  %v574_v21 = vld [vmem:[%s762_s2 + $0xa0] ss:$16 sps:$4 sm:$0xff]   ;;  %v547_v28 = vld [vmem:[%s762_s2 + $0x28] ss:$16 sps:$4 sm:$0xff]  }
   0x9   :  { %345 = vmatprep.subr.bf16.mxu1 %v551_v10  ;;  %v575_v22 = vld [vmem:[%s762_s2 + $0xc4] ss:$16 sps:$4 sm:$0xff]   ;;  %v20_v23 = vld [vmem:[%s763_s0] sm:$0x1]  ;;  %v555_v29 = vld [vmem:[%s762_s2 + $0x4c] ss:$16 sps:$4 sm:$0xff]  }
   0xa   :  { %512 = vmatpush3.bf16.msra.mxu0 %v533_v3  ;;  %v580_v26 = vld [vmem:[%s762_s2 + $0xc0] ss:$16 sps:$4 sm:$0xff]   ;;  %v581_v27 = vld [vmem:[%s762_s2 + $0xe4] ss:$16 sps:$4 sm:$0xff]   ;;  %v553_v30 = vld [vmem:[%s762_s2 + $0x48] ss:$16 sps:$4 sm:$0xff]  }
   0xb   :  { %513 = vmatprep.subr.bf16.mxu0 %v595_v0  ;;  %v561_v31 = vld [vmem:[%s762_s2 + $0x6c] ss:$16 sps:$4 sm:$0xff]   ;;  %v559_v32 = vld [vmem:[%s762_s2 + $0x68] ss:$16 sps:$4 sm:$0xff]   ;;  %v586_v41 = vld [vmem:[%s762_s2 + $0xe0] ss:$16 sps:$4 sm:$0xff]  }
   0xc   :  { %346 = vmatpush1.bf16.msra.mxu1 %v556_v11  ;;  %v567_v33 = vld [vmem:[%s762_s2 + $0x8c] ss:$16 sps:$4 sm:$0xff]   ;;  %v565_v34 = vld [vmem:[%s762_s2 + $0x88] ss:$16 sps:$4 sm:$0xff]   ;;  %v159_v52 = vld [vmem:[%s765_s3] sm:$0xf] }
   0xd   :  { %347 = vmatprep.subr.bf16.mxu1 %v557_v12  ;;  %v573_v35 = vld [vmem:[%s762_s2 + $0xac] ss:$16 sps:$4 sm:$0xff]   ;;  %v571_v36 = vld [vmem:[%s762_s2 + $0xa8] ss:$16 sps:$4 sm:$0xff]   ;;  %v175_v54 = vsub.s32 3, %v162_v49  ;;  %v164_v55 = vrot.slane %v159_v52, %v163_v50  ;;  %v172_v56 = vrot.slane %v159_v52, %v171_v51  ;;  %v168_v57 = vrot.slane %v159_v52, %v167_v53 }
   0xe   :  { %514 = vmatpush3.bf16.msra.mxu0 %v534_v5  ;;  %v579_v37 = vld [vmem:[%s762_s2 + $0xcc] ss:$16 sps:$4 sm:$0xff]   ;;  %v577_v38 = vld [vmem:[%s762_s2 + $0xc8] ss:$16 sps:$4 sm:$0xff]   ;;  %v598_v7 = vmov 1983009808  }
   0xf   :  { %515 = vmatprep.subr.bf16.mxu0 %v595_v0  ;;  %v585_v39 = vld [vmem:[%s762_s2 + $0xec] ss:$16 sps:$4 sm:$0xff]   ;;  %v583_v40 = vld [vmem:[%s762_s2 + $0xe8] ss:$16 sps:$4 sm:$0xff]   ;;  %v176_v58 = vrot.slane %v159_v52, %v175_v54 }
  0x10   :  { %348 = vmatpush1.bf16.msra.mxu1 %v562_v14 }
  0x11   :  { %349 = vmatprep.subr.bf16.mxu1 %v563_v15 }
  0x12   :  { %516 = vmatpush3.bf16.msra.mxu0 %v535_v8  ;;  %v434_v8 = vunpack.c.l.s4 %v598_v7 }
  0x13   :  { %517 = vmatprep.subr.bf16.mxu0 %v595_v0 }
  0x14   :  { %350 = vmatpush1.bf16.msra.mxu1 %v568_v17  ;;  %v435_v9 = vunpack.c.0.s8 %v434_v8 }
  0x15   :  { %351 = vmatprep.subr.bf16.mxu1 %v569_v18 }
  0x16   :  { %518 = vmatpush3.bf16.msra.mxu0 %v536_v13  ;;  %v438_v12 = vsub.s32 %v435_v9, %v162_v49 }
  0x17   :  { %519 = vmatprep.subr.bf16.mxu0 %v595_v0 }
  0x18   :  { %352 = vmatpush1.bf16.msra.mxu1 %v574_v21 }
  0x19   :  { %353 = vmatprep.subr.bf16.mxu1 %v575_v22 }
  0x1a   :  { %520 = vmatpush3.bf16.msra.mxu0 %v537_v16 }
  0x1b   :  { %521 = vmatprep.subr.bf16.mxu0 %v595_v0 }
  0x1c   :  { %354 = vmatpush1.bf16.msra.mxu1 %v580_v26 }
  0x1d   :  { %355 = vmatprep.subr.bf16.mxu1 %v581_v27 }
  0x1e   :  { %522 = vmatpush3.bf16.msra.mxu0 %v538_v19 }
  0x1f   :  { %382 = vmatprep.subr.bf16.mxu0 %v543_v20 }
  0x20   :  { %356 = vmatpush1.bf16.msra.mxu1 %v586_v41 }
  0x21   :  { %524 = vmatmul.mubr.bf16.vlgmr.msra.gmra.mrb[0].mxu0 %v20_v23 }
  0x22   :  { %383 = vmatpush1.bf16.msra.mxu0 %v541_v24  ;;  %414 = vmatprep.mubr.bf16.mxu0 %v597_v42 }
  0x23   :  { %384 = vmatprep.subr.bf16.mxu0 %v549_v25 }
  0x26   :  { %385 = vmatpush1.bf16.msra.mxu0 %v547_v28 }
  0x27   :  { %386 = vmatprep.subr.bf16.mxu0 %v555_v29 }
  0x2a   :  { %387 = vmatpush1.bf16.msra.mxu0 %v553_v30 }
  0x2b   :  { %388 = vmatprep.subr.bf16.mxu0 %v561_v31 }
  0x2e   :  { %389 = vmatpush1.bf16.msra.mxu0 %v559_v32 }
  0x2f   :  { %390 = vmatprep.subr.bf16.mxu0 %v567_v33 }
  0x32   :  { %391 = vmatpush1.bf16.msra.mxu0 %v565_v34 }
  0x33   :  { %392 = vmatprep.subr.bf16.mxu0 %v573_v35 }
  0x36   :  { %393 = vmatpush1.bf16.msra.mxu0 %v571_v36 }
  0x37   :  { %394 = vmatprep.subr.bf16.mxu0 %v579_v37 }
  0x3a   :  { %395 = vmatpush1.bf16.msra.mxu0 %v577_v38 }
  0x3b   :  { %396 = vmatprep.subr.bf16.mxu0 %v585_v39 }
  0x3e   :  { %397 = vmatpush1.bf16.msra.mxu0 %v583_v40 }
  0xf4   :  { %v119_v43 = vpop.f32.mrb[0].mxu0 }
  0xf5   :  { %125 = vst [vmem:[%s764_s4] sm:$0x3] %v119_v43  ;;  %v126_v44 = vpack.c.bf16 %v119_v43, %v119_v43  ;;  %v525_v45 = vpop.f32.mrb[1].mxu0 }
  0xf6   :  { %v122_v46 = vpop.f32.mrb[2].mxu0 }
  0xf7   :  { %v526_v47 = vpop.f32.mrb[3].mxu0  ;;  %374 = vmatmul.mubr.bf16.vlgmr.msra.gmra.mrb[0].mxu1 %v126_v44  ;;  %415 = vmatmul.mubr.bf16.vlgmr.msra.gmra.mrb[4].mxu0 %v126_v44 }
 0x1ca   :  { %v375_v59 = vpop.f32.mrb[0].mxu1  ;;  %v416_v60 = vpop.f32.mrb[4].mxu0 }
 0x1cb   :  { %v376_v61 = vadd.f32 %v375_v59, %v164_v55  ;;  %v417_v62 = vadd.f32 %v416_v60, %v172_v56  ;;  %v377_v63 = vpop.f32.mrb[1].mxu1  ;;  %v418_v0 = vpop.f32.mrb[5].mxu0 }
 0x1cc   :  { %v378_v1 = vadd.f32 %v377_v63, %v168_v57  ;;  %v419_v2 = vadd.f32 %v418_v0, %v176_v58  ;;  %v379_v3 = vpop.f32.mrb[2].mxu1  ;;  %v420_v4 = vpop.f32.mrb[6].mxu0 }
 0x1cd   :  { %587 = vtanh.f32 %v376_v61  ;;  %v380_v5 = vpop.f32.mrb[3].mxu1  ;;  %v421_v6 = vpop.f32.mrb[7].mxu0 }
 0x1ce   :  { %589 = vtanh.f32 %v417_v62 }
 0x1cf   :  { %591 = vtanh.f32 %v378_v1 }
 0x1d0   :  { %593 = vtanh.f32 %v419_v2 }
 0x1d7   :  { %v588_v10 = vpop.eup %587 }
 0x1d8   :  { %v590_v11 = vpop.eup %589 }
 0x1d9   :  { %v592_v13 = vpop.eup %591 }
 0x1da   :  { %v594_v14 = vpop.eup %593  ;;  %v431_v15 = vcombine.low %v588_v10, %v592_v13 }
 0x1db   :  { %v432_v16 = vcombine.low %v590_v11, %v594_v14 }
 0x1dc   :  { %v439_v17 = vrot.slane %v431_v15, %v438_v12 }
 0x1dd   :  { %v446_v18 = vrot.slane %v432_v16, %v438_v12 }
 0x1df   :  { %v447_v19 = vcombine.low %v439_v17, %v446_v18 }
 0x1e1   :  { %449 = vst [vmem:[%s766_s5] sm:$0xff] %v447_v19 }

// kernel: rsrae_forward.12
= control target key start
LH: loop header
LB: loop body
LE: loop exit
PB: predicated region body
PF: predicated region fallthrough
CT: control target
= control target key end

     0   :  { %s92_s0 = inlined_call_operand.vmem [shape: f32[8,128], index: 0, kind: input, shape index: {}]   ;;  %s93_s1 = inlined_call_operand.vmem [shape: f32[1,128], index: 1, kind: input, shape index: {}]   ;;  %s94_s2 = inlined_call_operand.vmem [shape: f32[1,128], index: 2, kind: input, shape index: {}]   ;;  %s95_s3 = inlined_call_operand.vmem [shape: f32[8,128], index: 3, kind: output, shape index: {}]  }
   0x1   :  { %v14_v0 = vld [vmem:[%s92_s0] sm:$0xff] }
   0x2   :  { %v15_v1 = vrot.slane %v14_v0, 4  ;;  %v56_v19 = vld [vmem:[%s93_s1] ss:$0 sm:$0xff] }
   0x3   :  { %v57_v21 = vld [vmem:[%s94_s2] ss:$0 sm:$0xff] }
   0x4   :  { %v16_v2 = vadd.f32 %v15_v1, %v14_v0 }
   0x6   :  { %v17_v3 = vrot.slane %v16_v2, 2 }
   0x8   :  { %v18_v4 = vadd.f32 %v17_v3, %v16_v2 }
   0xa   :  { %v19_v5 = vrot.slane %v18_v4, 1 }
   0xc   :  { %v20_v6 = vadd.f32 %v19_v5, %v18_v4 }
   0xe   :  { %v22_v7 = vmul.f32 0.125, %v20_v6 }
  0x10   :  { %v23_v8 = vsub.f32 %v14_v0, %v22_v7 }
  0x12   :  { %v24_v9 = vmul.f32 %v23_v8, %v23_v8 }
  0x14   :  { %v25_v10 = vrot.slane %v24_v9, 4 }
  0x16   :  { %v26_v11 = vadd.f32 %v25_v10, %v24_v9 }
  0x18   :  { %v27_v12 = vrot.slane %v26_v11, 2 }
  0x1a   :  { %v28_v13 = vadd.f32 %v27_v12, %v26_v11 }
  0x1c   :  { %v29_v14 = vrot.slane %v28_v13, 1 }
  0x1e   :  { %v30_v15 = vadd.f32 %v29_v14, %v28_v13 }
  0x20   :  { %v31_v16 = vmul.f32 0.125, %v30_v15 }
  0x22   :  { %v32_v17 = vadd.f32 1e-05, %v31_v16 }
  0x24   :  { %58 = vrsqrt.f32 %v32_v17 }
  0x2e   :  { %v59_v18 = vpop.eup %58 }
  0x2f   :  { %v34_v20 = vmul.f32 %v59_v18, %v23_v8 }
  0x31   :  { %v42_v22 = vmul.f32 %v56_v19, %v34_v20 }
  0x33   :  { %v50_v23 = vadd.f32 %v57_v21, %v42_v22 }
  0x35   :  { %51 = vst [vmem:[%s95_s3] sm:$0xff] %v50_v23 }

// kernel: rsrae_forward.13
= control target key start
LH: loop header
LB: loop body
LE: loop exit
PB: predicated region body
PF: predicated region fallthrough
CT: control target
= control target key end

     0   :  { %vm210_vm0 = vcmask 261120   ;;  %s612_s1 = inlined_call_operand.vmem [shape: bf16[288,128], index: 1, kind: input, shape index: {}]   ;;  %s613_s0 = inlined_call_operand.vmem [shape: bf16[32,288], index: 0, kind: input, shape index: {}]   ;;  %s614_s2 = inlined_call_operand.vmem [shape: f32[1,128], index: 2, kind: input, shape index: {}]   ;;  %s615_s3 = inlined_call_operand.vmem [shape: f32[1,128], index: 3, kind: input, shape index: {}]   ;;  %s616_s4 = inlined_call_operand.vmem [shape: f32[1,128], index: 4, kind: input, shape index: {}]   ;;  %s617_s5 = inlined_call_operand.vmem [shape: f32[32,128], index: 5, kind: output, shape index: {}]  }
   0x1   :  { %v453_v0 = vld [vmem:[%s612_s1 + $0x40] sm:$0xff]   ;;  %v455_v2 = vld [vmem:[%s612_s1 + $0x48] sm:$0xff]   ;;  %v457_v4 = vld [vmem:[%s612_s1 + $0x50] sm:$0xff]  }
   0x2   :  { %v454_v1 = vld [vmem:[%s612_s1] sm:$0xff]   ;;  %413 = vmatprep.subr.bf16.mxu0 %v453_v0  ;;  %v456_v3 = vld [vmem:[%s612_s1 + $0x8] sm:$0xff]   ;;  %v458_v5 = vld [vmem:[%s612_s1 + $0x10] sm:$0xff]  }
   0x3   :  { %414 = vmatpush3.bf16.msra.mxu0 %v454_v1  ;;  %v459_v6 = vld [vmem:[%s612_s1 + $0x58] sm:$0xff]   ;;  %v461_v8 = vld [vmem:[%s612_s1 + $0x60] sm:$0xff]   ;;  %v463_v11 = vld [vmem:[%s612_s1 + $0x68] sm:$0xff]  }
   0x4   :  { %415 = vmatprep.subr.bf16.mxu0 %v455_v2  ;;  %v460_v7 = vld [vmem:[%s612_s1 + $0x18] sm:$0xff]   ;;  %v462_v9 = vld [vmem:[%s612_s1 + $0x20] sm:$0xff]   ;;  %v464_v12 = vld [vmem:[%s612_s1 + $0x28] sm:$0xff]  }
   0x5   :  { %v468_v10 = vld [vmem:[%s612_s1 + $0x80] sm:$0xff]   ;;  %v465_v13 = vld [vmem:[%s612_s1 + $0x70] sm:$0xff]   ;;  %v473_v15 = vld [vmem:[%s612_s1 + $0x88] sm:$0xff]  }
   0x6   :  { %445 = vmatprep.subr.bf16.mxu1 %v468_v10  ;;  %v472_v14 = vld [vmem:[%s613_s0 + $0x4] ss:$12 sps:$4 sm:$0xff]   ;;  %v474_v16 = vld [vmem:[%s613_s0 + $0x8] ss:$12 sps:$4 sm:$0xff]   ;;  %v475_v17 = vld [vmem:[%s613_s0 + $0x20] ss:$12 sps:$4 sm:$0xff]  }
   0x7   :  { %416 = vmatpush3.bf16.msra.mxu0 %v456_v3  ;;  %446 = vmatpush3.bf16.msra.mxu1 %v468_v10  ;;  %v466_v18 = vld [vmem:[%s612_s1 + $0x30] sm:$0xff]   ;;  %v467_v19 = vld [vmem:[%s612_s1 + $0x78] sm:$0xff]   ;;  %v470_v21 = vld [vmem:[%s613_s0] ss:$12 sps:$4 sm:$0xff]  }
   0x8   :  { %417 = vmatprep.subr.bf16.mxu0 %v457_v4  ;;  %249 = vmatprep.mubr.bf16.mxu0 %v472_v14  ;;  %v469_v20 = vld [vmem:[%s612_s1 + $0x38] sm:$0xff]   ;;  %v384_v30 = vld [vmem:[%s614_s2] ss:$0 sm:$0xff] }
   0x9   :  { %447 = vmatprep.subr.bf16.mxu1 %v473_v15  ;;  %449 = vmatprep.mubr.msk.bf16.mxu1 %vm210_vm0, %v474_v16  ;;  %v476_v22 = vld [vmem:[%s613_s0 + $0x1c] ss:$12 sps:$4 sm:$0xff]   ;;  %v478_v23 = vld [vmem:[%s613_s0 + $0x18] ss:$12 sps:$4 sm:$0xff]  }
   0xb   :  { %418 = vmatpush3.bf16.msra.mxu0 %v458_v5  ;;  %448 = vmatpush3.bf16.msra.mxu1 %v473_v15 }
   0xc   :  { %419 = vmatprep.subr.bf16.mxu0 %v459_v6 }
   0xe   :  { %450 = vmatmul.mubr.msk.bf16.vlgmr.msra.gmra.mrb[0].mxu1 %vm210_vm0, %v475_v17 }
   0xf   :  { %420 = vmatpush3.bf16.msra.mxu0 %v460_v7 }
  0x10   :  { %421 = vmatprep.subr.bf16.mxu0 %v461_v8 }
  0x13   :  { %422 = vmatpush3.bf16.msra.mxu0 %v462_v9 }
  0x14   :  { %423 = vmatprep.subr.bf16.mxu0 %v463_v11 }
  0x17   :  { %424 = vmatpush3.bf16.msra.mxu0 %v464_v12 }
  0x18   :  { %425 = vmatprep.subr.bf16.mxu0 %v465_v13 }
  0x1b   :  { %426 = vmatpush3.bf16.msra.mxu0 %v466_v18 }
  0x1c   :  { %427 = vmatprep.subr.bf16.mxu0 %v467_v19  ;;  %v411_v19 = vld [vmem:[%s615_s3] ss:$0 sm:$0xff] }
  0x1f   :  { %428 = vmatpush3.bf16.msra.mxu0 %v469_v20 }
  0x22   :  { %250 = vmatmul.mubr.bf16.vlgmr.msra.gmra.mrb[0].mxu0 %v470_v21 }
  0x23   :  { %257 = vmatprep.mubr.bf16.mxu0 %v476_v22 }
  0x2a   :  { %258 = vmatmul.mubr.bf16.gmra.mrb[4].mxu0 %v478_v23 }
  0xe1   :  { %v451_v24 = vpop.f32.mrb[0].mxu1 }
  0xe2   :  { %v300_v25 = vpop.f32.mrb[1].mxu1 }
  0xe3   :  { %v452_v26 = vpop.f32.mrb[2].mxu1 }
  0xe4   :  { %v303_v27 = vpop.f32.mrb[3].mxu1 }
  0xf5   :  { %v429_v28 = vpop.f32.mrb[0].mxu0 }
  0xf6   :  { %v430_v29 = vpop.f32.mrb[1].mxu0 }
  0xf7   :  { %v431_v31 = vadd.f32 %v430_v29, %v429_v28  ;;  %v432_v32 = vpop.f32.mrb[2].mxu0 }
  0xf8   :  { %v433_v33 = vpop.f32.mrb[3].mxu0 }
  0xf9   :  { %v434_v34 = vadd.f32 %v433_v33, %v432_v32  ;;  %v252_v35 = vadd.f32 %v431_v31, %v384_v30 }
  0xfb   :  { %v301_v36 = vadd.f32 %v300_v25, %v252_v35  ;;  %v255_v37 = vadd.f32 %v434_v34, %v384_v30 }
  0xfd   :  { %v304_v38 = vadd.f32 %v303_v27, %v255_v37  ;;  %v435_v39 = vpop.f32.mrb[4].mxu0  ;;  %479 = vtanh.f32 %v301_v36 }
  0xfe   :  { %v436_v40 = vpop.f32.mrb[5].mxu0 }
  0xff   :  { %481 = vtanh.f32 %v304_v38  ;;  %v437_v41 = vadd.f32 %v436_v40, %v435_v39  ;;  %v438_v42 = vpop.f32.mrb[6].mxu0 }
 0x100   :  { %v439_v43 = vpop.f32.mrb[7].mxu0 }
 0x101   :  { %v260_v44 = vadd.f32 %v437_v41, %v384_v30  ;;  %v440_v45 = vadd.f32 %v439_v43, %v438_v42 }
 0x103   :  { %v309_v46 = vadd.f32 %v451_v24, %v260_v44  ;;  %v263_v47 = vadd.f32 %v440_v45, %v384_v30  ;;  %v412_v24 = vld [vmem:[%s616_s4] ss:$0 sm:$0xff] }
 0x105   :  { %483 = vtanh.f32 %v309_v46  ;;  %v312_v48 = vadd.f32 %v452_v26, %v263_v47 }
 0x107   :  { %485 = vtanh.f32 %v312_v48  ;;  %v480_v49 = vpop.eup %479 }
 0x109   :  { %v482_v50 = vpop.eup %481 }
 0x10a   :  { %v319_v51 = vadd.f32 %v482_v50, %v480_v49 }
 0x10f   :  { %v484_v52 = vpop.eup %483 }
 0x110   :  { %v320_v53 = vadd.f32 %v484_v52, %v319_v51 }
 0x111   :  { %v486_v54 = vpop.eup %485 }
 0x112   :  { %v321_v55 = vadd.f32 %v486_v54, %v320_v53 }
 0x114   :  { %v322_v56 = vrot.slane %v321_v55, 4 }
 0x116   :  { %v323_v57 = vadd.f32 %v322_v56, %v321_v55 }
 0x118   :  { %v324_v58 = vrot.slane %v323_v57, 2 }
 0x11a   :  { %v325_v59 = vadd.f32 %v324_v58, %v323_v57 }
 0x11c   :  { %v326_v60 = vrot.slane %v325_v59, 1 }
 0x11e   :  { %v327_v61 = vadd.f32 %v326_v60, %v325_v59 }
 0x120   :  { %v329_v62 = vmul.f32 0.03125, %v327_v61 }
 0x122   :  { %v330_v63 = vsub.f32 %v480_v49, %v329_v62  ;;  %v331_v0 = vsub.f32 %v482_v50, %v329_v62  ;;  %v332_v1 = vsub.f32 %v484_v52, %v329_v62  ;;  %v333_v2 = vsub.f32 %v486_v54, %v329_v62 }
 0x124   :  { %v334_v3 = vmul.f32 %v330_v63, %v330_v63  ;;  %v335_v4 = vmul.f32 %v331_v0, %v331_v0  ;;  %v336_v5 = vmul.f32 %v332_v1, %v332_v1  ;;  %v337_v7 = vmul.f32 %v333_v2, %v333_v2 }
 0x126   :  { %v338_v6 = vadd.f32 %v335_v4, %v334_v3 }
 0x128   :  { %v339_v8 = vadd.f32 %v338_v6, %v336_v5 }
 0x12a   :  { %v340_v9 = vadd.f32 %v339_v8, %v337_v7 }
 0x12c   :  { %v341_v10 = vrot.slane %v340_v9, 4 }
 0x12e   :  { %v342_v11 = vadd.f32 %v341_v10, %v340_v9 }
 0x130   :  { %v343_v12 = vrot.slane %v342_v11, 2 }
 0x132   :  { %v344_v13 = vadd.f32 %v343_v12, %v342_v11 }
 0x134   :  { %v345_v14 = vrot.slane %v344_v13, 1 }
 0x136   :  { %v346_v15 = vadd.f32 %v345_v14, %v344_v13 }
 0x138   :  { %v347_v16 = vmul.f32 0.03125, %v346_v15 }
 0x13a   :  { %v348_v17 = vadd.f32 1e-05, %v347_v16 }
 0x13c   :  { %487 = vrsqrt.f32 %v348_v17 }
 0x146   :  { %v488_v18 = vpop.eup %487 }
 0x147   :  { %v350_v20 = vmul.f32 %v488_v18, %v330_v63  ;;  %v351_v21 = vmul.f32 %v488_v18, %v331_v0  ;;  %v352_v22 = vmul.f32 %v488_v18, %v332_v1  ;;  %v353_v23 = vmul.f32 %v488_v18, %v333_v2 }
 0x149   :  { %v361_v25 = vmul.f32 %v411_v19, %v350_v20  ;;  %v362_v26 = vmul.f32 %v411_v19, %v351_v21  ;;  %v363_v27 = vmul.f32 %v411_v19, %v352_v22  ;;  %v364_v28 = vmul.f32 %v411_v19, %v353_v23 }
 0x14b   :  { %v372_v29 = vadd.f32 %v412_v24, %v361_v25  ;;  %v373_v30 = vadd.f32 %v412_v24, %v362_v26  ;;  %v374_v31 = vadd.f32 %v412_v24, %v363_v27  ;;  %v375_v32 = vadd.f32 %v412_v24, %v364_v28 }
 0x14d   :  { %376 = vst [vmem:[%s617_s5] sm:$0xff] %v372_v29  ;;  %377 = vst [vmem:[%s617_s5 + $0x8] sm:$0xff] %v373_v30 }
 0x14e   :  { %378 = vst [vmem:[%s617_s5 + $0x10] sm:$0xff] %v374_v31  ;;  %379 = vst [vmem:[%s617_s5 + $0x18] sm:$0xff] %v375_v32 }

// kernel: rsrae_forward.14
= control target key start
LH: loop header
LB: loop body
LE: loop exit
PB: predicated region body
PF: predicated region fallthrough
CT: control target
= control target key end

     0   :  { %v1048_v0 = vmov 0   ;;  %vm412_vm0 = vcmask 130048   ;;  %s1374_s1 = inlined_call_operand.vmem [shape: bf16[400,128], index: 1, kind: input, shape index: {}]   ;;  %s1375_s0 = inlined_call_operand.vmem [shape: bf16[128,400], index: 0, kind: input, shape index: {}]   ;;  %s1376_s2 = inlined_call_operand.vmem [shape: f32[1,128], index: 2, kind: input, shape index: {}]   ;;  %s1377_s3 = inlined_call_operand.vmem [shape: f32[1,128], index: 3, kind: input, shape index: {}]   ;;  %s1378_s4 = inlined_call_operand.vmem [shape: f32[1,128], index: 4, kind: input, shape index: {}]   ;;  %s1379_s5 = inlined_call_operand.vmem [shape: f32[128,128], index: 5, kind: output, shape index: {}]  }
   0x1   :  { %534 = vmatprep.subr.bf16.mxu1 %v1048_v0  ;;  %v941_v1 = vld [vmem:[%s1374_s1 + $0x40] sm:$0xff]   ;;  %v944_v4 = vld [vmem:[%s1374_s1 + $0x48] sm:$0xff]   ;;  %v947_v7 = vld [vmem:[%s1374_s1 + $0x50] sm:$0xff]  }
   0x2   :  { %v942_v2 = vld [vmem:[%s1374_s1 + $0x80] sm:$0xff]   ;;  %876 = vmatprep.subr.bf16.mxu0 %v941_v1  ;;  %v945_v5 = vld [vmem:[%s1374_s1 + $0x88] sm:$0xff]   ;;  %v948_v8 = vld [vmem:[%s1374_s1 + $0x90] sm:$0xff]  }
   0x3   :  { %v943_v3 = vld [vmem:[%s1374_s1] sm:$0xff]   ;;  %535 = vmatpush1.bf16.msra.mxu1 %v942_v2  ;;  %v946_v6 = vld [vmem:[%s1374_s1 + $0x8] sm:$0xff]   ;;  %v949_v9 = vld [vmem:[%s1374_s1 + $0x10] sm:$0xff]  }
   0x4   :  { %877 = vmatpush3.bf16.msra.mxu0 %v943_v3  ;;  %536 = vmatprep.subr.bf16.mxu1 %v1048_v0  ;;  %v950_v10 = vld [vmem:[%s1374_s1 + $0x58] sm:$0xff]   ;;  %v953_v13 = vld [vmem:[%s1374_s1 + $0x60] sm:$0xff]   ;;  %v956_v16 = vld [vmem:[%s1374_s1 + $0x68] sm:$0xff]  }
   0x5   :  { %878 = vmatprep.subr.bf16.mxu0 %v944_v4  ;;  %v951_v11 = vld [vmem:[%s1374_s1 + $0x98] sm:$0xff]   ;;  %v954_v14 = vld [vmem:[%s1374_s1 + $0xa0] sm:$0xff]   ;;  %v957_v17 = vld [vmem:[%s1374_s1 + $0xa8] sm:$0xff]  }
   0x6   :  { %v952_v12 = vld [vmem:[%s1374_s1 + $0x18] sm:$0xff]   ;;  %v955_v15 = vld [vmem:[%s1374_s1 + $0x20] sm:$0xff]   ;;  %v958_v18 = vld [vmem:[%s1374_s1 + $0x28] sm:$0xff]  }
   0x7   :  { %537 = vmatpush1.bf16.msra.mxu1 %v945_v5  ;;  %v959_v19 = vld [vmem:[%s1374_s1 + $0x70] sm:$0xff]   ;;  %v962_v22 = vld [vmem:[%s1374_s1 + $0x78] sm:$0xff]   ;;  %v968_v28 = vld [vmem:[%s1374_s1 + $0xc0] sm:$0xff]  }
   0x8   :  { %879 = vmatpush3.bf16.msra.mxu0 %v946_v6  ;;  %538 = vmatprep.subr.bf16.mxu1 %v1048_v0  ;;  %v960_v20 = vld [vmem:[%s1374_s1 + $0xb0] sm:$0xff]   ;;  %v963_v24 = vld [vmem:[%s1374_s1 + $0xb8] sm:$0xff]   ;;  %v1270_v60 = vld [vmem:[%s1376_s2] ss:$0 sm:$0xff] }
   0x9   :  { %880 = vmatprep.subr.bf16.mxu0 %v947_v7  ;;  %v961_v21 = vld [vmem:[%s1374_s1 + $0x30] sm:$0xff]   ;;  %v971_v25 = vld [vmem:[%s1375_s0 + $0xc] ss:$16 sps:$4 sm:$0xff]   ;;  %v969_v30 = vld [vmem:[%s1375_s0 + $0x8] ss:$16 sps:$4 sm:$0xff]  }
   0xa   :  { %v967_v23 = vld [vmem:[%s1375_s0 + $0x4] ss:$16 sps:$4 sm:$0xff]   ;;  %v964_v26 = vld [vmem:[%s1374_s1 + $0x38] sm:$0xff]   ;;  %866 = vmatprep.mubr.msk.bf16.mxu1 %vm412_vm0, %v971_v25  ;;  %v965_v27 = vld [vmem:[%s1375_s0] ss:$16 sps:$4 sm:$0xff]  }
   0xb   :  { %539 = vmatpush1.bf16.msra.mxu1 %v948_v8  ;;  %469 = vmatprep.mubr.bf16.mxu0 %v967_v23  ;;  %v972_v29 = vld [vmem:[%s1375_s0 + $0x24] ss:$16 sps:$4 sm:$0xff]   ;;  %v975_v31 = vld [vmem:[%s1375_s0 + $0x2c] ss:$16 sps:$4 sm:$0xff]   ;;  %v974_v32 = vld [vmem:[%s1375_s0 + $0x20] ss:$16 sps:$4 sm:$0xff]  }
   0xc   :  { %881 = vmatpush3.bf16.msra.mxu0 %v949_v9  ;;  %540 = vmatprep.subr.bf16.mxu1 %v1048_v0  ;;  %v978_v33 = vld [vmem:[%s1375_s0 + $0x44] ss:$16 sps:$4 sm:$0xff]   ;;  %v977_v34 = vld [vmem:[%s1375_s0 + $0x28] ss:$16 sps:$4 sm:$0xff]   ;;  %v981_v35 = vld [vmem:[%s1375_s0 + $0x4c] ss:$16 sps:$4 sm:$0xff]  }
   0xd   :  { %882 = vmatprep.subr.bf16.mxu0 %v950_v10  ;;  %v980_v36 = vld [vmem:[%s1375_s0 + $0x40] ss:$16 sps:$4 sm:$0xff]   ;;  %v984_v37 = vld [vmem:[%s1375_s0 + $0x64] ss:$16 sps:$4 sm:$0xff]   ;;  %v983_v38 = vld [vmem:[%s1375_s0 + $0x48] ss:$16 sps:$4 sm:$0xff]  }
   0xe   :  { %v987_v39 = vld [vmem:[%s1375_s0 + $0x6c] ss:$16 sps:$4 sm:$0xff]   ;;  %v986_v40 = vld [vmem:[%s1375_s0 + $0x60] ss:$16 sps:$4 sm:$0xff]   ;;  %v990_v41 = vld [vmem:[%s1375_s0 + $0x84] ss:$16 sps:$4 sm:$0xff]  }
   0xf   :  { %541 = vmatpush1.bf16.msra.mxu1 %v951_v11  ;;  %v989_v42 = vld [vmem:[%s1375_s0 + $0x68] ss:$16 sps:$4 sm:$0xff]   ;;  %v993_v43 = vld [vmem:[%s1375_s0 + $0x8c] ss:$16 sps:$4 sm:$0xff]   ;;  %v992_v44 = vld [vmem:[%s1375_s0 + $0x80] ss:$16 sps:$4 sm:$0xff]  }
  0x10   :  { %883 = vmatpush3.bf16.msra.mxu0 %v952_v12  ;;  %542 = vmatprep.subr.bf16.mxu1 %v1048_v0  ;;  %v996_v45 = vld [vmem:[%s1375_s0 + $0xa4] ss:$16 sps:$4 sm:$0xff]   ;;  %v995_v46 = vld [vmem:[%s1375_s0 + $0x88] ss:$16 sps:$4 sm:$0xff]   ;;  %v999_v47 = vld [vmem:[%s1375_s0 + $0xac] ss:$16 sps:$4 sm:$0xff]  }
  0x11   :  { %884 = vmatprep.subr.bf16.mxu0 %v953_v13  ;;  %v998_v48 = vld [vmem:[%s1375_s0 + $0xa0] ss:$16 sps:$4 sm:$0xff]   ;;  %v1002_v49 = vld [vmem:[%s1375_s0 + $0xc4] ss:$16 sps:$4 sm:$0xff]   ;;  %v1001_v50 = vld [vmem:[%s1375_s0 + $0xa8] ss:$16 sps:$4 sm:$0xff]  }
  0x12   :  { %v1005_v51 = vld [vmem:[%s1375_s0 + $0xcc] ss:$16 sps:$4 sm:$0xff]   ;;  %v1004_v52 = vld [vmem:[%s1375_s0 + $0xc0] ss:$16 sps:$4 sm:$0xff]   ;;  %v1008_v53 = vld [vmem:[%s1375_s0 + $0xe4] ss:$16 sps:$4 sm:$0xff]  }
  0x13   :  { %543 = vmatpush1.bf16.msra.mxu1 %v954_v14  ;;  %v1007_v54 = vld [vmem:[%s1375_s0 + $0xc8] ss:$16 sps:$4 sm:$0xff]   ;;  %v1011_v55 = vld [vmem:[%s1375_s0 + $0xec] ss:$16 sps:$4 sm:$0xff]   ;;  %v1010_v56 = vld [vmem:[%s1375_s0 + $0xe0] ss:$16 sps:$4 sm:$0xff]  }
  0x14   :  { %885 = vmatpush3.bf16.msra.mxu0 %v955_v15  ;;  %544 = vmatprep.subr.bf16.mxu1 %v1048_v0  ;;  %v1013_v57 = vld [vmem:[%s1375_s0 + $0xe8] ss:$16 sps:$4 sm:$0xff]  }
  0x15   :  { %886 = vmatprep.subr.bf16.mxu0 %v956_v16 }
  0x17   :  { %545 = vmatpush1.bf16.msra.mxu1 %v957_v17 }
  0x18   :  { %887 = vmatpush3.bf16.msra.mxu0 %v958_v18  ;;  %546 = vmatprep.subr.bf16.mxu1 %v1048_v0 }
  0x19   :  { %888 = vmatprep.subr.bf16.mxu0 %v959_v19 }
  0x1b   :  { %547 = vmatpush1.bf16.msra.mxu1 %v960_v20 }
  0x1c   :  { %889 = vmatpush3.bf16.msra.mxu0 %v961_v21  ;;  %548 = vmatprep.subr.bf16.mxu1 %v1048_v0 }
  0x1d   :  { %890 = vmatprep.subr.bf16.mxu0 %v962_v22 }
  0x1f   :  { %549 = vmatpush1.bf16.msra.mxu1 %v963_v24 }
  0x20   :  { %891 = vmatpush3.bf16.msra.mxu0 %v964_v26  ;;  %550 = vmatprep.subr.bf16.mxu1 %v1048_v0 }
  0x23   :  { %470 = vmatmul.mubr.bf16.vlgmr.msra.gmra.mrb[0].mxu0 %v965_v27  ;;  %551 = vmatpush1.bf16.msra.mxu1 %v968_v28 }
  0x24   :  { %477 = vmatprep.mubr.bf16.mxu0 %v972_v29 }
  0x26   :  { %567 = vmatmul.mubr.bf16.vlgmr.msra.gmra.mrb[0].mxu1 %v969_v30 }
  0x27   :  { %867 = vmatprep.mubr.msk.bf16.mxu1 %vm412_vm0, %v975_v31 }
  0x2b   :  { %478 = vmatmul.mubr.bf16.gmra.mrb[4].mxu0 %v974_v32 }
  0x2c   :  { %485 = vmatprep.mubr.bf16.mxu0 %v978_v33 }
  0x2e   :  { %575 = vmatmul.mubr.bf16.gmra.mrb[4].mxu1 %v977_v34 }
  0x2f   :  { %868 = vmatprep.mubr.msk.bf16.mxu1 %vm412_vm0, %v981_v35 }
  0x33   :  { %486 = vmatmul.mubr.bf16.gmra.mrb[8].mxu0 %v980_v36 }
  0x34   :  { %493 = vmatprep.mubr.bf16.mxu0 %v984_v37 }
  0x36   :  { %583 = vmatmul.mubr.bf16.gmra.mrb[8].mxu1 %v983_v38 }
  0x37   :  { %869 = vmatprep.mubr.msk.bf16.mxu1 %vm412_vm0, %v987_v39 }
  0x3b   :  { %494 = vmatmul.mubr.bf16.gmra.mrb[12].mxu0 %v986_v40 }
  0x3c   :  { %501 = vmatprep.mubr.bf16.mxu0 %v990_v41 }
  0x3e   :  { %591 = vmatmul.mubr.bf16.gmra.mrb[12].mxu1 %v989_v42 }
  0x3f   :  { %870 = vmatprep.mubr.msk.bf16.mxu1 %vm412_vm0, %v993_v43 }
  0x43   :  { %502 = vmatmul.mubr.bf16.gmra.mrb[16].mxu0 %v992_v44 }
  0x44   :  { %509 = vmatprep.mubr.bf16.mxu0 %v996_v45 }
  0x46   :  { %599 = vmatmul.mubr.bf16.gmra.mrb[16].mxu1 %v995_v46 }
  0x47   :  { %871 = vmatprep.mubr.msk.bf16.mxu1 %vm412_vm0, %v999_v47 }
  0x4b   :  { %510 = vmatmul.mubr.bf16.gmra.mrb[20].mxu0 %v998_v48 }
  0x4c   :  { %517 = vmatprep.mubr.bf16.mxu0 %v1002_v49 }
  0x4e   :  { %607 = vmatmul.mubr.bf16.gmra.mrb[20].mxu1 %v1001_v50 }
  0x4f   :  { %872 = vmatprep.mubr.msk.bf16.mxu1 %vm412_vm0, %v1005_v51 }
  0x53   :  { %518 = vmatmul.mubr.bf16.gmra.mrb[24].mxu0 %v1004_v52 }
  0x54   :  { %525 = vmatprep.mubr.bf16.mxu0 %v1008_v53 }
  0x56   :  { %615 = vmatmul.mubr.bf16.gmra.mrb[24].mxu1 %v1007_v54 }
  0x57   :  { %873 = vmatprep.mubr.msk.bf16.mxu1 %vm412_vm0, %v1011_v55 }
  0x5b   :  { %526 = vmatmul.mubr.bf16.gmra.mrb[28].mxu0 %v1010_v56 }
  0x5e   :  { %623 = vmatmul.mubr.bf16.gmra.mrb[28].mxu1 %v1013_v57 }
  0xf6   :  { %v892_v58 = vpop.f32.mrb[0].mxu0 }
  0xf7   :  { %v893_v59 = vpop.f32.mrb[1].mxu0 }
  0xf8   :  { %v894_v61 = vadd.f32 %v893_v59, %v892_v58  ;;  %v895_v62 = vpop.f32.mrb[2].mxu0 }
  0xf9   :  { %v896_v63 = vpop.f32.mrb[3].mxu0  ;;  %v568_v0 = vpop.f32.mrb[0].mxu1 }
  0xfa   :  { %v897_v1 = vadd.f32 %v896_v63, %v895_v62  ;;  %v472_v2 = vadd.f32 %v894_v61, %v1270_v60  ;;  %v570_v3 = vpop.f32.mrb[1].mxu1 }
  0xfb   :  { %v571_v4 = vpop.f32.mrb[2].mxu1 }
  0xfc   :  { %v569_v5 = vadd.f32 %v568_v0, %v472_v2  ;;  %v475_v6 = vadd.f32 %v897_v1, %v1270_v60  ;;  %v573_v7 = vpop.f32.mrb[3].mxu1 }
  0xfe   :  { %v572_v8 = vadd.f32 %v571_v4, %v475_v6  ;;  %v898_v9 = vpop.f32.mrb[4].mxu0  ;;  %1014 = vtanh.f32 %v569_v5 }
  0xff   :  { %v899_v10 = vpop.f32.mrb[5].mxu0 }
 0x100   :  { %1016 = vtanh.f32 %v572_v8  ;;  %v900_v11 = vadd.f32 %v899_v10, %v898_v9  ;;  %v901_v12 = vpop.f32.mrb[6].mxu0 }
 0x101   :  { %v902_v13 = vpop.f32.mrb[7].mxu0  ;;  %v576_v14 = vpop.f32.mrb[4].mxu1 }
 0x102   :  { %v903_v15 = vadd.f32 %v902_v13, %v901_v12  ;;  %v480_v16 = vadd.f32 %v900_v11, %v1270_v60  ;;  %v578_v17 = vpop.f32.mrb[5].mxu1 }
 0x103   :  { %v579_v18 = vpop.f32.mrb[6].mxu1 }
 0x104   :  { %v577_v19 = vadd.f32 %v576_v14, %v480_v16  ;;  %v483_v20 = vadd.f32 %v903_v15, %v1270_v60  ;;  %v581_v21 = vpop.f32.mrb[7].mxu1 }
 0x106   :  { %1018 = vtanh.f32 %v577_v19  ;;  %v580_v22 = vadd.f32 %v579_v18, %v483_v20  ;;  %v904_v23 = vpop.f32.mrb[8].mxu0 }
 0x107   :  { %v905_v24 = vpop.f32.mrb[9].mxu0 }
 0x108   :  { %1020 = vtanh.f32 %v580_v22  ;;  %v906_v25 = vadd.f32 %v905_v24, %v904_v23  ;;  %v907_v26 = vpop.f32.mrb[10].mxu0  ;;  %v1276_v27 = vpop.eup %1014 }
 0x109   :  { %v908_v28 = vpop.f32.mrb[11].mxu0  ;;  %v584_v29 = vpop.f32.mrb[8].mxu1 }
 0x10a   :  { %v1278_v30 = vpop.eup %1016  ;;  %v909_v31 = vadd.f32 %v908_v28, %v907_v26  ;;  %v488_v32 = vadd.f32 %v906_v25, %v1270_v60  ;;  %v586_v33 = vpop.f32.mrb[9].mxu1 }
 0x10b   :  { %v647_v34 = vadd.f32 %v1278_v30, %v1276_v27  ;;  %v587_v35 = vpop.f32.mrb[10].mxu1 }
 0x10c   :  { %v585_v36 = vadd.f32 %v584_v29, %v488_v32  ;;  %v491_v37 = vadd.f32 %v909_v31, %v1270_v60  ;;  %v589_v38 = vpop.f32.mrb[11].mxu1 }
 0x10e   :  { %1022 = vtanh.f32 %v585_v36  ;;  %v588_v39 = vadd.f32 %v587_v35, %v491_v37  ;;  %v910_v40 = vpop.f32.mrb[12].mxu0 }
 0x10f   :  { %v911_v41 = vpop.f32.mrb[13].mxu0 }
 0x110   :  { %v1284_v42 = vpop.eup %1018  ;;  %1024 = vtanh.f32 %v588_v39  ;;  %v912_v43 = vadd.f32 %v911_v41, %v910_v40  ;;  %v913_v44 = vpop.f32.mrb[14].mxu0 }
 0x111   :  { %v648_v45 = vadd.f32 %v1284_v42, %v647_v34  ;;  %v914_v46 = vpop.f32.mrb[15].mxu0  ;;  %v592_v47 = vpop.f32.mrb[12].mxu1 }
 0x112   :  { %v1287_v48 = vpop.eup %1020  ;;  %v915_v49 = vadd.f32 %v914_v46, %v913_v44  ;;  %v496_v50 = vadd.f32 %v912_v43, %v1270_v60  ;;  %v594_v51 = vpop.f32.mrb[13].mxu1 }
 0x113   :  { %v649_v52 = vadd.f32 %v1287_v48, %v648_v45  ;;  %v595_v53 = vpop.f32.mrb[14].mxu1 }
 0x114   :  { %v593_v54 = vadd.f32 %v592_v47, %v496_v50  ;;  %v499_v55 = vadd.f32 %v915_v49, %v1270_v60  ;;  %v597_v56 = vpop.f32.mrb[15].mxu1 }
 0x116   :  { %1026 = vtanh.f32 %v593_v54  ;;  %v596_v57 = vadd.f32 %v595_v53, %v499_v55  ;;  %v916_v58 = vpop.f32.mrb[16].mxu0 }
 0x117   :  { %v917_v59 = vpop.f32.mrb[17].mxu0 }
 0x118   :  { %v1292_v61 = vpop.eup %1022  ;;  %1028 = vtanh.f32 %v596_v57  ;;  %v918_v62 = vadd.f32 %v917_v59, %v916_v58  ;;  %v919_v63 = vpop.f32.mrb[18].mxu0 }
 0x119   :  { %v650_v0 = vadd.f32 %v1292_v61, %v649_v52  ;;  %v920_v1 = vpop.f32.mrb[19].mxu0  ;;  %v600_v2 = vpop.f32.mrb[16].mxu1 }
 0x11a   :  { %v1295_v3 = vpop.eup %1024  ;;  %v921_v4 = vadd.f32 %v920_v1, %v919_v63  ;;  %v504_v5 = vadd.f32 %v918_v62, %v1270_v60  ;;  %v602_v6 = vpop.f32.mrb[17].mxu1 }
 0x11b   :  { %v651_v7 = vadd.f32 %v1295_v3, %v650_v0  ;;  %v603_v8 = vpop.f32.mrb[18].mxu1 }
 0x11c   :  { %v601_v9 = vadd.f32 %v600_v2, %v504_v5  ;;  %v507_v10 = vadd.f32 %v921_v4, %v1270_v60  ;;  %v605_v11 = vpop.f32.mrb[19].mxu1 }
 0x11e   :  { %1030 = vtanh.f32 %v601_v9  ;;  %v604_v12 = vadd.f32 %v603_v8, %v507_v10  ;;  %v922_v13 = vpop.f32.mrb[20].mxu0 }
 0x11f   :  { %v923_v14 = vpop.f32.mrb[21].mxu0 }
 0x120   :  { %v1300_v15 = vpop.eup %1026  ;;  %1032 = vtanh.f32 %v604_v12  ;;  %v924_v16 = vadd.f32 %v923_v14, %v922_v13  ;;  %v925_v17 = vpop.f32.mrb[22].mxu0 }
 0x121   :  { %v652_v18 = vadd.f32 %v1300_v15, %v651_v7  ;;  %v926_v19 = vpop.f32.mrb[23].mxu0  ;;  %v608_v20 = vpop.f32.mrb[20].mxu1 }
 0x122   :  { %v1303_v21 = vpop.eup %1028  ;;  %v927_v22 = vadd.f32 %v926_v19, %v925_v17  ;;  %v512_v23 = vadd.f32 %v924_v16, %v1270_v60  ;;  %v610_v24 = vpop.f32.mrb[21].mxu1 }
 0x123   :  { %v653_v25 = vadd.f32 %v1303_v21, %v652_v18  ;;  %v611_v26 = vpop.f32.mrb[22].mxu1 }
 0x124   :  { %v609_v28 = vadd.f32 %v608_v20, %v512_v23  ;;  %v515_v29 = vadd.f32 %v927_v22, %v1270_v60  ;;  %v613_v31 = vpop.f32.mrb[23].mxu1 }
 0x126   :  { %1034 = vtanh.f32 %v609_v28  ;;  %v612_v32 = vadd.f32 %v611_v26, %v515_v29  ;;  %v928_v33 = vpop.f32.mrb[24].mxu0 }
 0x127   :  { %v929_v34 = vpop.f32.mrb[25].mxu0 }
 0x128   :  { %v1031_v35 = vpop.eup %1030  ;;  %1036 = vtanh.f32 %v612_v32  ;;  %v930_v36 = vadd.f32 %v929_v34, %v928_v33  ;;  %v931_v37 = vpop.f32.mrb[26].mxu0 }
 0x129   :  { %v654_v38 = vadd.f32 %v1031_v35, %v653_v25  ;;  %v932_v39 = vpop.f32.mrb[27].mxu0  ;;  %v616_v40 = vpop.f32.mrb[24].mxu1 }
 0x12a   :  { %v1033_v41 = vpop.eup %1032  ;;  %v933_v43 = vadd.f32 %v932_v39, %v931_v37  ;;  %v520_v44 = vadd.f32 %v930_v36, %v1270_v60  ;;  %v618_v45 = vpop.f32.mrb[25].mxu1 }
 0x12b   :  { %v655_v46 = vadd.f32 %v1033_v41, %v654_v38  ;;  %v619_v47 = vpop.f32.mrb[26].mxu1 }
 0x12c   :  { %v617_v49 = vadd.f32 %v616_v40, %v520_v44  ;;  %v523_v50 = vadd.f32 %v933_v43, %v1270_v60  ;;  %v621_v51 = vpop.f32.mrb[27].mxu1 }
 0x12e   :  { %1038 = vtanh.f32 %v617_v49  ;;  %v620_v52 = vadd.f32 %v619_v47, %v523_v50  ;;  %v934_v53 = vpop.f32.mrb[28].mxu0 }
 0x12f   :  { %v935_v54 = vpop.f32.mrb[29].mxu0 }
 0x130   :  { %v1035_v55 = vpop.eup %1034  ;;  %1040 = vtanh.f32 %v620_v52  ;;  %v936_v56 = vadd.f32 %v935_v54, %v934_v53  ;;  %v937_v57 = vpop.f32.mrb[30].mxu0 }
 0x131   :  { %v656_v58 = vadd.f32 %v1035_v55, %v655_v46  ;;  %v938_v59 = vpop.f32.mrb[31].mxu0  ;;  %v624_v62 = vpop.f32.mrb[28].mxu1 }
 0x132   :  { %v1037_v63 = vpop.eup %1036  ;;  %v939_v0 = vadd.f32 %v938_v59, %v937_v57  ;;  %v528_v1 = vadd.f32 %v936_v56, %v1270_v60  ;;  %v626_v2 = vpop.f32.mrb[29].mxu1 }
 0x133   :  { %v657_v4 = vadd.f32 %v1037_v63, %v656_v58  ;;  %v627_v5 = vpop.f32.mrb[30].mxu1 }
 0x134   :  { %v625_v6 = vadd.f32 %v624_v62, %v528_v1  ;;  %v531_v7 = vadd.f32 %v939_v0, %v1270_v60  ;;  %v629_v8 = vpop.f32.mrb[31].mxu1 }
 0x136   :  { %1042 = vtanh.f32 %v625_v6  ;;  %v628_v9 = vadd.f32 %v627_v5, %v531_v7 }
 0x138   :  { %v1039_v10 = vpop.eup %1038  ;;  %1044 = vtanh.f32 %v628_v9 }
 0x139   :  { %v658_v11 = vadd.f32 %v1039_v10, %v657_v4 }
 0x13a   :  { %v1041_v12 = vpop.eup %1040 }
 0x13b   :  { %v659_v13 = vadd.f32 %v1041_v12, %v658_v11 }
 0x140   :  { %v1043_v14 = vpop.eup %1042 }
 0x141   :  { %v660_v16 = vadd.f32 %v1043_v14, %v659_v13 }
 0x142   :  { %v1045_v17 = vpop.eup %1044 }
 0x143   :  { %v661_v18 = vadd.f32 %v1045_v17, %v660_v16 }
 0x145   :  { %v662_v19 = vrot.slane %v661_v18, 4 }
 0x147   :  { %v663_v20 = vadd.f32 %v662_v19, %v661_v18 }
 0x149   :  { %v664_v22 = vrot.slane %v663_v20, 2 }
 0x14b   :  { %v665_v23 = vadd.f32 %v664_v22, %v663_v20 }
 0x14d   :  { %v666_v24 = vrot.slane %v665_v23, 1 }
 0x14f   :  { %v667_v25 = vadd.f32 %v666_v24, %v665_v23 }
 0x151   :  { %v669_v26 = vmul.f32 0.0078125, %v667_v25 }
 0x153   :  { %v670_v60 = vsub.f32 %v1276_v27, %v669_v26  ;;  %v671_v28 = vsub.f32 %v1278_v30, %v669_v26  ;;  %v672_v29 = vsub.f32 %v1284_v42, %v669_v26  ;;  %v673_v31 = vsub.f32 %v1287_v48, %v669_v26 }
 0x154   :  { %v674_v32 = vsub.f32 %v1292_v61, %v669_v26  ;;  %v675_v33 = vsub.f32 %v1295_v3, %v669_v26  ;;  %v676_v34 = vsub.f32 %v1300_v15, %v669_v26  ;;  %v677_v36 = vsub.f32 %v1303_v21, %v669_v26 }
 0x155   :  { %v678_v37 = vsub.f32 %v1031_v35, %v669_v26  ;;  %v679_v38 = vsub.f32 %v1033_v41, %v669_v26  ;;  %v680_v39 = vsub.f32 %v1035_v55, %v669_v26  ;;  %v681_v40 = vsub.f32 %v1037_v63, %v669_v26 }
 0x156   :  { %v682_v43 = vsub.f32 %v1039_v10, %v669_v26  ;;  %v683_v27 = vsub.f32 %v1041_v12, %v669_v26  ;;  %v684_v44 = vsub.f32 %v1043_v14, %v669_v26  ;;  %v685_v30 = vsub.f32 %v1045_v17, %v669_v26 }
 0x157   :  { %v686_v45 = vmul.f32 %v670_v60, %v670_v60  ;;  %v687_v42 = vmul.f32 %v671_v28, %v671_v28  ;;  %v688_v46 = vmul.f32 %v672_v29, %v672_v29  ;;  %v689_v47 = vmul.f32 %v673_v31, %v673_v31 }
 0x158   :  { %v690_v49 = vmul.f32 %v674_v32, %v674_v32  ;;  %v691_v50 = vmul.f32 %v675_v33, %v675_v33  ;;  %v692_v51 = vmul.f32 %v676_v34, %v676_v34  ;;  %v693_v35 = vmul.f32 %v677_v36, %v677_v36 }
 0x159   :  { %v702_v48 = vadd.f32 %v687_v42, %v686_v45  ;;  %v694_v52 = vmul.f32 %v678_v37, %v678_v37  ;;  %v695_v54 = vmul.f32 %v679_v38, %v679_v38  ;;  %v696_v56 = vmul.f32 %v680_v39, %v680_v39  ;;  %v874_v45 = vld [vmem:[%s1377_s3] ss:$0 sm:$0xff] }
 0x15a   :  { %v697_v58 = vmul.f32 %v681_v40, %v681_v40  ;;  %v698_v62 = vmul.f32 %v682_v43, %v682_v43  ;;  %v699_v0 = vmul.f32 %v683_v27, %v683_v27  ;;  %v700_v2 = vmul.f32 %v684_v44, %v684_v44 }
 0x15b   :  { %v703_v61 = vadd.f32 %v702_v48, %v688_v46  ;;  %v701_v5 = vmul.f32 %v685_v30, %v685_v30 }
 0x15d   :  { %v704_v3 = vadd.f32 %v703_v61, %v689_v47 }
 0x15f   :  { %v705_v15 = vadd.f32 %v704_v3, %v690_v49 }
 0x161   :  { %v706_v21 = vadd.f32 %v705_v15, %v691_v50  ;;  %v875_v15 = vld [vmem:[%s1378_s4] ss:$0 sm:$0xff] }
 0x163   :  { %v707_v41 = vadd.f32 %v706_v21, %v692_v51 }
 0x165   :  { %v708_v53 = vadd.f32 %v707_v41, %v693_v35 }
 0x167   :  { %v709_v55 = vadd.f32 %v708_v53, %v694_v52 }
 0x169   :  { %v710_v57 = vadd.f32 %v709_v55, %v695_v54 }
 0x16b   :  { %v711_v59 = vadd.f32 %v710_v57, %v696_v56 }
 0x16d   :  { %v712_v63 = vadd.f32 %v711_v59, %v697_v58 }
 0x16f   :  { %v713_v1 = vadd.f32 %v712_v63, %v698_v62 }
 0x171   :  { %v714_v4 = vadd.f32 %v713_v1, %v699_v0 }
 0x173   :  { %v715_v6 = vadd.f32 %v714_v4, %v700_v2 }
 0x175   :  { %v716_v7 = vadd.f32 %v715_v6, %v701_v5 }
 0x177   :  { %v717_v8 = vrot.slane %v716_v7, 4 }
 0x179   :  { %v718_v9 = vadd.f32 %v717_v8, %v716_v7 }
 0x17b   :  { %v719_v10 = vrot.slane %v718_v9, 2 }
 0x17d   :  { %v720_v11 = vadd.f32 %v719_v10, %v718_v9 }
 0x17f   :  { %v721_v12 = vrot.slane %v720_v11, 1 }
 0x181   :  { %v722_v13 = vadd.f32 %v721_v12, %v720_v11 }
 0x183   :  { %v723_v14 = vmul.f32 0.0078125, %v722_v13 }
 0x185   :  { %v724_v16 = vadd.f32 1e-05, %v723_v14 }
 0x187   :  { %1046 = vrsqrt.f32 %v724_v16 }
 0x191   :  { %v1047_v17 = vpop.eup %1046 }
 0x192   :  { %v726_v18 = vmul.f32 %v1047_v17, %v670_v60  ;;  %v727_v19 = vmul.f32 %v1047_v17, %v671_v28  ;;  %v728_v20 = vmul.f32 %v1047_v17, %v672_v29  ;;  %v729_v22 = vmul.f32 %v1047_v17, %v673_v31 }
 0x193   :  { %v730_v23 = vmul.f32 %v1047_v17, %v674_v32  ;;  %v731_v24 = vmul.f32 %v1047_v17, %v675_v33  ;;  %v732_v25 = vmul.f32 %v1047_v17, %v676_v34  ;;  %v733_v26 = vmul.f32 %v1047_v17, %v677_v36 }
 0x194   :  { %v734_v42 = vmul.f32 %v1047_v17, %v678_v37  ;;  %v735_v46 = vmul.f32 %v1047_v17, %v679_v38  ;;  %v736_v48 = vmul.f32 %v1047_v17, %v680_v39  ;;  %v737_v47 = vmul.f32 %v1047_v17, %v681_v40 }
 0x195   :  { %v738_v61 = vmul.f32 %v1047_v17, %v682_v43  ;;  %v739_v49 = vmul.f32 %v1047_v17, %v683_v27  ;;  %v740_v3 = vmul.f32 %v1047_v17, %v684_v44  ;;  %v741_v50 = vmul.f32 %v1047_v17, %v685_v30 }
 0x196   :  { %v749_v60 = vmul.f32 %v874_v45, %v726_v18  ;;  %v750_v28 = vmul.f32 %v874_v45, %v727_v19  ;;  %v751_v29 = vmul.f32 %v874_v45, %v728_v20  ;;  %v752_v31 = vmul.f32 %v874_v45, %v729_v22 }
 0x197   :  { %v753_v32 = vmul.f32 %v874_v45, %v730_v23  ;;  %v754_v33 = vmul.f32 %v874_v45, %v731_v24  ;;  %v755_v34 = vmul.f32 %v874_v45, %v732_v25  ;;  %v756_v36 = vmul.f32 %v874_v45, %v733_v26 }
 0x198   :  { %v757_v37 = vmul.f32 %v874_v45, %v734_v42  ;;  %v758_v38 = vmul.f32 %v874_v45, %v735_v46  ;;  %v759_v39 = vmul.f32 %v874_v45, %v736_v48  ;;  %v760_v40 = vmul.f32 %v874_v45, %v737_v47 }
 0x199   :  { %v761_v43 = vmul.f32 %v874_v45, %v738_v61  ;;  %v762_v27 = vmul.f32 %v874_v45, %v739_v49  ;;  %v763_v44 = vmul.f32 %v874_v45, %v740_v3  ;;  %v764_v30 = vmul.f32 %v874_v45, %v741_v50 }
 0x19a   :  { %v772_v51 = vadd.f32 %v875_v15, %v749_v60  ;;  %v773_v21 = vadd.f32 %v875_v15, %v750_v28  ;;  %v774_v35 = vadd.f32 %v875_v15, %v751_v29  ;;  %v775_v41 = vadd.f32 %v875_v15, %v752_v31 }
 0x19b   :  { %v776_v52 = vadd.f32 %v875_v15, %v753_v32  ;;  %v777_v53 = vadd.f32 %v875_v15, %v754_v33  ;;  %v778_v54 = vadd.f32 %v875_v15, %v755_v34  ;;  %v779_v55 = vadd.f32 %v875_v15, %v756_v36 }
 0x19c   :  { %v780_v56 = vadd.f32 %v875_v15, %v757_v37  ;;  %v781_v57 = vadd.f32 %v875_v15, %v758_v38  ;;  %v782_v58 = vadd.f32 %v875_v15, %v759_v39  ;;  %v783_v59 = vadd.f32 %v875_v15, %v760_v40  ;;  %788 = vst [vmem:[%s1379_s5] sm:$0xff] %v772_v51 }
 0x19d   :  { %789 = vst [vmem:[%s1379_s5 + $0x8] sm:$0xff] %v773_v21  ;;  %790 = vst [vmem:[%s1379_s5 + $0x10] sm:$0xff] %v774_v35  ;;  %v784_v62 = vadd.f32 %v875_v15, %v761_v43  ;;  %v785_v63 = vadd.f32 %v875_v15, %v762_v27  ;;  %v786_v0 = vadd.f32 %v875_v15, %v763_v44 }
 0x19e   :  { %791 = vst [vmem:[%s1379_s5 + $0x18] sm:$0xff] %v775_v41  ;;  %v787_v1 = vadd.f32 %v875_v15, %v764_v30  ;;  %792 = vst [vmem:[%s1379_s5 + $0x20] sm:$0xff] %v776_v52 }
 0x19f   :  { %793 = vst [vmem:[%s1379_s5 + $0x28] sm:$0xff] %v777_v53  ;;  %794 = vst [vmem:[%s1379_s5 + $0x30] sm:$0xff] %v778_v54 }
 0x1a0   :  { %795 = vst [vmem:[%s1379_s5 + $0x38] sm:$0xff] %v779_v55  ;;  %796 = vst [vmem:[%s1379_s5 + $0x40] sm:$0xff] %v780_v56 }
 0x1a1   :  { %797 = vst [vmem:[%s1379_s5 + $0x48] sm:$0xff] %v781_v57  ;;  %798 = vst [vmem:[%s1379_s5 + $0x50] sm:$0xff] %v782_v58 }
 0x1a2   :  { %799 = vst [vmem:[%s1379_s5 + $0x58] sm:$0xff] %v783_v59  ;;  %800 = vst [vmem:[%s1379_s5 + $0x60] sm:$0xff] %v784_v62 }
 0x1a3   :  { %801 = vst [vmem:[%s1379_s5 + $0x68] sm:$0xff] %v785_v63  ;;  %802 = vst [vmem:[%s1379_s5 + $0x70] sm:$0xff] %v786_v0 }
 0x1a4   :  { %803 = vst [vmem:[%s1379_s5 + $0x78] sm:$0xff] %v787_v1 }

// kernel: rsrae_forward.15
= control target key start
LH: loop header
LB: loop body
LE: loop exit
PB: predicated region body
PF: predicated region fallthrough
CT: control target
= control target key end

     0   :  { %s1123_s18 = smov 0   ;;  %s1333_s0 = inlined_call_operand.vmem [shape: bf16[512,200], index: 0, kind: input, shape index: {}]   ;;  %s1334_s1 = inlined_call_operand.vmem [shape: bf16[200,128], index: 1, kind: input, shape index: {}]   ;;  %s1335_s2 = inlined_call_operand.vmem [shape: f32[1,128], index: 2, kind: input, shape index: {}]   ;;  %s1336_s3 = inlined_call_operand.vmem [shape: f32[1,128], index: 3, kind: input, shape index: {}]   ;;  %s1337_s4 = inlined_call_operand.vmem [shape: f32[1,128], index: 4, kind: input, shape index: {}]   ;;  %s1338_s5 = inlined_call_operand.vmem [shape: f32[512,128], index: 5, kind: output, shape index: {}]  }
   0x1 LB: > { %s849_s19 = sadd.s32 4294967295, %s1090_s18   ;;  %p853_p0 = scmp.ge.s32.totalorder %s1090_s18, 1  ;;  %s1090_s18 = sphi %s1123_s18, %s15_s18  }
   0x2   : > { %p189_p1 = scmp.lt.s32.totalorder %s1090_s18, 3 }
   0x4   : > { %p190_p2 = pnand %p853_p0, %p189_p1 }
   0x5   : > { %v959_v0 = vld [vmem:[%s1334_s1] sm:$0xff] (!%p190_p2)   ;;  %v1092_v1 = vmov (!%p190_p2), 0   ;;  %v960_v2 = vld [vmem:[%s1334_s1 + $0x8] sm:$0xff] (!%p190_p2)   ;;  %s854_s22 = sshll.u32 (!%p190_p2), %s849_s19, 5  ;;  %v961_v3 = vld [vmem:[%s1334_s1 + $0x10] sm:$0xff] (!%p190_p2)   ;;  %vm515_vm0 = vcmask (!%p190_p2), 588800  }
   0x6   : > { %193 = sbr.rel (%p190_p2) target bundleno = 343 (0x157), region = 40  ;;  %568 = vmatprep.subr.bf16.mxu0 (!%p190_p2), %v1092_v1  ;;  %924 = vmatprep.subr.bf16.mxu1 (!%p190_p2), %v1092_v1  ;;  %p219_p3 = scmp.lt.s32.totalorder (!%p190_p2), %s854_s22, 63  ;;  %v962_v4 = vld [vmem:[%s1334_s1 + $0x18] sm:$0xff] (!%p190_p2)   ;;  %v963_v6 = vld [vmem:[%s1334_s1 + $0x20] sm:$0xff] (!%p190_p2)   ;;  %v964_v8 = vld [vmem:[%s1334_s1 + $0x28] sm:$0xff] (!%p190_p2)   ;;  %vm564_vm1 = vcmask (!%p190_p2), 1043456  }
   0x7   : > { %569 = vmatpush1.bf16.msra.mxu0 (!%p190_p2), %v959_v0  ;;  %937 = vmatpush1.bf16.msra.mxu1 (!%p190_p2), %v959_v0  ;;  %v965_v9 = vld [vmem:[%s1334_s1 + $0x30] sm:$0xff] (!%p190_p2)   ;;  %v966_v10 = vld [vmem:[%s1334_s1 + $0x38] sm:$0xff] (!%p190_p2)   ;;  %v967_v11 = vld [vmem:[%s1334_s1 + $0x40] sm:$0xff] (!%p190_p2)  }
   0x8   : > { %570 = vmatprep.subr.bf16.mxu0 (!%p190_p2), %v1092_v1  ;;  %925 = vmatprep.subr.bf16.mxu1 (!%p190_p2), %v1092_v1  ;;  %v968_v12 = vld [vmem:[%s1334_s1 + $0x48] sm:$0xff] (!%p190_p2)   ;;  %v969_v13 = vld [vmem:[%s1334_s1 + $0x50] sm:$0xff] (!%p190_p2)   ;;  %v970_v14 = vld [vmem:[%s1334_s1 + $0x58] sm:$0xff] (!%p190_p2)  }
   0x9   : > { %v971_v15 = vld [vmem:[%s1334_s1 + $0x60] ss:$0 sps:$4 sm:$0xff] (!%p190_p2)  }
   0xa   : > { %v566_v16 = vsel (!%p190_p2), %vm564_vm1, %v971_v15, 0  ;;  %v1257_v47 = vld [vmem:[%s1335_s2] ss:$0 sm:$0xff] (!%p190_p2) }
   0xb   : > { %571 = vmatpush1.bf16.msra.mxu0 (!%p190_p2), %v960_v2  ;;  %938 = vmatpush1.bf16.msra.mxu1 (!%p190_p2), %v960_v2 }
   0xc   : > { %572 = vmatprep.subr.bf16.mxu0 (!%p190_p2), %v1092_v1  ;;  %926 = vmatprep.subr.bf16.mxu1 (!%p190_p2), %v1092_v1 }
   0xd   : > { %s1340_s22 = smov (!%p219_p3, %s854_s22), 63 }
   0xe   : > { %s923_s25 = sshll.u32 %s1340_s22, 3 }
   0xf   : > { %573 = vmatpush1.bf16.msra.mxu0 %v961_v3  ;;  %939 = vmatpush1.bf16.msra.mxu1 %v961_v3  ;;  %s1157_s30 = scalar_lea.vmem %s1333_s0, %s923_s25  ;;  %s1270_s29 = scalar_lea.vmem %s1338_s5, %s923_s25 }
  0x10   : > { %574 = vmatprep.subr.bf16.mxu0 %v1092_v1  ;;  %927 = vmatprep.subr.bf16.mxu1 %v1092_v1  ;;  %v974_v5 = vld [vmem:[%s1157_s30 + $0x4] ss:$8 sps:$4 sm:$0xff]   ;;  %v972_v17 = vld [vmem:[%s1157_s30] ss:$8 sps:$4 sm:$0xff]   ;;  %v978_v19 = vld [vmem:[%s1157_s30 + $0x14] ss:$8 sps:$4 sm:$0xff]  }
  0x11   : > { %v977_v7 = vld [vmem:[%s1157_s30 + $0x84] ss:$8 sps:$4 sm:$0xff]   ;;  %905 = vmatprep.mubr.msk.bf16.mxu0 %vm515_vm0, %v974_v5  ;;  %v975_v18 = vld [vmem:[%s1157_s30 + $0x80] ss:$8 sps:$4 sm:$0xff]   ;;  %v980_v20 = vld [vmem:[%s1157_s30 + $0x94] ss:$8 sps:$4 sm:$0xff]  }
  0x12   : > { %913 = vmatprep.mubr.msk.bf16.mxu1 %vm515_vm0, %v977_v7  ;;  %v982_v21 = vld [vmem:[%s1157_s30 + $0x10] ss:$8 sps:$4 sm:$0xff]   ;;  %v984_v23 = vld [vmem:[%s1157_s30 + $0x24] ss:$8 sps:$4 sm:$0xff]   ;;  %v988_v25 = vld [vmem:[%s1157_s30 + $0x20] ss:$8 sps:$4 sm:$0xff]  }
  0x13   : > { %575 = vmatpush1.bf16.msra.mxu0 %v962_v4  ;;  %940 = vmatpush1.bf16.msra.mxu1 %v962_v4  ;;  %v983_v22 = vld [vmem:[%s1157_s30 + $0x90] ss:$8 sps:$4 sm:$0xff]   ;;  %v986_v24 = vld [vmem:[%s1157_s30 + $0xa4] ss:$8 sps:$4 sm:$0xff]   ;;  %v989_v26 = vld [vmem:[%s1157_s30 + $0xa0] ss:$8 sps:$4 sm:$0xff]  }
  0x14   : > { %576 = vmatprep.subr.bf16.mxu0 %v1092_v1  ;;  %928 = vmatprep.subr.bf16.mxu1 %v1092_v1  ;;  %v990_v27 = vld [vmem:[%s1157_s30 + $0x34] ss:$8 sps:$4 sm:$0xff]   ;;  %v994_v29 = vld [vmem:[%s1157_s30 + $0x30] ss:$8 sps:$4 sm:$0xff]   ;;  %v996_v31 = vld [vmem:[%s1157_s30 + $0x44] ss:$8 sps:$4 sm:$0xff]  }
  0x15   : > { %v992_v28 = vld [vmem:[%s1157_s30 + $0xb4] ss:$8 sps:$4 sm:$0xff]   ;;  %v995_v30 = vld [vmem:[%s1157_s30 + $0xb0] ss:$8 sps:$4 sm:$0xff]   ;;  %v998_v32 = vld [vmem:[%s1157_s30 + $0xc4] ss:$8 sps:$4 sm:$0xff]  }
  0x16   : > { %v1000_v33 = vld [vmem:[%s1157_s30 + $0x40] ss:$8 sps:$4 sm:$0xff]   ;;  %v1002_v35 = vld [vmem:[%s1157_s30 + $0x54] ss:$8 sps:$4 sm:$0xff]   ;;  %v1006_v37 = vld [vmem:[%s1157_s30 + $0x50] ss:$8 sps:$4 sm:$0xff]  }
  0x17   : > { %577 = vmatpush1.bf16.msra.mxu0 %v963_v6  ;;  %941 = vmatpush1.bf16.msra.mxu1 %v963_v6  ;;  %v1001_v34 = vld [vmem:[%s1157_s30 + $0xc0] ss:$8 sps:$4 sm:$0xff]   ;;  %v1004_v36 = vld [vmem:[%s1157_s30 + $0xd4] ss:$8 sps:$4 sm:$0xff]   ;;  %v1007_v38 = vld [vmem:[%s1157_s30 + $0xd0] ss:$8 sps:$4 sm:$0xff]  }
  0x18   : > { %578 = vmatprep.subr.bf16.mxu0 %v1092_v1  ;;  %929 = vmatprep.subr.bf16.mxu1 %v1092_v1  ;;  %v1008_v39 = vld [vmem:[%s1157_s30 + $0x64] ss:$8 sps:$4 sm:$0xff]   ;;  %v1012_v41 = vld [vmem:[%s1157_s30 + $0x60] ss:$8 sps:$4 sm:$0xff]   ;;  %v1014_v43 = vld [vmem:[%s1157_s30 + $0x74] ss:$8 sps:$4 sm:$0xff]  }
  0x19   : > { %v1010_v40 = vld [vmem:[%s1157_s30 + $0xe4] ss:$8 sps:$4 sm:$0xff]   ;;  %v1013_v42 = vld [vmem:[%s1157_s30 + $0xe0] ss:$8 sps:$4 sm:$0xff]   ;;  %v1016_v44 = vld [vmem:[%s1157_s30 + $0xf4] ss:$8 sps:$4 sm:$0xff]  }
  0x1a   : > { %v1018_v45 = vld [vmem:[%s1157_s30 + $0x70] ss:$8 sps:$4 sm:$0xff]  }
  0x1b   : > { %579 = vmatpush1.bf16.msra.mxu0 %v964_v8  ;;  %942 = vmatpush1.bf16.msra.mxu1 %v964_v8  ;;  %v1019_v46 = vld [vmem:[%s1157_s30 + $0xf0] ss:$8 sps:$4 sm:$0xff]  }
  0x1c   : > { %580 = vmatprep.subr.bf16.mxu0 %v1092_v1  ;;  %930 = vmatprep.subr.bf16.mxu1 %v1092_v1 }
  0x1f   : > { %581 = vmatpush1.bf16.msra.mxu0 %v965_v9  ;;  %943 = vmatpush1.bf16.msra.mxu1 %v965_v9 }
  0x20   : > { %582 = vmatprep.subr.bf16.mxu0 %v1092_v1  ;;  %931 = vmatprep.subr.bf16.mxu1 %v1092_v1 }
  0x23   : > { %583 = vmatpush1.bf16.msra.mxu0 %v966_v10  ;;  %944 = vmatpush1.bf16.msra.mxu1 %v966_v10 }
  0x24   : > { %584 = vmatprep.subr.bf16.mxu0 %v1092_v1  ;;  %932 = vmatprep.subr.bf16.mxu1 %v1092_v1 }
  0x27   : > { %585 = vmatpush1.bf16.msra.mxu0 %v967_v11  ;;  %945 = vmatpush1.bf16.msra.mxu1 %v967_v11 }
  0x28   : > { %586 = vmatprep.subr.bf16.mxu0 %v1092_v1  ;;  %933 = vmatprep.subr.bf16.mxu1 %v1092_v1 }
  0x2b   : > { %587 = vmatpush1.bf16.msra.mxu0 %v968_v12  ;;  %946 = vmatpush1.bf16.msra.mxu1 %v968_v12 }
  0x2c   : > { %588 = vmatprep.subr.bf16.mxu0 %v1092_v1  ;;  %934 = vmatprep.subr.bf16.mxu1 %v1092_v1 }
  0x2f   : > { %589 = vmatpush1.bf16.msra.mxu0 %v969_v13  ;;  %947 = vmatpush1.bf16.msra.mxu1 %v969_v13 }
  0x30   : > { %590 = vmatprep.subr.bf16.mxu0 %v1092_v1  ;;  %935 = vmatprep.subr.bf16.mxu1 %v1092_v1 }
  0x33   : > { %591 = vmatpush1.bf16.msra.mxu0 %v970_v14  ;;  %948 = vmatpush1.bf16.msra.mxu1 %v970_v14 }
  0x34   : > { %592 = vmatprep.subr.bf16.mxu0 %v1092_v1  ;;  %936 = vmatprep.subr.bf16.mxu1 %v1092_v1 }
  0x37   : > { %593 = vmatpush1.bf16.msra.mxu0 %v566_v16  ;;  %949 = vmatpush1.bf16.msra.mxu1 %v566_v16 }
  0x3a   : > { %601 = vmatmul.mubr.bf16.vlgmr.msra.gmra.mrb[0].mxu0 %v972_v17  ;;  %665 = vmatmul.mubr.bf16.vlgmr.msra.gmra.mrb[0].mxu1 %v975_v18 }
  0x3b   : > { %906 = vmatprep.mubr.msk.bf16.mxu0 %vm515_vm0, %v978_v19  ;;  %914 = vmatprep.mubr.msk.bf16.mxu1 %vm515_vm0, %v980_v20 }
  0x42   : > { %609 = vmatmul.mubr.bf16.gmra.mrb[4].mxu0 %v982_v21  ;;  %673 = vmatmul.mubr.bf16.gmra.mrb[4].mxu1 %v983_v22 }
  0x43   : > { %907 = vmatprep.mubr.msk.bf16.mxu0 %vm515_vm0, %v984_v23  ;;  %915 = vmatprep.mubr.msk.bf16.mxu1 %vm515_vm0, %v986_v24 }
  0x4a   : > { %617 = vmatmul.mubr.bf16.gmra.mrb[8].mxu0 %v988_v25  ;;  %681 = vmatmul.mubr.bf16.gmra.mrb[8].mxu1 %v989_v26 }
  0x4b   : > { %908 = vmatprep.mubr.msk.bf16.mxu0 %vm515_vm0, %v990_v27  ;;  %916 = vmatprep.mubr.msk.bf16.mxu1 %vm515_vm0, %v992_v28 }
  0x52   : > { %625 = vmatmul.mubr.bf16.gmra.mrb[12].mxu0 %v994_v29  ;;  %689 = vmatmul.mubr.bf16.gmra.mrb[12].mxu1 %v995_v30 }
  0x53   : > { %909 = vmatprep.mubr.msk.bf16.mxu0 %vm515_vm0, %v996_v31  ;;  %917 = vmatprep.mubr.msk.bf16.mxu1 %vm515_vm0, %v998_v32 }
  0x5a   : > { %633 = vmatmul.mubr.bf16.gmra.mrb[16].mxu0 %v1000_v33  ;;  %697 = vmatmul.mubr.bf16.gmra.mrb[16].mxu1 %v1001_v34 }
  0x5b   : > { %910 = vmatprep.mubr.msk.bf16.mxu0 %vm515_vm0, %v1002_v35  ;;  %918 = vmatprep.mubr.msk.bf16.mxu1 %vm515_vm0, %v1004_v36 }
  0x62   : > { %641 = vmatmul.mubr.bf16.gmra.mrb[20].mxu0 %v1006_v37  ;;  %705 = vmatmul.mubr.bf16.gmra.mrb[20].mxu1 %v1007_v38 }
  0x63   : > { %911 = vmatprep.mubr.msk.bf16.mxu0 %vm515_vm0, %v1008_v39  ;;  %919 = vmatprep.mubr.msk.bf16.mxu1 %vm515_vm0, %v1010_v40 }
  0x6a   : > { %649 = vmatmul.mubr.bf16.gmra.mrb[24].mxu0 %v1012_v41  ;;  %713 = vmatmul.mubr.bf16.gmra.mrb[24].mxu1 %v1013_v42 }
  0x6b   : > { %912 = vmatprep.mubr.msk.bf16.mxu0 %vm515_vm0, %v1014_v43  ;;  %920 = vmatprep.mubr.msk.bf16.mxu1 %vm515_vm0, %v1016_v44 }
  0x72   : > { %657 = vmatmul.mubr.bf16.gmra.mrb[28].mxu0 %v1018_v45  ;;  %721 = vmatmul.mubr.bf16.gmra.mrb[28].mxu1 %v1019_v46 }
 0x10d   : > { %v602_v48 = vpop.f32.mrb[0].mxu0  ;;  %v666_v49 = vpop.f32.mrb[0].mxu1 }
 0x10e   : > { %v603_v50 = vadd.f32 %v1257_v47, %v602_v48  ;;  %v667_v51 = vadd.f32 %v1257_v47, %v666_v49  ;;  %v604_v52 = vpop.f32.mrb[1].mxu0  ;;  %v668_v53 = vpop.f32.mrb[1].mxu1 }
 0x10f   : > { %v605_v54 = vpop.f32.mrb[2].mxu0  ;;  %v669_v55 = vpop.f32.mrb[2].mxu1 }
 0x110   : > { %1020 = vtanh.f32 %v603_v50  ;;  %v606_v56 = vadd.f32 %v1257_v47, %v605_v54  ;;  %v670_v57 = vadd.f32 %v1257_v47, %v669_v55  ;;  %v607_v58 = vpop.f32.mrb[3].mxu0  ;;  %v671_v59 = vpop.f32.mrb[3].mxu1 }
 0x111   : > { %1022 = vtanh.f32 %v667_v51 }
 0x112   : > { %1024 = vtanh.f32 %v606_v56 }
 0x113   : > { %1026 = vtanh.f32 %v670_v57 }
 0x115   : > { %v610_v60 = vpop.f32.mrb[4].mxu0  ;;  %v674_v61 = vpop.f32.mrb[4].mxu1 }
 0x116   : > { %v611_v62 = vadd.f32 %v1257_v47, %v610_v60  ;;  %v675_v63 = vadd.f32 %v1257_v47, %v674_v61  ;;  %v612_v0 = vpop.f32.mrb[5].mxu0  ;;  %v676_v1 = vpop.f32.mrb[5].mxu1 }
 0x117   : > { %v613_v2 = vpop.f32.mrb[6].mxu0  ;;  %v677_v3 = vpop.f32.mrb[6].mxu1 }
 0x118   : > { %1028 = vtanh.f32 %v611_v62  ;;  %v614_v4 = vadd.f32 %v1257_v47, %v613_v2  ;;  %v678_v5 = vadd.f32 %v1257_v47, %v677_v3  ;;  %v615_v6 = vpop.f32.mrb[7].mxu0  ;;  %v679_v7 = vpop.f32.mrb[7].mxu1 }
 0x119   : > { %1030 = vtanh.f32 %v675_v63 }
 0x11a   : > { %v1021_v8 = vpop.eup %1020  ;;  %1032 = vtanh.f32 %v614_v4 }
 0x11b   : > { %v1023_v9 = vpop.eup %1022  ;;  %761 = vst [vmem:[%s1270_s29] sm:$0xff] %v1021_v8  ;;  %1034 = vtanh.f32 %v678_v5 }
 0x11c   : > { %v1025_v10 = vpop.eup %1024  ;;  %777 = vst [vmem:[%s1270_s29 + $0x80] sm:$0xff] %v1023_v9 }
 0x11d   : > { %v1027_v11 = vpop.eup %1026  ;;  %762 = vst [vmem:[%s1270_s29 + $0x8] sm:$0xff] %v1025_v10  ;;  %v618_v12 = vpop.f32.mrb[8].mxu0 }
 0x11e   : > { %v682_v13 = vpop.f32.mrb[8].mxu1  ;;  %778 = vst [vmem:[%s1270_s29 + $0x88] sm:$0xff] %v1027_v11  ;;  %v619_v14 = vadd.f32 %v1257_v47, %v618_v12  ;;  %v620_v16 = vpop.f32.mrb[9].mxu0 }
 0x11f   : > { %v683_v15 = vadd.f32 %v1257_v47, %v682_v13  ;;  %v684_v17 = vpop.f32.mrb[9].mxu1  ;;  %v621_v18 = vpop.f32.mrb[10].mxu0 }
 0x120   : > { %v685_v19 = vpop.f32.mrb[10].mxu1  ;;  %1036 = vtanh.f32 %v619_v14  ;;  %v622_v20 = vadd.f32 %v1257_v47, %v621_v18  ;;  %v623_v22 = vpop.f32.mrb[11].mxu0 }
 0x121   : > { %v686_v21 = vadd.f32 %v1257_v47, %v685_v19  ;;  %v687_v23 = vpop.f32.mrb[11].mxu1  ;;  %1038 = vtanh.f32 %v683_v15 }
 0x122   : > { %v1029_v24 = vpop.eup %1028  ;;  %1040 = vtanh.f32 %v622_v20 }
 0x123   : > { %v1031_v25 = vpop.eup %1030  ;;  %763 = vst [vmem:[%s1270_s29 + $0x10] sm:$0xff] %v1029_v24  ;;  %1042 = vtanh.f32 %v686_v21 }
 0x124   : > { %v1033_v26 = vpop.eup %1032  ;;  %779 = vst [vmem:[%s1270_s29 + $0x90] sm:$0xff] %v1031_v25 }
 0x125   : > { %v1035_v27 = vpop.eup %1034  ;;  %764 = vst [vmem:[%s1270_s29 + $0x18] sm:$0xff] %v1033_v26  ;;  %v626_v28 = vpop.f32.mrb[12].mxu0 }
 0x126   : > { %v690_v29 = vpop.f32.mrb[12].mxu1  ;;  %780 = vst [vmem:[%s1270_s29 + $0x98] sm:$0xff] %v1035_v27  ;;  %v627_v30 = vadd.f32 %v1257_v47, %v626_v28  ;;  %v628_v32 = vpop.f32.mrb[13].mxu0 }
 0x127   : > { %v691_v31 = vadd.f32 %v1257_v47, %v690_v29  ;;  %v692_v33 = vpop.f32.mrb[13].mxu1  ;;  %v629_v34 = vpop.f32.mrb[14].mxu0 }
 0x128   : > { %v693_v35 = vpop.f32.mrb[14].mxu1  ;;  %1044 = vtanh.f32 %v627_v30  ;;  %v630_v36 = vadd.f32 %v1257_v47, %v629_v34  ;;  %v631_v38 = vpop.f32.mrb[15].mxu0 }
 0x129   : > { %v694_v37 = vadd.f32 %v1257_v47, %v693_v35  ;;  %v695_v39 = vpop.f32.mrb[15].mxu1  ;;  %1046 = vtanh.f32 %v691_v31 }
 0x12a   : > { %v1037_v40 = vpop.eup %1036  ;;  %1048 = vtanh.f32 %v630_v36 }
 0x12b   : > { %v1039_v41 = vpop.eup %1038  ;;  %765 = vst [vmem:[%s1270_s29 + $0x20] sm:$0xff] %v1037_v40  ;;  %1050 = vtanh.f32 %v694_v37 }
 0x12c   : > { %v1041_v42 = vpop.eup %1040  ;;  %781 = vst [vmem:[%s1270_s29 + $0xa0] sm:$0xff] %v1039_v41 }
 0x12d   : > { %v1043_v43 = vpop.eup %1042  ;;  %766 = vst [vmem:[%s1270_s29 + $0x28] sm:$0xff] %v1041_v42  ;;  %v634_v44 = vpop.f32.mrb[16].mxu0 }
 0x12e   : > { %v698_v45 = vpop.f32.mrb[16].mxu1  ;;  %782 = vst [vmem:[%s1270_s29 + $0xa8] sm:$0xff] %v1043_v43  ;;  %v635_v46 = vadd.f32 %v1257_v47, %v634_v44  ;;  %v636_v49 = vpop.f32.mrb[17].mxu0 }
 0x12f   : > { %v699_v48 = vadd.f32 %v1257_v47, %v698_v45  ;;  %v700_v50 = vpop.f32.mrb[17].mxu1  ;;  %v637_v51 = vpop.f32.mrb[18].mxu0 }
 0x130   : > { %v701_v52 = vpop.f32.mrb[18].mxu1  ;;  %1052 = vtanh.f32 %v635_v46  ;;  %v638_v53 = vadd.f32 %v1257_v47, %v637_v51  ;;  %v639_v55 = vpop.f32.mrb[19].mxu0 }
 0x131   : > { %v702_v54 = vadd.f32 %v1257_v47, %v701_v52  ;;  %v703_v56 = vpop.f32.mrb[19].mxu1  ;;  %1054 = vtanh.f32 %v699_v48 }
 0x132   : > { %v1045_v57 = vpop.eup %1044  ;;  %1056 = vtanh.f32 %v638_v53 }
 0x133   : > { %v1047_v58 = vpop.eup %1046  ;;  %767 = vst [vmem:[%s1270_s29 + $0x30] sm:$0xff] %v1045_v57  ;;  %1058 = vtanh.f32 %v702_v54 }
 0x134   : > { %v1049_v59 = vpop.eup %1048  ;;  %783 = vst [vmem:[%s1270_s29 + $0xb0] sm:$0xff] %v1047_v58 }
 0x135   : > { %v1051_v60 = vpop.eup %1050  ;;  %768 = vst [vmem:[%s1270_s29 + $0x38] sm:$0xff] %v1049_v59  ;;  %v642_v61 = vpop.f32.mrb[20].mxu0 }
 0x136   : > { %v706_v62 = vpop.f32.mrb[20].mxu1  ;;  %784 = vst [vmem:[%s1270_s29 + $0xb8] sm:$0xff] %v1051_v60  ;;  %v643_v63 = vadd.f32 %v1257_v47, %v642_v61  ;;  %v644_v1 = vpop.f32.mrb[21].mxu0 }
 0x137   : > { %v707_v0 = vadd.f32 %v1257_v47, %v706_v62  ;;  %v708_v2 = vpop.f32.mrb[21].mxu1  ;;  %v645_v3 = vpop.f32.mrb[22].mxu0 }
 0x138   : > { %v709_v4 = vpop.f32.mrb[22].mxu1  ;;  %1060 = vtanh.f32 %v643_v63  ;;  %v646_v5 = vadd.f32 %v1257_v47, %v645_v3  ;;  %v647_v7 = vpop.f32.mrb[23].mxu0 }
 0x139   : > { %v710_v6 = vadd.f32 %v1257_v47, %v709_v4  ;;  %v711_v8 = vpop.f32.mrb[23].mxu1  ;;  %1062 = vtanh.f32 %v707_v0 }
 0x13a   : > { %v1053_v9 = vpop.eup %1052  ;;  %1064 = vtanh.f32 %v646_v5 }
 0x13b   : > { %v1055_v10 = vpop.eup %1054  ;;  %769 = vst [vmem:[%s1270_s29 + $0x40] sm:$0xff] %v1053_v9  ;;  %1066 = vtanh.f32 %v710_v6 }
 0x13c   : > { %v1057_v11 = vpop.eup %1056  ;;  %785 = vst [vmem:[%s1270_s29 + $0xc0] sm:$0xff] %v1055_v10 }
 0x13d   : > { %v1059_v12 = vpop.eup %1058  ;;  %770 = vst [vmem:[%s1270_s29 + $0x48] sm:$0xff] %v1057_v11  ;;  %v650_v13 = vpop.f32.mrb[24].mxu0 }
 0x13e   : > { %v714_v14 = vpop.f32.mrb[24].mxu1  ;;  %786 = vst [vmem:[%s1270_s29 + $0xc8] sm:$0xff] %v1059_v12  ;;  %v651_v15 = vadd.f32 %v1257_v47, %v650_v13  ;;  %v652_v17 = vpop.f32.mrb[25].mxu0 }
 0x13f   : > { %v715_v16 = vadd.f32 %v1257_v47, %v714_v14  ;;  %v716_v18 = vpop.f32.mrb[25].mxu1  ;;  %v653_v19 = vpop.f32.mrb[26].mxu0 }
 0x140   : > { %v717_v20 = vpop.f32.mrb[26].mxu1  ;;  %1068 = vtanh.f32 %v651_v15  ;;  %v654_v21 = vadd.f32 %v1257_v47, %v653_v19  ;;  %v655_v23 = vpop.f32.mrb[27].mxu0 }
 0x141   : > { %v718_v22 = vadd.f32 %v1257_v47, %v717_v20  ;;  %v719_v24 = vpop.f32.mrb[27].mxu1  ;;  %1070 = vtanh.f32 %v715_v16 }
 0x142   : > { %v1061_v25 = vpop.eup %1060  ;;  %1072 = vtanh.f32 %v654_v21 }
 0x143   : > { %v1063_v26 = vpop.eup %1062  ;;  %771 = vst [vmem:[%s1270_s29 + $0x50] sm:$0xff] %v1061_v25  ;;  %1074 = vtanh.f32 %v718_v22 }
 0x144   : > { %v1065_v27 = vpop.eup %1064  ;;  %787 = vst [vmem:[%s1270_s29 + $0xd0] sm:$0xff] %v1063_v26 }
 0x145   : > { %v1067_v28 = vpop.eup %1066  ;;  %772 = vst [vmem:[%s1270_s29 + $0x58] sm:$0xff] %v1065_v27  ;;  %v658_v29 = vpop.f32.mrb[28].mxu0 }
 0x146   : > { %v722_v30 = vpop.f32.mrb[28].mxu1  ;;  %788 = vst [vmem:[%s1270_s29 + $0xd8] sm:$0xff] %v1067_v28  ;;  %v659_v31 = vadd.f32 %v1257_v47, %v658_v29  ;;  %v660_v33 = vpop.f32.mrb[29].mxu0 }
 0x147   : > { %v723_v32 = vadd.f32 %v1257_v47, %v722_v30  ;;  %v724_v34 = vpop.f32.mrb[29].mxu1  ;;  %v661_v35 = vpop.f32.mrb[30].mxu0 }
 0x148   : > { %v725_v36 = vpop.f32.mrb[30].mxu1  ;;  %1076 = vtanh.f32 %v659_v31  ;;  %v662_v37 = vadd.f32 %v1257_v47, %v661_v35  ;;  %v663_v39 = vpop.f32.mrb[31].mxu0 }
 0x149   : > { %v726_v38 = vadd.f32 %v1257_v47, %v725_v36  ;;  %v727_v40 = vpop.f32.mrb[31].mxu1  ;;  %1078 = vtanh.f32 %v723_v32 }
 0x14a   : > { %v1069_v41 = vpop.eup %1068  ;;  %1080 = vtanh.f32 %v662_v37 }
 0x14b   : > { %v1071_v42 = vpop.eup %1070  ;;  %773 = vst [vmem:[%s1270_s29 + $0x60] sm:$0xff] %v1069_v41  ;;  %1082 = vtanh.f32 %v726_v38 }
 0x14c   : > { %v1073_v43 = vpop.eup %1072  ;;  %789 = vst [vmem:[%s1270_s29 + $0xe0] sm:$0xff] %v1071_v42 }
 0x14d   : > { %v1075_v44 = vpop.eup %1074  ;;  %774 = vst [vmem:[%s1270_s29 + $0x68] sm:$0xff] %v1073_v43 }
 0x14e   : > { %790 = vst [vmem:[%s1270_s29 + $0xe8] sm:$0xff] %v1075_v44 }
 0x152   : > { %v1077_v45 = vpop.eup %1076 }
 0x153   : > { %v1079_v46 = vpop.eup %1078  ;;  %775 = vst [vmem:[%s1270_s29 + $0x70] sm:$0xff] %v1077_v45 }
 0x154   : > { %v1081_v47 = vpop.eup %1080  ;;  %791 = vst [vmem:[%s1270_s29 + $0xf0] sm:$0xff] %v1079_v46 }
 0x155   : > { %v1083_v48 = vpop.eup %1082  ;;  %776 = vst [vmem:[%s1270_s29 + $0x78] sm:$0xff] %v1081_v47 }
 0x156   : > { %792 = vst [vmem:[%s1270_s29 + $0xf8] sm:$0xff] %v1083_v48 }
 0x157 PF: > { %s15_s18 = sadd.s32 1, %s1090_s18  }
 0x158   : > { %p12_p4 = scmp.ge.s32.totalorder %s15_s18, 4  }
 0x15a   :  { %14 = sbr.rel (!%p12_p4) target bundleno = 1 (0x1), region = 70 }

</bundles_post_ra>
